<compile_context>
chip_gen: v7x
topology: tpu7x:2x2x1
jax: 0.10.0
libtpu: 0.0.40
codegen_flags: <defaults>
</compile_context>

<pallas_src>
import functools

import jax
import jax.numpy as jnp
from jax import lax
from jax.experimental import pallas as pl
from jax.experimental.pallas import tpu as pltpu


def _round_up(x, m):
    return (x + m - 1) // m * m


def _make_convtrans_kernel(kH, kW, stride, ph, pw, H, W, C_in, H_out, W_out):
    """Stride-1 correlation of the VMEM-resident zero-upsampled input with the
    spatially-flipped kernel, done as a single im2col matmul + bias + ReLU."""
    H_pad = H_out + kH - 1
    W_pad = W_out + kW - 1
    M = H_out * W_out

    def kernel(x_ref, w_ref, b_ref, o_ref, xw_ref, xu_ref):
        # x_ref : (H, W, C_in)          bf16  compact input, one batch element
        # w_ref : (kH*kW*C_in, C_pad)   bf16  flipped weights, C_out padded to 128 lanes
        # b_ref : (1, C_pad)            f32
        # o_ref : (M, C_pad)            f32   lane-dense output slab
        # xw_ref: (H, W_pad, C_in)      bf16  scratch: width-upsampled rows
        # xu_ref: (H_pad, W_pad, C_in)  bf16  scratch: fully upsampled + padded input

        # ---- zero-upsample + pad entirely in VMEM (nothing dilated touches HBM) ----
        xw_ref[...] = jnp.zeros_like(xw_ref)
        xu_ref[...] = jnp.zeros_like(xu_ref)
        for j in range(W):                       # width: column j -> pw + j*stride
            v = pw + j * stride
            xw_ref[:, v:v + 1, :] = x_ref[:, j:j + 1, :]
        for i in range(H):                       # height: row i -> ph + i*stride
            u = ph + i * stride
            xu_ref[u:u + 1, :, :] = xw_ref[i:i + 1, :, :]

        # ---- im2col: build the (M, kH*kW*C_in) patch matrix once ----
        cols = []
        for kh in range(kH):
            for kw in range(kW):
                win = xu_ref[kh:kh + H_out, kw:kw + W_out, :]   # (H_out, W_out, C_in)
                cols.append(win.reshape(M, C_in))               # leading-dim merge only
        patch = jnp.concatenate(cols, axis=-1)                  # (M, kH*kW*C_in) bf16

        # ---- one MXU matmul with f32 accumulation; bias + ReLU epilogue in f32 ----
        acc = jnp.dot(patch, w_ref[...], preferred_element_type=jnp.float32)
        acc = jnp.maximum(acc + b_ref[...], 0.0)
        o_ref[...] = acc.astype(o_ref.dtype)                    # unmasked 128-lane stores

    return kernel


def convtrans2d_block(x_nchw, weight, bias, *, stride=1, padding=0, output_padding=0):
    """Forward of ConvTrans2dBlock: relu(conv_transpose2d(x, weight, bias))."""
    C_in, C_out, kH, kW = weight.shape     # PyTorch ConvTranspose2d layout (Cin, Cout, kH, kW)
    N, _, H, W = x_nchw.shape
    H_out = (H - 1) * stride - 2 * padding + kH + output_padding
    W_out = (W - 1) * stride - 2 * padding + kW + output_padding
    ph, pw = kH - 1 - padding, kW - 1 - padding
    assert ph >= 0 and pw >= 0, "padding > kernel_size-1 not supported by this kernel"

    M = H_out * W_out
    K = kH * kW * C_in
    C_pad = _round_up(C_out, 128)          # lane-dense output via channel padding

    # ---- wrapper glue (cheap): NHWC + bf16 cast, flipped weights as one matmul slab ----
    # TODO(synk): keep activations NHWC across the whole model to drop this transpose.
    x = jnp.transpose(x_nchw, (0, 2, 3, 1)).astype(jnp.bfloat16)        # (N, H, W, Cin)
    w_flip = weight[:, :, ::-1, ::-1]                                    # flip spatial taps
    w_mat = jnp.transpose(w_flip, (2, 3, 0, 1)).reshape(K, C_out)        # (kh,kw,ci) rows
    w_mat = jnp.pad(w_mat, ((0, 0), (0, C_pad - C_out))).astype(jnp.bfloat16)
    b_mat = jnp.pad(bias.reshape(1, C_out), ((0, 0), (0, C_pad - C_out))).astype(jnp.float32)

    # rough per-program VMEM budget check (one block per image)
    H_pad, W_pad = H_out + kH - 1, W_out + kW - 1
    vmem_est = (2 * M * C_pad * 4 + M * (K + C_pad) * 4
                + (H * W_pad + H_pad * W_pad) * C_in * 2)
    assert vmem_est < 24 * 1024 * 1024, "feature map too large for the per-image block"
    # TODO(synk): for large feature maps, tile H_out over the grid with (kH-1)-row halos.

    out_padded = pl.pallas_call(
        _make_convtrans_kernel(kH, kW, stride, ph, pw, H, W, C_in, H_out, W_out),
        out_shape=jax.ShapeDtypeStruct((N, M, C_pad), jnp.float32),
        grid=(N,),
        in_specs=[
            pl.BlockSpec((None, H, W, C_in), lambda n: (n, 0, 0, 0)),   # compact x
            pl.BlockSpec((K, C_pad), lambda n: (0, 0)),                 # weights (resident)
            pl.BlockSpec((1, C_pad), lambda n: (0, 0)),                 # bias
        ],
        out_specs=pl.BlockSpec((None, M, C_pad), lambda n: (n, 0, 0)),
        scratch_shapes=[
            pltpu.VMEM((H, W_pad, C_in), jnp.bfloat16),
            pltpu.VMEM((H_pad, W_pad, C_in), jnp.bfloat16),
        ],
        compiler_params=pltpu.CompilerParams(
            dimension_semantics=("parallel",),
            vmem_limit_bytes=32 * 1024 * 1024,
        ),
    )(x, w_mat, b_mat)

    # strip the lane padding and restore NCHW
    out = out_padded[:, :, :C_out].reshape(N, H_out, W_out, C_out)
    return jnp.transpose(out, (0, 3, 1, 2))


def kaiming_uniform(key, shape):
    # PyTorch kaiming_uniform_(nonlinearity='relu') on a ConvTranspose2d weight
    # (Cin, Cout, kH, kW): fan_in = shape[1] * kH * kW, gain = sqrt(2).
    fan_in = shape[1] * shape[2] * shape[3]
    bound = (2.0 ** 0.5) * (3.0 / fan_in) ** 0.5
    return jax.random.uniform(key, shape, jnp.float32, -bound, bound)


if __name__ == "__main__":
    key = jax.random.PRNGKey(0)
    kx, kw = jax.random.split(key)

    # ConvTrans2dBlock(in_channels=4, out_channels=8, kernel_size=3,
    #                  stride=2, padding=1, output_padding=1)
    N, C_in, C_out, H, W = 2, 4, 8, 8, 8
    kH = kW = 3
    stride, padding, output_padding = 2, 1, 1

    x = jax.random.normal(kx, (N, C_in, H, W), jnp.float32)
    weight = kaiming_uniform(kw, (C_in, C_out, kH, kW))
    bias = jnp.zeros((C_out,), jnp.float32)                    # nn.init.zeros_

    fwd = jax.jit(functools.partial(convtrans2d_block, stride=stride,
                                    padding=padding, output_padding=output_padding))
    out = jax.block_until_ready(fwd(x, weight, bias))

    # cross-check against XLA's dilated conv on the same bf16-rounded operands
    x_bf = x.astype(jnp.bfloat16).astype(jnp.float32)
    w_bf = weight.astype(jnp.bfloat16).astype(jnp.float32)
    ref = lax.conv_general_dilated(
        x_bf, jnp.transpose(w_bf[:, :, ::-1, ::-1], (1, 0, 2, 3)),
        window_strides=(1, 1),
        padding=[(kH - 1 - padding, kH - 1 - padding + output_padding),
                 (kW - 1 - padding, kW - 1 - padding + output_padding)],
        lhs_dilation=(stride, stride),
        dimension_numbers=("NCHW", "OIHW", "NCHW"),
        preferred_element_type=jnp.float32)
    ref = jnp.maximum(ref + bias[None, :, None, None], 0.0)

    H_out = (H - 1) * stride - 2 * padding + kH + output_padding
    W_out = (W - 1) * stride - 2 * padding + kW + output_padding
    assert out.shape == (N, C_out, H_out, W_out)
    assert jnp.allclose(out, ref, atol=2e-3, rtol=2e-3), float(jnp.max(jnp.abs(out - ref)))
    print("KERNEL_OK")
</pallas_src>

<mosaic_0001>
module attributes {stable_mosaic.version = 11 : i64} {
  func.func @kernel(%arg0: i32, %arg1: memref<1x8x8x4xbf16, #tpu.memory_space<vmem>>, %arg2: memref<36x128xbf16, #tpu.memory_space<vmem>>, %arg3: memref<1x128xf32, #tpu.memory_space<vmem>>, %arg4: memref<1x256x128xf32, #tpu.memory_space<vmem>>, %arg5: memref<8x18x4xbf16, #tpu.memory_space<vmem>>, %arg6: memref<18x18x4xbf16, #tpu.memory_space<vmem>>) attributes {dimension_semantics = [#tpu.dimension_semantics<parallel>], iteration_bounds = array<i64: 2>, scalar_prefetch = 0 : i64, scratch_operands = 2 : i64, tpu.core_type = #tpu.core_type<tc>, window_params = [{transform_indices = @transform_0, window_bounds = array<i64: 1, 8, 8, 4>}, {pipeline_mode = #tpu.pipeline_mode<synchronous>, transform_indices = @transform_1, window_bounds = array<i64: 36, 128>}, {pipeline_mode = #tpu.pipeline_mode<synchronous>, transform_indices = @transform_2, window_bounds = array<i64: 1, 128>}, {transform_indices = @transform_3, window_bounds = array<i64: 1, 256, 128>}]} {
    %cst = arith.constant 0.000000e+00 : bf16
    %0 = vector.broadcast %cst : bf16 to vector<8x18x4xbf16>
    %c0 = arith.constant 0 : index
    %c0_0 = arith.constant 0 : index
    %c0_1 = arith.constant 0 : index
    %1 = vector.load %arg5[%c0, %c0_0, %c0_1] : memref<8x18x4xbf16, #tpu.memory_space<vmem>>, vector<8x18x4xbf16>
    tpu.vector_store %arg5[%c0, %c0_0, %c0_1], %0 {strides = array<i32>} : memref<8x18x4xbf16, #tpu.memory_space<vmem>>, vector<8x18x4xbf16>,
    %cst_2 = arith.constant 0.000000e+00 : bf16
    %2 = vector.broadcast %cst_2 : bf16 to vector<18x18x4xbf16>
    %c0_3 = arith.constant 0 : index
    %c0_4 = arith.constant 0 : index
    %c0_5 = arith.constant 0 : index
    %3 = vector.load %arg6[%c0_3, %c0_4, %c0_5] : memref<18x18x4xbf16, #tpu.memory_space<vmem>>, vector<18x18x4xbf16>
    tpu.vector_store %arg6[%c0_3, %c0_4, %c0_5], %2 {strides = array<i32>} : memref<18x18x4xbf16, #tpu.memory_space<vmem>>, vector<18x18x4xbf16>,
    %c0_6 = arith.constant 0 : index
    %c0_7 = arith.constant 0 : index
    %c0_8 = arith.constant 0 : index
    %c0_9 = arith.constant 0 : index
    %4 = vector.load %arg1[%c0_6, %c0_7, %c0_8, %c0_9] : memref<1x8x8x4xbf16, #tpu.memory_space<vmem>>, vector<1x8x1x4xbf16>
    %5 = vector.shape_cast %4 : vector<1x8x1x4xbf16> to vector<8x1x4xbf16>
    %c0_10 = arith.constant 0 : index
    %c1 = arith.constant 1 : index
    %c0_11 = arith.constant 0 : index
    %6 = vector.load %arg5[%c0_10, %c1, %c0_11] : memref<8x18x4xbf16, #tpu.memory_space<vmem>>, vector<8x1x4xbf16>
    tpu.vector_store %arg5[%c0_10, %c1, %c0_11], %5 {strides = array<i32>} : memref<8x18x4xbf16, #tpu.memory_space<vmem>>, vector<8x1x4xbf16>,
    %c0_12 = arith.constant 0 : index
    %c0_13 = arith.constant 0 : index
    %c1_14 = arith.constant 1 : index
    %c0_15 = arith.constant 0 : index
    %7 = vector.load %arg1[%c0_12, %c0_13, %c1_14, %c0_15] : memref<1x8x8x4xbf16, #tpu.memory_space<vmem>>, vector<1x8x1x4xbf16>
    %8 = vector.shape_cast %7 : vector<1x8x1x4xbf16> to vector<8x1x4xbf16>
    %c0_16 = arith.constant 0 : index
    %c3 = arith.constant 3 : index
    %c0_17 = arith.constant 0 : index
    %9 = vector.load %arg5[%c0_16, %c3, %c0_17] : memref<8x18x4xbf16, #tpu.memory_space<vmem>>, vector<8x1x4xbf16>
    tpu.vector_store %arg5[%c0_16, %c3, %c0_17], %8 {strides = array<i32>} : memref<8x18x4xbf16, #tpu.memory_space<vmem>>, vector<8x1x4xbf16>,
    %c0_18 = arith.constant 0 : index
    %c0_19 = arith.constant 0 : index
    %c2 = arith.constant 2 : index
    %c0_20 = arith.constant 0 : index
    %10 = vector.load %arg1[%c0_18, %c0_19, %c2, %c0_20] : memref<1x8x8x4xbf16, #tpu.memory_space<vmem>>, vector<1x8x1x4xbf16>
    %11 = vector.shape_cast %10 : vector<1x8x1x4xbf16> to vector<8x1x4xbf16>
    %c0_21 = arith.constant 0 : index
    %c5 = arith.constant 5 : index
    %c0_22 = arith.constant 0 : index
    %12 = vector.load %arg5[%c0_21, %c5, %c0_22] : memref<8x18x4xbf16, #tpu.memory_space<vmem>>, vector<8x1x4xbf16>
    tpu.vector_store %arg5[%c0_21, %c5, %c0_22], %11 {strides = array<i32>} : memref<8x18x4xbf16, #tpu.memory_space<vmem>>, vector<8x1x4xbf16>,
    %c0_23 = arith.constant 0 : index
    %c0_24 = arith.constant 0 : index
    %c3_25 = arith.constant 3 : index
    %c0_26 = arith.constant 0 : index
    %13 = vector.load %arg1[%c0_23, %c0_24, %c3_25, %c0_26] : memref<1x8x8x4xbf16, #tpu.memory_space<vmem>>, vector<1x8x1x4xbf16>
    %14 = vector.shape_cast %13 : vector<1x8x1x4xbf16> to vector<8x1x4xbf16>
    %c0_27 = arith.constant 0 : index
    %c7 = arith.constant 7 : index
    %c0_28 = arith.constant 0 : index
    %15 = vector.load %arg5[%c0_27, %c7, %c0_28] : memref<8x18x4xbf16, #tpu.memory_space<vmem>>, vector<8x1x4xbf16>
    tpu.vector_store %arg5[%c0_27, %c7, %c0_28], %14 {strides = array<i32>} : memref<8x18x4xbf16, #tpu.memory_space<vmem>>, vector<8x1x4xbf16>,
    %c0_29 = arith.constant 0 : index
    %c0_30 = arith.constant 0 : index
    %c4 = arith.constant 4 : index
    %c0_31 = arith.constant 0 : index
    %16 = vector.load %arg1[%c0_29, %c0_30, %c4, %c0_31] : memref<1x8x8x4xbf16, #tpu.memory_space<vmem>>, vector<1x8x1x4xbf16>
    %17 = vector.shape_cast %16 : vector<1x8x1x4xbf16> to vector<8x1x4xbf16>
    %c0_32 = arith.constant 0 : index
    %c9 = arith.constant 9 : index
    %c0_33 = arith.constant 0 : index
    %18 = vector.load %arg5[%c0_32, %c9, %c0_33] : memref<8x18x4xbf16, #tpu.memory_space<vmem>>, vector<8x1x4xbf16>
    tpu.vector_store %arg5[%c0_32, %c9, %c0_33], %17 {strides = array<i32>} : memref<8x18x4xbf16, #tpu.memory_space<vmem>>, vector<8x1x4xbf16>,
    %c0_34 = arith.constant 0 : index
    %c0_35 = arith.constant 0 : index
    %c5_36 = arith.constant 5 : index
    %c0_37 = arith.constant 0 : index
    %19 = vector.load %arg1[%c0_34, %c0_35, %c5_36, %c0_37] : memref<1x8x8x4xbf16, #tpu.memory_space<vmem>>, vector<1x8x1x4xbf16>
    %20 = vector.shape_cast %19 : vector<1x8x1x4xbf16> to vector<8x1x4xbf16>
    %c0_38 = arith.constant 0 : index
    %c11 = arith.constant 11 : index
    %c0_39 = arith.constant 0 : index
    %21 = vector.load %arg5[%c0_38, %c11, %c0_39] : memref<8x18x4xbf16, #tpu.memory_space<vmem>>, vector<8x1x4xbf16>
    tpu.vector_store %arg5[%c0_38, %c11, %c0_39], %20 {strides = array<i32>} : memref<8x18x4xbf16, #tpu.memory_space<vmem>>, vector<8x1x4xbf16>,
    %c0_40 = arith.constant 0 : index
    %c0_41 = arith.constant 0 : index
    %c6 = arith.constant 6 : index
    %c0_42 = arith.constant 0 : index
    %22 = vector.load %arg1[%c0_40, %c0_41, %c6, %c0_42] : memref<1x8x8x4xbf16, #tpu.memory_space<vmem>>, vector<1x8x1x4xbf16>
    %23 = vector.shape_cast %22 : vector<1x8x1x4xbf16> to vector<8x1x4xbf16>
    %c0_43 = arith.constant 0 : index
    %c13 = arith.constant 13 : index
    %c0_44 = arith.constant 0 : index
    %24 = vector.load %arg5[%c0_43, %c13, %c0_44] : memref<8x18x4xbf16, #tpu.memory_space<vmem>>, vector<8x1x4xbf16>
    tpu.vector_store %arg5[%c0_43, %c13, %c0_44], %23 {strides = array<i32>} : memref<8x18x4xbf16, #tpu.memory_space<vmem>>, vector<8x1x4xbf16>,
    %c0_45 = arith.constant 0 : index
    %c0_46 = arith.constant 0 : index
    %c7_47 = arith.constant 7 : index
    %c0_48 = arith.constant 0 : index
    %25 = vector.load %arg1[%c0_45, %c0_46, %c7_47, %c0_48] : memref<1x8x8x4xbf16, #tpu.memory_space<vmem>>, vector<1x8x1x4xbf16>
    %26 = vector.shape_cast %25 : vector<1x8x1x4xbf16> to vector<8x1x4xbf16>
    %c0_49 = arith.constant 0 : index
    %c15 = arith.constant 15 : index
    %c0_50 = arith.constant 0 : index
    %27 = vector.load %arg5[%c0_49, %c15, %c0_50] : memref<8x18x4xbf16, #tpu.memory_space<vmem>>, vector<8x1x4xbf16>
    tpu.vector_store %arg5[%c0_49, %c15, %c0_50], %26 {strides = array<i32>} : memref<8x18x4xbf16, #tpu.memory_space<vmem>>, vector<8x1x4xbf16>,
    %c0_51 = arith.constant 0 : index
    %c0_52 = arith.constant 0 : index
    %c0_53 = arith.constant 0 : index
    %28 = vector.load %arg5[%c0_51, %c0_52, %c0_53] : memref<8x18x4xbf16, #tpu.memory_space<vmem>>, vector<1x18x4xbf16>
    %c1_54 = arith.constant 1 : index
    %c0_55 = arith.constant 0 : index
    %c0_56 = arith.constant 0 : index
    %29 = vector.load %arg6[%c1_54, %c0_55, %c0_56] : memref<18x18x4xbf16, #tpu.memory_space<vmem>>, vector<1x18x4xbf16>
    tpu.vector_store %arg6[%c1_54, %c0_55, %c0_56], %28 {strides = array<i32>} : memref<18x18x4xbf16, #tpu.memory_space<vmem>>, vector<1x18x4xbf16>,
    %c1_57 = arith.constant 1 : index
    %c0_58 = arith.constant 0 : index
    %c0_59 = arith.constant 0 : index
    %30 = vector.load %arg5[%c1_57, %c0_58, %c0_59] : memref<8x18x4xbf16, #tpu.memory_space<vmem>>, vector<1x18x4xbf16>
    %c3_60 = arith.constant 3 : index
    %c0_61 = arith.constant 0 : index
    %c0_62 = arith.constant 0 : index
    %31 = vector.load %arg6[%c3_60, %c0_61, %c0_62] : memref<18x18x4xbf16, #tpu.memory_space<vmem>>, vector<1x18x4xbf16>
    tpu.vector_store %arg6[%c3_60, %c0_61, %c0_62], %30 {strides = array<i32>} : memref<18x18x4xbf16, #tpu.memory_space<vmem>>, vector<1x18x4xbf16>,
    %c2_63 = arith.constant 2 : index
    %c0_64 = arith.constant 0 : index
    %c0_65 = arith.constant 0 : index
    %32 = vector.load %arg5[%c2_63, %c0_64, %c0_65] : memref<8x18x4xbf16, #tpu.memory_space<vmem>>, vector<1x18x4xbf16>
    %c5_66 = arith.constant 5 : index
    %c0_67 = arith.constant 0 : index
    %c0_68 = arith.constant 0 : index
    %33 = vector.load %arg6[%c5_66, %c0_67, %c0_68] : memref<18x18x4xbf16, #tpu.memory_space<vmem>>, vector<1x18x4xbf16>
    tpu.vector_store %arg6[%c5_66, %c0_67, %c0_68], %32 {strides = array<i32>} : memref<18x18x4xbf16, #tpu.memory_space<vmem>>, vector<1x18x4xbf16>,
    %c3_69 = arith.constant 3 : index
    %c0_70 = arith.constant 0 : index
    %c0_71 = arith.constant 0 : index
    %34 = vector.load %arg5[%c3_69, %c0_70, %c0_71] : memref<8x18x4xbf16, #tpu.memory_space<vmem>>, vector<1x18x4xbf16>
    %c7_72 = arith.constant 7 : index
    %c0_73 = arith.constant 0 : index
    %c0_74 = arith.constant 0 : index
    %35 = vector.load %arg6[%c7_72, %c0_73, %c0_74] : memref<18x18x4xbf16, #tpu.memory_space<vmem>>, vector<1x18x4xbf16>
    tpu.vector_store %arg6[%c7_72, %c0_73, %c0_74], %34 {strides = array<i32>} : memref<18x18x4xbf16, #tpu.memory_space<vmem>>, vector<1x18x4xbf16>,
    %c4_75 = arith.constant 4 : index
    %c0_76 = arith.constant 0 : index
    %c0_77 = arith.constant 0 : index
    %36 = vector.load %arg5[%c4_75, %c0_76, %c0_77] : memref<8x18x4xbf16, #tpu.memory_space<vmem>>, vector<1x18x4xbf16>
    %c9_78 = arith.constant 9 : index
    %c0_79 = arith.constant 0 : index
    %c0_80 = arith.constant 0 : index
    %37 = vector.load %arg6[%c9_78, %c0_79, %c0_80] : memref<18x18x4xbf16, #tpu.memory_space<vmem>>, vector<1x18x4xbf16>
    tpu.vector_store %arg6[%c9_78, %c0_79, %c0_80], %36 {strides = array<i32>} : memref<18x18x4xbf16, #tpu.memory_space<vmem>>, vector<1x18x4xbf16>,
    %c5_81 = arith.constant 5 : index
    %c0_82 = arith.constant 0 : index
    %c0_83 = arith.constant 0 : index
    %38 = vector.load %arg5[%c5_81, %c0_82, %c0_83] : memref<8x18x4xbf16, #tpu.memory_space<vmem>>, vector<1x18x4xbf16>
    %c11_84 = arith.constant 11 : index
    %c0_85 = arith.constant 0 : index
    %c0_86 = arith.constant 0 : index
    %39 = vector.load %arg6[%c11_84, %c0_85, %c0_86] : memref<18x18x4xbf16, #tpu.memory_space<vmem>>, vector<1x18x4xbf16>
    tpu.vector_store %arg6[%c11_84, %c0_85, %c0_86], %38 {strides = array<i32>} : memref<18x18x4xbf16, #tpu.memory_space<vmem>>, vector<1x18x4xbf16>,
    %c6_87 = arith.constant 6 : index
    %c0_88 = arith.constant 0 : index
    %c0_89 = arith.constant 0 : index
    %40 = vector.load %arg5[%c6_87, %c0_88, %c0_89] : memref<8x18x4xbf16, #tpu.memory_space<vmem>>, vector<1x18x4xbf16>
    %c13_90 = arith.constant 13 : index
    %c0_91 = arith.constant 0 : index
    %c0_92 = arith.constant 0 : index
    %41 = vector.load %arg6[%c13_90, %c0_91, %c0_92] : memref<18x18x4xbf16, #tpu.memory_space<vmem>>, vector<1x18x4xbf16>
    tpu.vector_store %arg6[%c13_90, %c0_91, %c0_92], %40 {strides = array<i32>} : memref<18x18x4xbf16, #tpu.memory_space<vmem>>, vector<1x18x4xbf16>,
    %c7_93 = arith.constant 7 : index
    %c0_94 = arith.constant 0 : index
    %c0_95 = arith.constant 0 : index
    %42 = vector.load %arg5[%c7_93, %c0_94, %c0_95] : memref<8x18x4xbf16, #tpu.memory_space<vmem>>, vector<1x18x4xbf16>
    %c15_96 = arith.constant 15 : index
    %c0_97 = arith.constant 0 : index
    %c0_98 = arith.constant 0 : index
    %43 = vector.load %arg6[%c15_96, %c0_97, %c0_98] : memref<18x18x4xbf16, #tpu.memory_space<vmem>>, vector<1x18x4xbf16>
    tpu.vector_store %arg6[%c15_96, %c0_97, %c0_98], %42 {strides = array<i32>} : memref<18x18x4xbf16, #tpu.memory_space<vmem>>, vector<1x18x4xbf16>,
    %c0_99 = arith.constant 0 : index
    %c0_100 = arith.constant 0 : index
    %c0_101 = arith.constant 0 : index
    %44 = vector.load %arg6[%c0_99, %c0_100, %c0_101] : memref<18x18x4xbf16, #tpu.memory_space<vmem>>, vector<16x16x4xbf16>
    %45 = vector.shape_cast %44 : vector<16x16x4xbf16> to vector<256x4xbf16>
    %c0_102 = arith.constant 0 : index
    %c1_103 = arith.constant 1 : index
    %c0_104 = arith.constant 0 : index
    %46 = vector.load %arg6[%c0_102, %c1_103, %c0_104] : memref<18x18x4xbf16, #tpu.memory_space<vmem>>, vector<16x16x4xbf16>
    %47 = vector.shape_cast %46 : vector<16x16x4xbf16> to vector<256x4xbf16>
    %c0_105 = arith.constant 0 : index
    %c2_106 = arith.constant 2 : index
    %c0_107 = arith.constant 0 : index
    %48 = vector.load %arg6[%c0_105, %c2_106, %c0_107] : memref<18x18x4xbf16, #tpu.memory_space<vmem>>, vector<16x16x4xbf16>
    %49 = vector.shape_cast %48 : vector<16x16x4xbf16> to vector<256x4xbf16>
    %c1_108 = arith.constant 1 : index
    %c0_109 = arith.constant 0 : index
    %c0_110 = arith.constant 0 : index
    %50 = vector.load %arg6[%c1_108, %c0_109, %c0_110] : memref<18x18x4xbf16, #tpu.memory_space<vmem>>, vector<16x16x4xbf16>
    %51 = vector.shape_cast %50 : vector<16x16x4xbf16> to vector<256x4xbf16>
    %c1_111 = arith.constant 1 : index
    %c1_112 = arith.constant 1 : index
    %c0_113 = arith.constant 0 : index
    %52 = vector.load %arg6[%c1_111, %c1_112, %c0_113] : memref<18x18x4xbf16, #tpu.memory_space<vmem>>, vector<16x16x4xbf16>
    %53 = vector.shape_cast %52 : vector<16x16x4xbf16> to vector<256x4xbf16>
    %c1_114 = arith.constant 1 : index
    %c2_115 = arith.constant 2 : index
    %c0_116 = arith.constant 0 : index
    %54 = vector.load %arg6[%c1_114, %c2_115, %c0_116] : memref<18x18x4xbf16, #tpu.memory_space<vmem>>, vector<16x16x4xbf16>
    %55 = vector.shape_cast %54 : vector<16x16x4xbf16> to vector<256x4xbf16>
    %c2_117 = arith.constant 2 : index
    %c0_118 = arith.constant 0 : index
    %c0_119 = arith.constant 0 : index
    %56 = vector.load %arg6[%c2_117, %c0_118, %c0_119] : memref<18x18x4xbf16, #tpu.memory_space<vmem>>, vector<16x16x4xbf16>
    %57 = vector.shape_cast %56 : vector<16x16x4xbf16> to vector<256x4xbf16>
    %c2_120 = arith.constant 2 : index
    %c1_121 = arith.constant 1 : index
    %c0_122 = arith.constant 0 : index
    %58 = vector.load %arg6[%c2_120, %c1_121, %c0_122] : memref<18x18x4xbf16, #tpu.memory_space<vmem>>, vector<16x16x4xbf16>
    %59 = vector.shape_cast %58 : vector<16x16x4xbf16> to vector<256x4xbf16>
    %c2_123 = arith.constant 2 : index
    %c2_124 = arith.constant 2 : index
    %c0_125 = arith.constant 0 : index
    %60 = vector.load %arg6[%c2_123, %c2_124, %c0_125] : memref<18x18x4xbf16, #tpu.memory_space<vmem>>, vector<16x16x4xbf16>
    %61 = vector.shape_cast %60 : vector<16x16x4xbf16> to vector<256x4xbf16>
    %62 = tpu.concatenate %45, %47, %49, %51, %53, %55, %57, %59, %61 in 1 : vector<256x4xbf16>, vector<256x4xbf16>, vector<256x4xbf16>, vector<256x4xbf16>, vector<256x4xbf16>, vector<256x4xbf16>, vector<256x4xbf16>, vector<256x4xbf16>, vector<256x4xbf16> -> vector<256x36xbf16>
    %c0_126 = arith.constant 0 : index
    %c0_127 = arith.constant 0 : index
    %63 = vector.load %arg2[%c0_126, %c0_127] : memref<36x128xbf16, #tpu.memory_space<vmem>>, vector<36x128xbf16>
    %cst_128 = arith.constant dense<0.000000e+00> : vector<256x128xf32>
    %64 = tpu.matmul %62, %63, %cst_128 {dimension_numbers = #tpu.dot_dimension_numbers<[1], [0], [0], [1], [0, 0, 1, 1], [], []>} : vector<256x36xbf16>, vector<36x128xbf16>, vector<256x128xf32> -> vector<256x128xf32>
    %c0_129 = arith.constant 0 : index
    %c0_130 = arith.constant 0 : index
    %65 = vector.load %arg3[%c0_129, %c0_130] : memref<1x128xf32, #tpu.memory_space<vmem>>, vector<1x128xf32>
    %66 = vector.broadcast %65 : vector<1x128xf32> to vector<256x128xf32>
    %67 = arith.addf %64, %66 : vector<256x128xf32>
    %cst_131 = arith.constant 0.000000e+00 : f32
    %68 = vector.broadcast %cst_131 : f32 to vector<256x128xf32>
    %69 = arith.maximumf %67, %68 : vector<256x128xf32>
    %c0_132 = arith.constant 0 : index
    %c0_133 = arith.constant 0 : index
    %c0_134 = arith.constant 0 : index
    %70 = vector.load %arg4[%c0_132, %c0_133, %c0_134] : memref<1x256x128xf32, #tpu.memory_space<vmem>>, vector<1x256x128xf32>
    %71 = vector.shape_cast %70 : vector<1x256x128xf32> to vector<256x128xf32>
    %72 = vector.shape_cast %69 : vector<256x128xf32> to vector<1x256x128xf32>
    tpu.vector_store %arg4[%c0_132, %c0_133, %c0_134], %72 {strides = array<i32>} : memref<1x256x128xf32, #tpu.memory_space<vmem>>, vector<1x256x128xf32>,
    return
  }
  func.func @transform_0(%arg0: i32) -> (i32, i32, i32, i32) {
    %c0_i32 = arith.constant 0 : i32
    %c0_i32_0 = arith.constant 0 : i32
    %c0_i32_1 = arith.constant 0 : i32
    %c0_i32_2 = arith.constant 0 : i32
    return %arg0, %c0_i32, %c0_i32_0, %c0_i32_1 : i32, i32, i32, i32
  }
  func.func @transform_1(%arg0: i32) -> (i32, i32) {
    %c0_i32 = arith.constant 0 : i32
    %c0_i32_0 = arith.constant 0 : i32
    %c0_i32_1 = arith.constant 0 : i32
    return %c0_i32, %c0_i32_0 : i32, i32
  }
  func.func @transform_2(%arg0: i32) -> (i32, i32) {
    %c0_i32 = arith.constant 0 : i32
    %c0_i32_0 = arith.constant 0 : i32
    %c0_i32_1 = arith.constant 0 : i32
    return %c0_i32, %c0_i32_0 : i32, i32
  }
  func.func @transform_3(%arg0: i32) -> (i32, i32, i32) {
    %c0_i32 = arith.constant 0 : i32
    %c0_i32_0 = arith.constant 0 : i32
    %c0_i32_1 = arith.constant 0 : i32
    return %arg0, %c0_i32, %c0_i32_0 : i32, i32, i32
  }
}

</mosaic_0001>

<bundles_post_ra>
// kernel: convtrans2d_block.1
= control target key start
LH: loop header
LB: loop body
LE: loop exit
PB: predicated region body
PF: predicated region fallthrough
CT: control target
= control target key end

     0   :  { %s4457_s12 = smov 0   ;;  %s6701_s0 = inlined_call_operand.vmem [shape: bf16[2,8,8,4], index: 0, kind: input, shape index: {}]   ;;  %s6702_s1 = inlined_call_operand.vmem [shape: bf16[36,128], index: 1, kind: input, shape index: {}]   ;;  %s6703_s2 = inlined_call_operand.vmem [shape: f32[1,128], index: 2, kind: input, shape index: {}]   ;;  %s6704_s3 = inlined_call_operand.vmem [shape: f32[2,256,128], index: 3, kind: output, shape index: {}]  }
   0x1 LB: > { %s4022_s13 = sadd.s32 4294967295, %s4426_s12   ;;  %p4026_p0 = scmp.ge.s32.totalorder %s4426_s12, 1  ;;  %s4426_s12 = sphi %s4457_s12, %s13_s12  }
   0x2   : > { %p137_p1 = scmp.lt.s32.totalorder %s4426_s12, 3 }
   0x4   : > { %p138_p2 = pnand %p4026_p0, %p137_p1 }
   0x5   : > { %vm172_vm0 = vcmask (!%p138_p2), 27648   ;;  %vm175_vm1 = vcmask (!%p138_p2), 24576   ;;  %v4428_v0 = vmov (!%p138_p2), 0   ;;  %vm1330_vm2 = vcmask (!%p138_p2), 1042432   ;;  %p4635_p3 = scmp.lt.s32.totalorder (!%p138_p2), %s4022_s13, 1  ;;  %s4429_s15 = smov (!%p138_p2), 12  }
   0x6   : > { %141 = sbr.rel (%p138_p2) target bundleno = 755 (0x2f3), region = 32  ;;  %204 = vst.msk [vmem:[#allocation3 + $0x18] sm:$0xf] (!%p138_p2), %vm172_vm0, %v4428_v0  ;;  %205 = vst.msk [vmem:[#allocation3 + $0x1c] sm:$0xf] (!%p138_p2), %vm172_vm0, %v4428_v0  ;;  %vm1331_vm3 = vcmask (!%p138_p2), 1046532  }
   0x7   : > { %173 = vst.msk [vmem:[#allocation2] sm:$0xf] (!%p138_p2), %vm172_vm0, %v4428_v0  ;;  %174 = vst.msk [vmem:[#allocation2 + $0x4] sm:$0xf] (!%p138_p2), %vm172_vm0, %v4428_v0  ;;  %vm879_vm5 = vsmask.f32 (!%p138_p2), 3328 }
   0x8   : > { %177 = vst.msk [vmem:[#allocation2 + $0xc] sm:$0xf] (!%p138_p2), %vm172_vm0, %v4428_v0  ;;  %178 = vst.msk [vmem:[#allocation2 + $0x10] sm:$0xf] (!%p138_p2), %vm172_vm0, %v4428_v0  ;;  %vm880_vm6 = vsmask.f32 (!%p138_p2), 7440 }
   0x9   : > { %180 = vst.msk [vmem:[#allocation2 + $0x18] sm:$0xf] (!%p138_p2), %vm172_vm0, %v4428_v0  ;;  %181 = vst.msk [vmem:[#allocation2 + $0x1c] sm:$0xf] (!%p138_p2), %vm172_vm0, %v4428_v0  ;;  %vm293_vm7 = vsmask.f32 (!%p138_p2), 7938 }
   0xa   : > { %183 = vst.msk [vmem:[#allocation2 + $0x24] sm:$0xf] (!%p138_p2), %vm172_vm0, %v4428_v0  ;;  %184 = vst.msk [vmem:[#allocation2 + $0x28] sm:$0xf] (!%p138_p2), %vm172_vm0, %v4428_v0  ;;  %vm351_vm8 = vcmask (!%p138_p2), 25601   ;;  %s4430_s16 = smov (!%p138_p2), 8  }
   0xb   : > { %186 = vst.msk [vmem:[#allocation2 + $0x30] sm:$0xf] (!%p138_p2), %vm172_vm0, %v4428_v0  ;;  %187 = vst.msk [vmem:[#allocation2 + $0x34] sm:$0xf] (!%p138_p2), %vm172_vm0, %v4428_v0  ;;  %vm352_vm9 = vsmask.f32 (!%p138_p2), 7942 }
   0xc   : > { %189 = vst.msk [vmem:[#allocation2 + $0x3c] sm:$0xf] (!%p138_p2), %vm172_vm0, %v4428_v0  ;;  %190 = vst.msk [vmem:[#allocation2 + $0x40] sm:$0xf] (!%p138_p2), %vm172_vm0, %v4428_v0  ;;  %vm485_vm10 = vcmask (!%p138_p2), 27651   ;;  %vm426_vm12 = vcmask (!%p138_p2), 26626  }
   0xd   : > { %192 = vst.msk [vmem:[#allocation2 + $0x48] sm:$0xf] %vm172_vm0, %v4428_v0  ;;  %193 = vst.msk [vmem:[#allocation2 + $0x4c] sm:$0xf] %vm172_vm0, %v4428_v0  ;;  %v1447_v1 = vld [vmem:[#allocation3 + $0x18] sm:$0xf] }
   0xe   : > { %195 = vst.msk [vmem:[#allocation2 + $0x54] sm:$0xf] %vm172_vm0, %v4428_v0  ;;  %196 = vst.msk [vmem:[#allocation2 + $0x58] sm:$0xf] %vm172_vm0, %v4428_v0  ;;  %v4621_v2 = vld [vmem:[#allocation3 + $0x1c] sm:$0xf] }
   0xf   : > { %198 = vst.msk [vmem:[#allocation3] sm:$0xf] %vm172_vm0, %v4428_v0  ;;  %199 = vst.msk [vmem:[#allocation3 + $0x4] sm:$0xf] %vm172_vm0, %v4428_v0  ;;  %v1527_v4 = vshll.u32 %v4621_v2, 16  ;;  %v1531_v5 = vshrl.u32 %v4621_v2, 16  ;;  %v4152_v6 = vcombine.low %v1447_v1, %v4621_v2 }
  0x10   : > { %201 = vst.msk [vmem:[#allocation3 + $0xc] sm:$0xf] %vm172_vm0, %v4428_v0  ;;  %202 = vst.msk [vmem:[#allocation3 + $0x10] sm:$0xf] %vm172_vm0, %v4428_v0  ;;  %v1518_v7 = vshrl.u32 %v1447_v1, 16  ;;  %v1521_v9 = vshll.u32 %v1447_v1, 16 }
  0x11   : > { %207 = vst.msk [vmem:[#allocation3 + $0x24] sm:$0xf] %vm172_vm0, %v4428_v0  ;;  %208 = vst.msk [vmem:[#allocation3 + $0x28] sm:$0xf] %vm172_vm0, %v4428_v0  ;;  %v4639_v14 = vrot.slane %v1531_v5, 4  ;;  %2952 = vrot.lane.b32.xlu0 %v4152_v6, %s4429_s15  ;;  %v1950_v29 = vrot.slane %v4621_v2, 5 }
  0x12   : > { %210 = vst.msk [vmem:[#allocation3 + $0x30] sm:$0xf] %vm172_vm0, %v4428_v0  ;;  %211 = vst.msk [vmem:[#allocation3 + $0x34] sm:$0xf] %vm172_vm0, %v4428_v0  ;;  %v1520_v15 = vrot.slane %v1518_v7, 4  ;;  %v1523_v19 = vrot.slane %v1521_v9, 5 }
  0x13   : > { %213 = vst.msk [vmem:[#allocation3 + $0x3c] sm:$0xf] %vm172_vm0, %v4428_v0  ;;  %214 = vst.msk [vmem:[#allocation3 + $0x40] sm:$0xf] %vm172_vm0, %v4428_v0  ;;  %v1878_v40 = vld [vmem:[#allocation3 + $0x18] sm:$0xe] }
  0x14   : > { %216 = vst.msk [vmem:[#allocation3 + $0x48] sm:$0xf] %vm172_vm0, %v4428_v0  ;;  %217 = vst.msk [vmem:[#allocation3 + $0x4c] sm:$0xf] %vm172_vm0, %v4428_v0  ;;  %v1524_v30 = vor.u32 %v1523_v19, %v1520_v15  ;;  %v4072_v44 = vrot.slane %v1878_v40, 9  ;;  %s6731_s13 = smov (!%p4635_p3, %s4022_s13), 1 }
  0x15   : > { %219 = vst.msk [vmem:[#allocation3 + $0x54] sm:$0xf] %vm172_vm0, %v4428_v0  ;;  %220 = vst.msk [vmem:[#allocation3 + $0x58] sm:$0xf] %vm172_vm0, %v4428_v0  ;;  %v1952_v49 = vrot.slane %v1950_v29, 4  ;;  %s4269_s17 = sshll.u32 %s6731_s13, 5 }
  0x16   : > { %222 = vst.msk [vmem:[#allocation3 + $0x60] sm:$0xf] %vm172_vm0, %v4428_v0  ;;  %223 = vst.msk [vmem:[#allocation3 + $0x64] sm:$0xf] %vm172_vm0, %v4428_v0  ;;  %v4631_v13 = vld [vmem:[#allocation3 + $0x4] sm:$0xf]  ;;  %s4704_s21 = scalar_lea.vmem %s6701_s0, %s4269_s17 }
  0x17   : > { %225 = vst.msk [vmem:[#allocation3 + $0x6c] sm:$0xf] %vm172_vm0, %v4428_v0  ;;  %226 = vst.msk [vmem:[#allocation3 + $0x70] sm:$0xf] %vm172_vm0, %v4428_v0  ;;  %v1266_v21 = vld [vmem:[#allocation3] sm:$0xe] }
  0x18   : > { %228 = vst.msk [vmem:[#allocation3 + $0x78] sm:$0xf] %vm172_vm0, %v4428_v0  ;;  %229 = vst.msk [vmem:[#allocation3 + $0x7c] sm:$0xf] %vm172_vm0, %v4428_v0  ;;  %v1335_v23 = vrot.slane %v4631_v13, 5  ;;  %v4055_v27 = vrot.slane %v1266_v21, 9 }
  0x19   : > { %231 = vst.msk [vmem:[#allocation3 + $0x84] sm:$0xf] %vm172_vm0, %v4428_v0  ;;  %232 = vst.msk [vmem:[#allocation3 + $0x88] sm:$0xf] %vm172_vm0, %v4428_v0  ;;  %v4666_v41 = vrot.slane %v1524_v30, 4  ;;  %v892_v62 = vshll.u32 %v4631_v13, 16 }
  0x1a   : > { %234 = vst.msk [vmem:[#allocation3 + $0x90] sm:$0xf] %vm172_vm0, %v4428_v0  ;;  %235 = vst.msk [vmem:[#allocation3 + $0x94] sm:$0xf] %vm172_vm0, %v4428_v0  ;;  %v1337_v31 = vrot.slane %v1335_v23, 4  ;;  %v896_v63 = vshrl.u32 %v4631_v13, 16 }
  0x1b   : > { %237 = vst.msk [vmem:[#allocation3 + $0x9c] sm:$0xf] %vm172_vm0, %v4428_v0  ;;  %238 = vst.msk [vmem:[#allocation3 + $0xa0] sm:$0xf] %vm172_vm0, %v4428_v0  ;;  %v831_v51 = vld [vmem:[#allocation3] sm:$0xf] }
  0x1c   : > { %240 = vst.msk [vmem:[#allocation3 + $0xa8] sm:$0xf] %vm172_vm0, %v4428_v0  ;;  %241 = vst.msk [vmem:[#allocation3 + $0xac] sm:$0xf] %vm172_vm0, %v4428_v0  ;;  %v883_v59 = vshrl.u32 %v831_v51, 16  ;;  %v886_v61 = vshll.u32 %v831_v51, 16 }
  0x1d   : > { %243 = vst.msk [vmem:[#allocation3 + $0xb4] sm:$0xf] %vm172_vm0, %v4428_v0  ;;  %244 = vst.msk [vmem:[#allocation3 + $0xb8] sm:$0xf] %vm172_vm0, %v4428_v0  ;;  %v4655_v28 = vld [vmem:[#allocation3 + $0x64] sm:$0xf] }
  0x1e   : > { %246 = vst.msk [vmem:[#allocation3 + $0xc0] sm:$0xf] %vm172_vm0, %v4428_v0  ;;  %247 = vst.msk [vmem:[#allocation3 + $0xc4] sm:$0xf] %vm172_vm0, %v4428_v0  ;;  %v1274_v33 = vld [vmem:[#allocation3 + $0x60] sm:$0xe] }
  0x1f   : > { %249 = vst.msk [vmem:[#allocation3 + $0xcc] sm:$0xf] %vm172_vm0, %v4428_v0  ;;  %250 = vst.msk [vmem:[#allocation3 + $0xd0] sm:$0xf] %vm172_vm0, %v4428_v0  ;;  %v1463_v3 = vld [vmem:[#allocation3 + $0x78] sm:$0xf] }
  0x20   : > { %200 = vst.msk [vmem:[#allocation3 + $0x8] sm:$0x1] %vm175_vm1, %v4428_v0  ;;  %176 = vst.msk [vmem:[#allocation2 + $0x8] sm:$0x1] %vm175_vm1, %v4428_v0  ;;  %v4626_v8 = vld [vmem:[#allocation3 + $0x7c] sm:$0xf] }
  0x21   : > { %179 = vst.msk [vmem:[#allocation2 + $0x14] sm:$0x1] %vm175_vm1, %v4428_v0  ;;  %182 = vst.msk [vmem:[#allocation2 + $0x20] sm:$0x1] %vm175_vm1, %v4428_v0  ;;  %v1719_v10 = vshll.u32 %v4626_v8, 16  ;;  %v1723_v11 = vshrl.u32 %v4626_v8, 16  ;;  %v4160_v12 = vcombine.low %v1463_v3, %v4626_v8 }
  0x22   : > { %185 = vst.msk [vmem:[#allocation2 + $0x2c] sm:$0x1] %vm175_vm1, %v4428_v0  ;;  %188 = vst.msk [vmem:[#allocation2 + $0x38] sm:$0x1] %vm175_vm1, %v4428_v0  ;;  %v1710_v16 = vshrl.u32 %v1463_v3, 16  ;;  %v1713_v17 = vshll.u32 %v1463_v3, 16 }
  0x23   : > { %191 = vst.msk [vmem:[#allocation2 + $0x44] sm:$0x1] %vm175_vm1, %v4428_v0  ;;  %194 = vst.msk [vmem:[#allocation2 + $0x50] sm:$0x1] %vm175_vm1, %v4428_v0  ;;  %v4644_v20 = vrot.slane %v1723_v11, 4  ;;  %2968 = vrot.lane.b32.xlu1 %v4160_v12, %s4429_s15  ;;  %v1391_v34 = vrot.slane %v4655_v28, 5 }
  0x24   : > { %197 = vst.msk [vmem:[#allocation2 + $0x5c] sm:$0x1] %vm175_vm1, %v4428_v0  ;;  %203 = vst.msk [vmem:[#allocation3 + $0x14] sm:$0x1] %vm175_vm1, %v4428_v0  ;;  %v1712_v25 = vrot.slane %v1710_v16, 4  ;;  %v1715_v26 = vrot.slane %v1713_v17, 5 }
  0x25   : > { %206 = vst.msk [vmem:[#allocation3 + $0x20] sm:$0x1] %vm175_vm1, %v4428_v0  ;;  %209 = vst.msk [vmem:[#allocation3 + $0x2c] sm:$0x1] %vm175_vm1, %v4428_v0  ;;  %v4063_v37 = vrot.slane %v1274_v33, 9  ;;  %v1393_v43 = vrot.slane %v1391_v34, 4 }
  0x26   : > { %212 = vst.msk [vmem:[#allocation3 + $0x38] sm:$0x1] %vm175_vm1, %v4428_v0  ;;  %215 = vst.msk [vmem:[#allocation3 + $0x44] sm:$0x1] %vm175_vm1, %v4428_v0  ;;  %v1716_v35 = vor.u32 %v1715_v26, %v1712_v25  ;;  %v1886_v50 = vld [vmem:[#allocation3 + $0x78] sm:$0xe] }
  0x27   : > { %218 = vst.msk [vmem:[#allocation3 + $0x50] sm:$0x1] %vm175_vm1, %v4428_v0  ;;  %221 = vst.msk [vmem:[#allocation3 + $0x5c] sm:$0x1] %vm175_vm1, %v4428_v0  ;;  %v4642_v18 = vld [vmem:[#allocation3 + $0x8] sm:$0x1] }
  0x28   : > { %224 = vst.msk [vmem:[#allocation3 + $0x68] sm:$0x1] %vm175_vm1, %v4428_v0  ;;  %227 = vst.msk [vmem:[#allocation3 + $0x74] sm:$0x1] %vm175_vm1, %v4428_v0  ;;  %v1338_v24 = vrot.slane %v4642_v18, 5  ;;  %v4676_v46 = vrot.slane %v1716_v35, 4 }
  0x29   : > { %230 = vst.msk [vmem:[#allocation3 + $0x80] sm:$0x1] %vm175_vm1, %v4428_v0  ;;  %233 = vst.msk [vmem:[#allocation3 + $0x8c] sm:$0x1] %vm175_vm1, %v4428_v0  ;;  %v4080_v55 = vrot.slane %v1886_v50, 9  ;;  %v2006_v57 = vrot.slane %v4626_v8, 5 }
  0x2a   : > { %236 = vst.msk [vmem:[#allocation3 + $0x98] sm:$0x1] %vm175_vm1, %v4428_v0  ;;  %239 = vst.msk [vmem:[#allocation3 + $0xa4] sm:$0x1] %vm175_vm1, %v4428_v0  ;;  %vm486_vm11 = vsmask.f32 7950 }
  0x2b   : > { %242 = vst.msk [vmem:[#allocation3 + $0xb0] sm:$0x1] %vm175_vm1, %v4428_v0  ;;  %245 = vst.msk [vmem:[#allocation3 + $0xbc] sm:$0x1] %vm175_vm1, %v4428_v0  ;;  %v2008_v5 = vrot.slane %v2006_v57, 4  ;;  %v885_v6 = vrot.slane %v883_v59, 4 }
  0x2c   : > { %248 = vst.msk [vmem:[#allocation3 + $0xc8] sm:$0x1] %vm175_vm1, %v4428_v0  ;;  %251 = vst.msk [vmem:[#allocation3 + $0xd4] sm:$0x1] %vm175_vm1, %v4428_v0  ;;  %v4664_v39 = vld [vmem:[#allocation3 + $0x20] sm:$0x1] }
  0x2d   : > { %vm4649_vm4 = vmor %vm1330_vm2, %vm1331_vm3  ;;  %v1953_v54 = vrot.slane %v4664_v39, 5  ;;  %v847_v0 = vld [vmem:[#allocation3 + $0x60] sm:$0xf]  ;;  %vm427_vm13 = vsmask.f32 7946  ;;  %v888_v7 = vrot.slane %v886_v61, 5 }
  0x2e   : > { %v1336_v36 = vsel %vm4649_vm4, %v4055_v27, %v1335_v23  ;;  %v1339_v42 = vsel %vm4649_vm4, %v1337_v31, %v1338_v24  ;;  %v1392_v48 = vsel %vm4649_vm4, %v4063_v37, %v1391_v34  ;;  %v1951_v53 = vsel %vm4649_vm4, %v4072_v44, %v1950_v29  ;;  %s4431_s18 = smov 20   ;;  %vm4708_vm14 = vmor %vm879_vm5, %vm880_vm6  ;;  %v256_v23 = vld [vmem:[%s4704_s21 + $0x10] sm:$0x1]  ;;  %v457_v44 = vld [vmem:[%s4704_s21 + $0x10] sm:$0x2]  ;;  %s4432_s22 = smov 4  }
  0x2f   : > { %v4658_v32 = vld [vmem:[#allocation3 + $0x68] sm:$0x1]  ;;  %v4135_v47 = vcombine.low %v1336_v36, %v1339_v42  ;;  %v1954_v60 = vsel %vm4649_vm4, %v1952_v49, %v1953_v54  ;;  %v2007_v3 = vsel %vm4649_vm4, %v4080_v55, %v2006_v57  ;;  %v894_v9 = vrot.slane %v892_v62, 5  ;;  %v307_v29 = vld [vmem:[#allocation2 + $0x30] sm:$0x1]  ;;  %vm4725_vm15 = vmand %vm175_vm1, %vm293_vm7  ;;  %s4433_s23 = smov 16  }
  0x30   : > { %v1394_v38 = vrot.slane %v4658_v32, 5  ;;  %v1486_v45 = vld [vmem:[#allocation3 + $0x80] sm:$0x1]  ;;  %v4184_v1 = vcombine.low %v1951_v53, %v1954_v60  ;;  %v898_v11 = vrot.slane %v896_v63, 4  ;;  %v902_v12 = vshll.u32 %v4642_v18, 16  ;;  %vm4740_vm2 = vmand %vm351_vm8, %vm352_vm9  ;;  %s4434_s24 = smov 24  }
  0x31   : > { %2854 = vrot.lane.b32.xlu0 %v4135_v47, %s4430_s16  ;;  %v2009_v58 = vrot.slane %v1486_v45, 5  ;;  %v1721_v15 = vrot.slane %v1719_v10, 5  ;;  %v1729_v16 = vshll.u32 %v1486_v45, 16  ;;  %v1075_v17 = vshrl.u32 %v847_v0, 16  ;;  %v323_v30 = vld [vmem:[%s4704_s21 + $0x10] sm:$0x1]  ;;  %vm4749_vm3 = vmand %vm485_vm10, %vm486_vm11 }
  0x32   : > { %v1395_v52 = vsel %vm4649_vm4, %v1393_v43, %v1394_v38  ;;  %v889_v21 = vor.u32 %v888_v7, %v885_v6  ;;  %v899_v8 = vor.u32 %v898_v11, %v894_v9  ;;  %v904_v10 = vrot.slane %v902_v12, 5  ;;  %v382_v36 = vld [vmem:[%s4704_s21 + $0x10] sm:$0x2]  ;;  %v596_v49 = vld [vmem:[%s4704_s21 + $0x10] sm:$0x4]  ;;  %vm4761_vm5 = vmand %vm426_vm12, %vm427_vm13  ;;  %s4435_s25 = smov 28  }
  0x33   : > { %v4143_v56 = vcombine.low %v1392_v48, %v1395_v52  ;;  %v2010_v13 = vsel %vm4649_vm4, %v2008_v5, %v2009_v58  ;;  %v1722_v24 = vsel %vm4708_vm14, %v4676_v46, %v1721_v15  ;;  %v1726_v25 = vor.u32 %v4644_v20, %v1721_v15  ;;  %v366_v43 = vld [vmem:[#allocation2 + $0x30] sm:$0x2]  ;;  %v500_v48 = vld [vmem:[#allocation2 + $0x30] sm:$0x8]  ;;  %v441_v61 = vld [vmem:[#allocation2 + $0x30] sm:$0x4] }
  0x34   : > { %v4192_v19 = vcombine.low %v2007_v3, %v2010_v13  ;;  %v1731_v26 = vrot.slane %v1729_v16, 5  ;;  %v1077_v27 = vrot.slane %v1075_v17, 4  ;;  %v890_v31 = vrot.slane %v889_v21, 4  ;;  %v660_v55 = vld [vmem:[%s4704_s21 + $0x10] sm:$0x8]  ;;  %s4436_s26 = smov 32  }
  0x35   : > { %2870 = vrot.lane.b32.xlu1 %v4143_v56, %s4430_s16  ;;  %3112 = vrot.lane.b32.xlu0 %v4184_v1, %s4431_s18  ;;  %v900_v33 = vrot.slane %v899_v8, 4  ;;  %v1078_v34 = vshll.u32 %v847_v0, 16  ;;  %v1084_v35 = vshll.u32 %v4655_v28, 16  ;;  %v1727_v37 = vrot.slane %v1726_v25, 4  ;;  %v802_v56 = vld [vmem:[#allocation2 + $0x38] sm:$0x1] }
  0x36   : > { %v1088_v38 = vshrl.u32 %v4655_v28, 16  ;;  %v1094_v20 = vshll.u32 %v4658_v32, 16  ;;  %v273_v40 = vshll.u32 %v256_v23, 16  ;;  %v895_v45 = vsel %vm4708_vm14, %v890_v31, %v894_v9  ;;  %v516_v32 = vld [vmem:[%s4704_s21 + $0x10] sm:$0x4]  ;;  %s4270_s8 = sshll.u32 %s6731_s13, 8 }
  0x37   : > { %v905_v46 = vsel %vm4708_vm14, %v900_v33, %v904_v10  ;;  %v1080_v47 = vrot.slane %v1078_v34, 5  ;;  %v1086_v28 = vrot.slane %v1084_v35, 5  ;;  %v1732_v51 = vsel %vm4708_vm14, %v1727_v37, %v1731_v26  ;;  %v580_v63 = vld [vmem:[#allocation2 + $0x34] sm:$0x1]  ;;  %v644_v0 = vld [vmem:[#allocation2 + $0x34] sm:$0x2]  ;;  %s6600_s11 = scalar_lea.vmem %s6704_s3, %s4270_s8 }
  0x38   : > { %v4119_v50 = vcombine.low %v895_v45, %v905_v46  ;;  %v1090_v52 = vrot.slane %v1088_v38, 4  ;;  %v1096_v53 = vrot.slane %v1094_v20, 5  ;;  %v4176_v57 = vcombine.low %v1722_v24, %v1732_v51  ;;  %v740_v1 = vld [vmem:[%s4704_s21 + $0x10] sm:$0x8]  ;;  %806 = vst.msk [vmem:[#allocation3 + $0x74] sm:$0x1] %vm175_vm1, %v802_v56 }
  0x39   : > { %3128 = vrot.lane.b32.xlu1 %v4192_v19, %s4431_s18  ;;  %v1081_v58 = vor.u32 %v1080_v47, %v1077_v27  ;;  %v308_v59 = vsel %vm4725_vm15, %v273_v40, %v307_v29  ;;  %v339_v60 = vrot.slane %v323_v30, 7  ;;  %v403_v5 = vshll.u32 %v382_v36, 16  ;;  %v724_v9 = vld [vmem:[#allocation2 + $0x34] sm:$0x4]  ;;  %v756_v11 = vld [vmem:[#allocation2 + $0x34] sm:$0x8] }
  0x3a   : > { %2774 = vrot.lane.b32.xlu0 %v4119_v50, %s4432_s22  ;;  %v1091_v3 = vor.u32 %v1090_v52, %v1086_v28  ;;  %309 = vst [vmem:[#allocation2 + $0x30] sm:$0x1] %v308_v59  ;;  %v473_v6 = vrot.slane %v457_v44, 6  ;;  %v541_v7 = vshll.u32 %v516_v32, 16  ;;  %v4043_v16 = vrot.slane %v596_v49, 9 }
  0x3b   : > { %v1082_v12 = vrot.slane %v1081_v58, 4  ;;  %v367_v13 = vsel %vm4740_vm2, %v339_v60, %v366_v43  ;;  %v685_v17 = vshll.u32 %v660_v55, 16  ;;  %v252_v19 = vld [vmem:[%s4704_s21] sm:$0x1]  ;;  %v405_v8 = vrot.slane %v403_v5, 7 }
  0x3c   : > { %v1092_v21 = vrot.slane %v1091_v3, 4  ;;  %368 = vst [vmem:[#allocation2 + $0x30] sm:$0x2] %v367_v13  ;;  %v501_v10 = vsel %vm4749_vm3, %v473_v6, %v500_v48  ;;  %v4035_v23 = vrot.slane %v541_v7, 10  ;;  %v295_v24 = vld [vmem:[#allocation2] sm:$0x1]  ;;  %v645_v26 = vsel %vm4740_vm2, %v4043_v16, %v644_v0 }
  0x3d   : > { %3048 = vrot.lane.b32.xlu1 %v4176_v57, %s4433_s23  ;;  %v1087_v25 = vsel %vm4708_vm14, %v1082_v12, %v1086_v28  ;;  %502 = vst [vmem:[#allocation2 + $0x30] sm:$0x8] %v501_v10  ;;  %v4051_v27 = vrot.slane %v685_v17, 9  ;;  %v757_v29 = vsel %vm4749_vm3, %v740_v1, %v756_v11  ;;  %v319_v30 = vld [vmem:[%s4704_s21] sm:$0x1]  ;;  %v442_v34 = vsel %vm4761_vm5, %v405_v8, %v441_v61 }
  0x3e   : > { %v378_v31 = vld [vmem:[%s4704_s21] sm:$0x2]  ;;  %v1097_v33 = vsel %vm4708_vm14, %v1092_v21, %v1096_v53  ;;  %v581_v35 = vsel %vm4725_vm15, %v4035_v23, %v580_v63  ;;  %646 = vst [vmem:[#allocation2 + $0x34] sm:$0x2] %v645_v26  ;;  %758 = vst [vmem:[#allocation2 + $0x34] sm:$0x8] %v757_v29 }
  0x3f   : > { %v1529_v36 = vrot.slane %v1527_v4, 5  ;;  %v354_v37 = vld [vmem:[#allocation2] sm:$0x2]  ;;  %v4127_v20 = vcombine.low %v1087_v25, %v1097_v33  ;;  %443 = vst [vmem:[#allocation2 + $0x30] sm:$0x4] %v442_v34  ;;  %v725_v40 = vsel %vm4761_vm5, %v4051_v27, %v724_v9  ;;  %v1537_v43 = vshll.u32 %v4664_v39, 16 }
  0x40   : > { %v453_v38 = vld [vmem:[%s4704_s21] sm:$0x2]  ;;  %582 = vst [vmem:[#allocation2 + $0x34] sm:$0x1] %v581_v35  ;;  %v261_v44 = vshll.u32 %v252_v19, 16  ;;  %v335_v2 = vrot.slane %v319_v30, 7 }
  0x41   : > { %v429_v45 = vld [vmem:[#allocation2] sm:$0x4]  ;;  %726 = vst [vmem:[#allocation2 + $0x34] sm:$0x4] %v725_v40  ;;  %v1534_v47 = vor.u32 %v4639_v14, %v1529_v36  ;;  %v387_v4 = vshll.u32 %v378_v31, 16  ;;  %2790 = vrot.lane.b32.xlu0 %v4127_v20, %s4432_s22  ;;  %v1530_v32 = vsel %vm4708_vm14, %v4666_v41, %v1529_v36  ;;  %v1539_v49 = vrot.slane %v1537_v43, 5 }
  0x42   : > { %v512_v46 = vld [vmem:[%s4704_s21] sm:$0x4]  ;;  %v488_v28 = vld [vmem:[#allocation2] sm:$0x8]  ;;  %v296_v39 = vsel %vm4725_vm15, %v261_v44, %v295_v24  ;;  %v469_v50 = vrot.slane %v453_v38, 6  ;;  %v355_v55 = vsel %vm4740_vm2, %v335_v2, %v354_v37  ;;  %vm3398_vm6 = vcmask 31744  }
  0x43   : > { %v592_v48 = vld [vmem:[%s4704_s21] sm:$0x4]  ;;  %v568_v51 = vld [vmem:[#allocation2 + $0x4] sm:$0x1]  ;;  %v632_v52 = vld [vmem:[#allocation2 + $0x4] sm:$0x2] }
  0x44   : > { %v656_v53 = vld [vmem:[%s4704_s21] sm:$0x8]  ;;  %v1535_v14 = vrot.slane %v1534_v47, 4  ;;  %297 = vst [vmem:[#allocation2] sm:$0x1] %v296_v39  ;;  %v389_v56 = vrot.slane %v387_v4, 7  ;;  %v489_v41 = vsel %vm4749_vm3, %v469_v50, %v488_v28 }
  0x45   : > { %v521_v57 = vshll.u32 %v512_v46, 16  ;;  %v712_v58 = vld [vmem:[#allocation2 + $0x4] sm:$0x4]  ;;  %v4800_v59 = vld [vmem:[#allocation3 + $0x74] sm:$0x1]  ;;  %v4039_v60 = vrot.slane %v592_v48, 9 }
  0x46   : > { %356 = vst [vmem:[#allocation2] sm:$0x2] %v355_v55  ;;  %v665_v61 = vshll.u32 %v656_v53, 16  ;;  %v736_v63 = vld [vmem:[%s4704_s21] sm:$0x8]  ;;  %v1540_v1 = vsel %vm4708_vm14, %v1535_v14, %v1539_v49  ;;  %v430_v3 = vsel %vm4761_vm5, %v389_v56, %v429_v45  ;;  %v1118_v8 = vshll.u32 %v4800_v59, 16 }
  0x47   : > { %v744_v0 = vld [vmem:[#allocation2 + $0x4] sm:$0x8]  ;;  %490 = vst [vmem:[#allocation2] sm:$0x8] %v489_v41  ;;  %v4031_v5 = vrot.slane %v521_v57, 10  ;;  %v4168_v11 = vcombine.low %v1530_v32, %v1540_v1  ;;  %v633_v12 = vsel %vm4740_vm2, %v4039_v60, %v632_v52  ;;  %v1401_v29 = vrot.slane %v4800_v59, 5 }
  0x48   : > { %v745_v6 = vsel %vm4749_vm3, %v736_v63, %v744_v0  ;;  %v4811_v7 = vld [vmem:[#allocation3 + $0x74] sm:$0x1]  ;;  %v770_v9 = vld [vmem:[#allocation2 + $0x8] sm:$0x1]  ;;  %431 = vst [vmem:[#allocation2] sm:$0x4] %v430_v3 }
  0x49   : > { %v4047_v13 = vrot.slane %v665_v61, 9  ;;  %746 = vst [vmem:[#allocation2 + $0x4] sm:$0x8] %v745_v6  ;;  %774 = vst.msk [vmem:[#allocation3 + $0x14] sm:$0x1] %vm175_vm1, %v770_v9  ;;  %v569_v21 = vsel %vm4725_vm15, %v4031_v5, %v568_v51  ;;  %v1705_v10 = vshll.u32 %v4811_v7, 16  ;;  %3032 = vrot.lane.b32.xlu0 %v4168_v11, %s4433_s23 }
  0x4a   : > { %v4816_v16 = vld [vmem:[#allocation3 + $0x18] sm:$0xf]  ;;  %v4818_v17 = vld [vmem:[#allocation3 + $0x1c] sm:$0xf]  ;;  %v800_v19 = vld [vmem:[#allocation2 + $0x30] sm:$0xf] }
  0x4b   : > { %634 = vst [vmem:[#allocation2 + $0x4] sm:$0x2] %v633_v12  ;;  %v2103_v23 = vshrl.u32 %v4816_v16, 16  ;;  %v801_v24 = vld [vmem:[#allocation2 + $0x34] sm:$0xf]  ;;  %v713_v25 = vsel %vm4761_vm5, %v4047_v13, %v712_v58  ;;  %v2106_v26 = vshll.u32 %v4816_v16, 16 }
  0x4c   : > { %804 = vst.msk [vmem:[#allocation3 + $0x6c] sm:$0xf] %vm172_vm0, %v800_v19  ;;  %570 = vst [vmem:[#allocation2 + $0x4] sm:$0x1] %v569_v21  ;;  %v4830_v27 = vld [vmem:[#allocation3 + $0x78] sm:$0xf] }
  0x4d   : > { %805 = vst.msk [vmem:[#allocation3 + $0x70] sm:$0xf] %vm172_vm0, %v801_v24  ;;  %714 = vst [vmem:[#allocation2 + $0x4] sm:$0x4] %v713_v25  ;;  %v2002_v30 = vrot.slane %v4811_v7, 5  ;;  %v2116_v31 = vshrl.u32 %v4818_v17, 16 }
  0x4e   : > { %v4836_v33 = vld [vmem:[#allocation3 + $0x7c] sm:$0xf]  ;;  %v2295_v34 = vshrl.u32 %v4830_v27, 16  ;;  %v4839_v35 = vrot.slane %v1118_v8, 5  ;;  %v4841_v36 = vrot.slane %v1705_v10, 5  ;;  %v4843_v37 = vrot.slane %v2103_v23, 4 }
  0x4f   : > { %v2298_v38 = vshll.u32 %v4830_v27, 16  ;;  %v253_v20 = vld [vmem:[%s4704_s21 + $0x4] sm:$0x1]  ;;  %v4847_v40 = vrot.slane %v2106_v26, 5  ;;  %v298_v44 = vld [vmem:[#allocation2 + $0xc] sm:$0x1] }
  0x50   : > { %v264_v43 = vshll.u32 %v253_v20, 16  ;;  %v320_v45 = vld [vmem:[%s4704_s21 + $0x4] sm:$0x1]  ;;  %v4850_v46 = vrot.slane %v2295_v34, 4  ;;  %v2308_v2 = vshrl.u32 %v4836_v33, 16  ;;  %vm3480_vm7 = vcmask 97280  }
  0x51   : > { %v4852_v47 = vrot.slane %v2298_v38, 5  ;;  %v336_v4 = vrot.slane %v320_v45, 7  ;;  %v357_v28 = vld [vmem:[#allocation2 + $0xc] sm:$0x2]  ;;  %v768_v48 = vld [vmem:[#allocation2] sm:$0xf]  ;;  %v2109_v45 = vor.u32 %v4847_v40, %v4843_v37 }
  0x52   : > { %v4855_v32 = vld [vmem:[#allocation3 + $0x14] sm:$0x1]  ;;  %v299_v39 = vsel %vm4725_vm15, %v264_v43, %v298_v44  ;;  %772 = vst.msk [vmem:[#allocation3 + $0xc] sm:$0xf] %vm172_vm0, %v768_v48  ;;  %v4199_v43 = vcombine.low %v4816_v16, %v4818_v17  ;;  %v4207_v44 = vcombine.low %v4830_v27, %v4836_v33  ;;  %vm3513_vm8 = vcmask 130048  }
  0x53   : > { %v4857_v49 = vld [vmem:[#allocation3 + $0x14] sm:$0x1]  ;;  %v1345_v50 = vrot.slane %v4855_v32, 5  ;;  %v926_v51 = vshll.u32 %v4855_v32, 16  ;;  %300 = vst [vmem:[#allocation2 + $0xc] sm:$0x1] %v299_v39  ;;  %v358_v57 = vsel %vm4740_vm2, %v336_v4, %v357_v28 }
  0x54   : > { %v1946_v52 = vrot.slane %v4857_v49, 5  ;;  %v1513_v53 = vshll.u32 %v4857_v49, 16  ;;  %v1461_v14 = vld [vmem:[#allocation3 + $0x6c] sm:$0xf]  ;;  %v4868_v58 = vld [vmem:[#allocation3 + $0x70] sm:$0xf] }
  0x55   : > { %v1275_v55 = vld [vmem:[#allocation3 + $0x6c] sm:$0xe]  ;;  %v1686_v59 = vshrl.u32 %v1461_v14, 16  ;;  %v1689_v41 = vshll.u32 %v1461_v14, 16  ;;  %v4870_v60 = vld [vmem:[#allocation3 + $0x70] sm:$0xf]  ;;  %v4159_v63 = vcombine.low %v1461_v14, %v4868_v58 }
  0x56   : > { %v1885_v56 = vld [vmem:[#allocation3 + $0x6c] sm:$0xe]  ;;  %359 = vst [vmem:[#allocation2 + $0xc] sm:$0x2] %v358_v57  ;;  %v1699_v61 = vshrl.u32 %v4868_v58, 16  ;;  %v4064_v0 = vrot.slane %v1275_v55, 9 }
  0x57   : > { %v1398_v1 = vrot.slane %v4870_v60, 5  ;;  %v769_v3 = vld [vmem:[#allocation2 + $0x4] sm:$0xf]  ;;  %v4875_v5 = vrot.slane %v1686_v59, 4  ;;  %v4877_v6 = vrot.slane %v1689_v41, 5  ;;  %v4079_v9 = vrot.slane %v1885_v56, 9  ;;  %2966 = vrot.lane.b32.xlu1 %v4159_v63, %s4429_s15 }
  0x58   : > { %773 = vst.msk [vmem:[#allocation3 + $0x10] sm:$0xf] %vm172_vm0, %v769_v3  ;;  %v1999_v11 = vrot.slane %v4868_v58, 5  ;;  %v849_v12 = vld [vmem:[#allocation3 + $0x6c] sm:$0xf]  ;;  %v4884_v21 = vrot.slane %v926_v51, 5 }
  0x59   : > { %v1399_v13 = vsel %vm4649_vm4, %v4064_v0, %v1398_v1  ;;  %v1400_v19 = vrot.slane %v1398_v1, 4  ;;  %v1099_v8 = vshrl.u32 %v849_v12, 16  ;;  %v1102_v24 = vshll.u32 %v849_v12, 16  ;;  %v1445_v34 = vld [vmem:[#allocation3 + $0xc] sm:$0xf] }
  0x5a   : > { %v2000_v10 = vsel %vm4649_vm4, %v4079_v9, %v1999_v11  ;;  %v2001_v23 = vrot.slane %v1999_v11, 4  ;;  %v1108_v25 = vshll.u32 %v4870_v60, 16  ;;  %v1267_v38 = vld [vmem:[#allocation3 + $0xc] sm:$0xe]  ;;  %v1494_v28 = vshrl.u32 %v1445_v34, 16 }
  0x5b   : > { %v1402_v26 = vsel %vm4649_vm4, %v1400_v19, %v1401_v29  ;;  %v833_v20 = vld [vmem:[#allocation3 + $0xc] sm:$0xf]  ;;  %v1497_v48 = vshll.u32 %v1445_v34, 16  ;;  %v4056_v14 = vrot.slane %v1267_v38, 9  ;;  %v1101_v63 = vrot.slane %v1099_v8, 4 }
  0x5c   : > { %v4144_v4 = vcombine.low %v1399_v13, %v1402_v26  ;;  %v2003_v29 = vsel %vm4649_vm4, %v2001_v23, %v2002_v30  ;;  %v1877_v39 = vld [vmem:[#allocation3 + $0xc] sm:$0xe]  ;;  %v907_v55 = vshrl.u32 %v833_v20, 16  ;;  %v910_v56 = vshll.u32 %v833_v20, 16  ;;  %v4401_v42 = vld [vmem:[#allocation3 + $0x1c] sm:$0xf] }
  0x5d   : > { %v4191_v51 = vcombine.low %v2000_v10, %v2003_v29  ;;  %v1496_v57 = vrot.slane %v1494_v28, 4  ;;  %v1499_v59 = vrot.slane %v1497_v48, 5  ;;  %v4071_v41 = vrot.slane %v1877_v39, 9 }
  0x5e   : > { %2872 = vrot.lane.b32.xlu1 %v4144_v4, %s4430_s16  ;;  %v909_v3 = vrot.slane %v907_v55, 4  ;;  %v912_v9 = vrot.slane %v910_v56, 5  ;;  %v1692_v7 = vor.u32 %v4877_v6, %v4875_v5  ;;  %v2301_v30 = vor.u32 %v4852_v47, %v4850_v46 }
  0x5f   : > { %v1446_v0 = vld [vmem:[#allocation3 + $0x10] sm:$0xf]  ;;  %v1104_v38 = vrot.slane %v1102_v24, 5  ;;  %v1110_v6 = vrot.slane %v1108_v25, 5  ;;  %v1112_v39 = vshrl.u32 %v4870_v60, 16  ;;  %v1701_v49 = vrot.slane %v1699_v61, 4 }
  0x60   : > { %v834_v1 = vld [vmem:[#allocation3 + $0x10] sm:$0xf]  ;;  %v1507_v11 = vshrl.u32 %v1446_v0, 16  ;;  %v4151_v12 = vcombine.low %v1445_v34, %v1446_v0  ;;  %v913_v10 = vor.u32 %v912_v9, %v909_v3  ;;  %v1943_v26 = vrot.slane %v1446_v0, 5  ;;  %v454_v9 = vld [vmem:[%s4704_s21 + $0x4] sm:$0x2] }
  0x61   : > { %v1342_v13 = vrot.slane %v834_v1, 5  ;;  %v916_v19 = vshll.u32 %v834_v1, 16  ;;  %v920_v23 = vshrl.u32 %v834_v1, 16  ;;  %v1105_v29 = vor.u32 %v1104_v38, %v1101_v63  ;;  %v379_v63 = vld [vmem:[%s4704_s21 + $0x4] sm:$0x2] }
  0x62   : > { %2950 = vrot.lane.b32.xlu0 %v4151_v12, %s4429_s15  ;;  %3126 = vrot.lane.b32.xlu1 %v4191_v51, %s4431_s18  ;;  %v914_v4 = vrot.slane %v913_v10, 4  ;;  %v1944_v34 = vsel %vm4649_vm4, %v4071_v41, %v1943_v26  ;;  %v1945_v48 = vrot.slane %v1943_v26, 4  ;;  %v1500_v51 = vor.u32 %v1499_v59, %v1496_v57  ;;  %v432_v10 = vld [vmem:[#allocation2 + $0xc] sm:$0x4]  ;;  %v513_v26 = vld [vmem:[%s4704_s21 + $0x4] sm:$0x4] }
  0x63   : > { %v1343_v8 = vsel %vm4649_vm4, %v4056_v14, %v1342_v13  ;;  %v1344_v20 = vrot.slane %v1342_v13, 4  ;;  %v918_v5 = vrot.slane %v916_v19, 5  ;;  %v922_v28 = vrot.slane %v920_v23, 4  ;;  %v491_v23 = vld [vmem:[#allocation2 + $0xc] sm:$0x8] }
  0x64   : > { %v1947_v56 = vsel %vm4649_vm4, %v1945_v48, %v1946_v52  ;;  %v1106_v32 = vrot.slane %v1105_v29, 4  ;;  %v1114_v1 = vrot.slane %v1112_v39, 4  ;;  %v1503_v57 = vshll.u32 %v1446_v0, 16  ;;  %v593_v38 = vld [vmem:[%s4704_s21 + $0x4] sm:$0x4] }
  0x65   : > { %v1346_v24 = vsel %vm4649_vm4, %v1344_v20, %v1345_v50  ;;  %v919_v25 = vsel %vm4708_vm14, %v914_v4, %v918_v5  ;;  %v923_v55 = vor.u32 %v922_v28, %v918_v5  ;;  %v4183_v41 = vcombine.low %v1944_v34, %v1947_v56  ;;  %v571_v4 = vld [vmem:[#allocation2 + $0x10] sm:$0x1]  ;;  %v737_v28 = vld [vmem:[%s4704_s21 + $0x4] sm:$0x8]  ;;  %v635_v48 = vld [vmem:[#allocation2 + $0x10] sm:$0x2] }
  0x66   : > { %v4136_v14 = vcombine.low %v1343_v8, %v1346_v24  ;;  %v4923_v50 = vrot.slane %v1500_v51, 4  ;;  %v1509_v59 = vrot.slane %v1507_v11, 4  ;;  %v1515_v3 = vrot.slane %v1513_v53, 5  ;;  %v657_v8 = vld [vmem:[%s4704_s21 + $0x4] sm:$0x8] }
  0x67   : > { %v924_v60 = vrot.slane %v923_v55, 4  ;;  %v1111_v52 = vsel %vm4708_vm14, %v1106_v32, %v1110_v6  ;;  %v1115_v12 = vor.u32 %v1114_v1, %v1110_v6  ;;  %v4932_v13 = vrot.slane %v1692_v7, 4  ;;  %v747_v24 = vld [vmem:[#allocation2 + $0x10] sm:$0x8]  ;;  %v257_v29 = vld [vmem:[%s4704_s21 + $0x14] sm:$0x1] }
  0x68   : > { %2856 = vrot.lane.b32.xlu0 %v4136_v14, %s4430_s16  ;;  %v1695_v19 = vshll.u32 %v4868_v58, 16  ;;  %v1505_v11 = vrot.slane %v1503_v57, 5  ;;  %v391_v53 = vshll.u32 %v379_v63, 16  ;;  %v470_v6 = vrot.slane %v454_v9, 6  ;;  %v310_v55 = vld [vmem:[#allocation2 + $0x3c] sm:$0x1] }
  0x69   : > { %v929_v0 = vsel %vm4708_vm14, %v924_v60, %v4884_v21  ;;  %v1116_v20 = vrot.slane %v1115_v12, 4  ;;  %v526_v34 = vshll.u32 %v513_v26, 16  ;;  %v324_v56 = vld [vmem:[%s4704_s21 + $0x14] sm:$0x1]  ;;  %v383_v32 = vld [vmem:[%s4704_s21 + $0x14] sm:$0x2] }
  0x6a   : > { %v4120_v7 = vcombine.low %v919_v25, %v929_v0  ;;  %v1697_v5 = vrot.slane %v1695_v19, 5  ;;  %v1506_v21 = vsel %vm4708_vm14, %v4923_v50, %v1505_v11  ;;  %v1510_v58 = vor.u32 %v1509_v59, %v1505_v11  ;;  %v715_v60 = vld [vmem:[#allocation2 + $0x10] sm:$0x4]  ;;  %v458_v57 = vld [vmem:[%s4704_s21 + $0x14] sm:$0x2] }
  0x6b   : > { %v393_v61 = vrot.slane %v391_v53, 7  ;;  %v1121_v39 = vsel %vm4708_vm14, %v1116_v20, %v4839_v35  ;;  %v492_v25 = vsel %vm4749_vm3, %v470_v6, %v491_v23  ;;  %v4032_v35 = vrot.slane %v526_v34, 10  ;;  %v517_v59 = vld [vmem:[%s4704_s21 + $0x14] sm:$0x4]  ;;  %v661_v26 = vld [vmem:[%s4704_s21 + $0x14] sm:$0x8] }
  0x6c   : > { %3110 = vrot.lane.b32.xlu0 %v4183_v41, %s4431_s18  ;;  %2776 = vrot.lane.b32.xlu1 %v4120_v7, %s4432_s22  ;;  %v1698_v51 = vsel %vm4708_vm14, %v4932_v13, %v1697_v5  ;;  %v1702_v14 = vor.u32 %v1701_v49, %v1697_v5  ;;  %v369_v41 = vld [vmem:[#allocation2 + $0x3c] sm:$0x2]  ;;  %v4128_v1 = vcombine.low %v1111_v52, %v1121_v39  ;;  %v1511_v50 = vrot.slane %v1510_v58, 4  ;;  %v597_v9 = vld [vmem:[%s4704_s21 + $0x14] sm:$0x4] }
  0x6d   : > { %v433_v63 = vsel %vm4761_vm5, %v393_v61, %v432_v10  ;;  %493 = vst [vmem:[#allocation2 + $0xc] sm:$0x8] %v492_v25  ;;  %v4040_v13 = vrot.slane %v593_v38, 9  ;;  %v670_v19 = vshll.u32 %v657_v8, 16  ;;  %v748_v23 = vsel %vm4749_vm3, %v737_v28, %v747_v24  ;;  %v778_v49 = vld [vmem:[#allocation2 + $0x14] sm:$0x1] }
  0x6e   : > { %v1703_v12 = vrot.slane %v1702_v14, 4  ;;  %434 = vst [vmem:[#allocation2 + $0xc] sm:$0x4] %v433_v63  ;;  %v1516_v52 = vsel %vm4708_vm14, %v1511_v50, %v1515_v3  ;;  %v572_v10 = vsel %vm4725_vm15, %v4032_v35, %v571_v4  ;;  %749 = vst [vmem:[#allocation2 + $0x10] sm:$0x8] %v748_v23  ;;  %v276_v0 = vshll.u32 %v257_v29, 16 }
  0x6f   : > { %v340_v11 = vrot.slane %v324_v56, 7  ;;  %v810_v53 = vld [vmem:[#allocation2 + $0x44] sm:$0x1]  ;;  %v4167_v38 = vcombine.low %v1506_v21, %v1516_v52  ;;  %573 = vst [vmem:[#allocation2 + $0x10] sm:$0x1] %v572_v10  ;;  %v636_v7 = vsel %vm4740_vm2, %v4040_v13, %v635_v48  ;;  %v4048_v3 = vrot.slane %v670_v19, 9 }
  0x70   : > { %2792 = vrot.lane.b32.xlu1 %v4128_v1, %s4432_s22  ;;  %v1708_v8 = vsel %vm4708_vm14, %v1703_v12, %v4841_v36  ;;  %v444_v20 = vld [vmem:[#allocation2 + $0x3c] sm:$0x4]  ;;  %v741_v5 = vld [vmem:[%s4704_s21 + $0x14] sm:$0x8]  ;;  %v759_v6 = vld [vmem:[#allocation2 + $0x40] sm:$0x8]  ;;  %v311_v28 = vsel %vm4725_vm15, %v276_v0, %v310_v55 }
  0x71   : > { %782 = vst.msk [vmem:[#allocation3 + $0x2c] sm:$0x1] %vm175_vm1, %v778_v49  ;;  %814 = vst.msk [vmem:[#allocation3 + $0x8c] sm:$0x1] %vm175_vm1, %v810_v53  ;;  %v4175_v4 = vcombine.low %v1698_v51, %v1708_v8  ;;  %v370_v36 = vsel %vm4740_vm2, %v340_v11, %v369_v41  ;;  %v407_v21 = vshll.u32 %v383_v32, 16  ;;  %3030 = vrot.lane.b32.xlu0 %v4167_v38, %s4433_s23  ;;  %v474_v48 = vrot.slane %v458_v57, 6 }
  0x72   : > { %637 = vst [vmem:[#allocation2 + $0x10] sm:$0x2] %v636_v7  ;;  %v503_v58 = vld [vmem:[#allocation2 + $0x3c] sm:$0x8]  ;;  %v647_v61 = vld [vmem:[#allocation2 + $0x40] sm:$0x2]  ;;  %v716_v34 = vsel %vm4761_vm5, %v4048_v3, %v715_v60  ;;  %v760_v55 = vsel %vm4749_vm3, %v741_v5, %v759_v6 }
  0x73   : > { %312 = vst [vmem:[#allocation2 + $0x3c] sm:$0x1] %v311_v28  ;;  %371 = vst [vmem:[#allocation2 + $0x3c] sm:$0x2] %v370_v36  ;;  %v546_v24 = vshll.u32 %v517_v59, 16  ;;  %v4044_v29 = vrot.slane %v597_v9, 9  ;;  %v504_v41 = vsel %vm4749_vm3, %v474_v48, %v503_v58 }
  0x74   : > { %v4988_v39 = vld [vmem:[#allocation3 + $0x20] sm:$0x1]  ;;  %717 = vst [vmem:[#allocation2 + $0x10] sm:$0x4] %v716_v34  ;;  %v409_v51 = vrot.slane %v407_v21, 7  ;;  %v690_v25 = vshll.u32 %v661_v26, 16  ;;  %3046 = vrot.lane.b32.xlu1 %v4175_v4, %s4433_s23 }
  0x75   : > { %v583_v14 = vld [vmem:[#allocation2 + $0x40] sm:$0x1]  ;;  %v2110_v56 = vrot.slane %v2109_v45, 4  ;;  %v4036_v32 = vrot.slane %v546_v24, 10  ;;  %v648_v1 = vsel %vm4740_vm2, %v4044_v29, %v647_v61  ;;  %v727_v50 = vld [vmem:[#allocation2 + $0x40] sm:$0x4]  ;;  %3206 = vrot.lane.b32.xlu0 %v4199_v43, %s4434_s24 }
  0x76   : > { %761 = vst [vmem:[#allocation2 + $0x40] sm:$0x8] %v760_v55  ;;  %v2112_v63 = vshll.u32 %v4818_v17, 16  ;;  %v5001_v35 = vld [vmem:[#allocation3 + $0x80] sm:$0x1]  ;;  %v445_v37 = vsel %vm4761_vm5, %v409_v51, %v444_v20  ;;  %v4052_v40 = vrot.slane %v690_v25, 9 }
  0x77   : > { %v776_v60 = vld [vmem:[#allocation2 + $0xc] sm:$0xf]  ;;  %505 = vst [vmem:[#allocation2 + $0x3c] sm:$0x8] %v504_v41  ;;  %649 = vst [vmem:[#allocation2 + $0x40] sm:$0x2] %v648_v1  ;;  %v584_v59 = vsel %vm4725_vm15, %v4036_v32, %v583_v14 }
  0x78   : > { %v2118_v45 = vrot.slane %v2116_v31, 4  ;;  %v2122_v57 = vshll.u32 %v4988_v39, 16  ;;  %780 = vst.msk [vmem:[#allocation3 + $0x24] sm:$0xf] %vm172_vm0, %v776_v60  ;;  %446 = vst [vmem:[#allocation2 + $0x3c] sm:$0x4] %v445_v37  ;;  %v728_v19 = vsel %vm4761_vm5, %v4052_v40, %v727_v50  ;;  %3222 = vrot.lane.b32.xlu1 %v4207_v44, %s4434_s24 }
  0x79   : > { %v2114_v9 = vrot.slane %v2112_v63, 5  ;;  %v2302_v12 = vrot.slane %v2301_v30, 4  ;;  %v2304_v31 = vshll.u32 %v4836_v33, 16  ;;  %v2486_v13 = vld [vmem:[#allocation3 + $0x18] sm:$0xe]  ;;  %v2310_v43 = vrot.slane %v2308_v2, 4 }
  0x7a   : > { %585 = vst [vmem:[#allocation2 + $0x40] sm:$0x1] %v584_v59  ;;  %v2124_v16 = vrot.slane %v2122_v57, 5  ;;  %v2314_v23 = vshll.u32 %v5001_v35, 16  ;;  %v5024_v26 = vld [vmem:[#allocation3 + $0x2c] sm:$0x1] }
  0x7b   : > { %729 = vst [vmem:[#allocation2 + $0x40] sm:$0x4] %v728_v19  ;;  %v2115_v46 = vsel %vm4708_vm14, %v2110_v56, %v2114_v9  ;;  %v2119_v47 = vor.u32 %v2118_v45, %v2114_v9  ;;  %v2306_v30 = vrot.slane %v2304_v31, 5  ;;  %v2146_v52 = vshll.u32 %v5024_v26, 16  ;;  %v5033_v10 = vld [vmem:[#allocation3 + $0x8c] sm:$0x1] }
  0x7c   : > { %v2316_v2 = vrot.slane %v2314_v23, 5  ;;  %v2338_v0 = vshll.u32 %v5033_v10, 16  ;;  %v4087_v11 = vrot.slane %v2486_v13, 9  ;;  %v2552_v49 = vrot.slane %v4818_v17, 5  ;;  %v2494_v53 = vld [vmem:[#allocation3 + $0x78] sm:$0xe] }
  0x7d   : > { %v777_v38 = vld [vmem:[#allocation2 + $0x10] sm:$0xf]  ;;  %v2120_v27 = vrot.slane %v2119_v47, 4  ;;  %v2307_v44 = vsel %vm4708_vm14, %v2302_v12, %v2306_v30  ;;  %v2311_v8 = vor.u32 %v2310_v43, %v2306_v30  ;;  %v5039_v7 = vrot.slane %v2146_v52, 5  ;;  %v835_v3 = vld [vmem:[#allocation3 + $0x18] sm:$0xf] }
  0x7e   : > { %781 = vst.msk [vmem:[#allocation3 + $0x28] sm:$0xf] %vm172_vm0, %v777_v38  ;;  %v5042_v20 = vrot.slane %v2338_v0, 5  ;;  %v5046_v5 = vsel %vm4649_vm4, %v4087_v11, %v2552_v49  ;;  %v2554_v6 = vrot.slane %v2552_v49, 4  ;;  %v2555_v17 = vrot.slane %v4988_v39, 5 }
  0x7f   : > { %v2125_v4 = vsel %vm4708_vm14, %v2120_v27, %v2124_v16  ;;  %v2312_v28 = vrot.slane %v2311_v8, 4  ;;  %v4095_v36 = vrot.slane %v2494_v53, 9  ;;  %v2608_v21 = vrot.slane %v4836_v33, 5  ;;  %v5052_v58 = vld [vmem:[#allocation3 + $0x1c] sm:$0xf] }
  0x80   : > { %v2056_v61 = vld [vmem:[#allocation3 + $0x24] sm:$0xf]  ;;  %v808_v34 = vld [vmem:[#allocation2 + $0x3c] sm:$0xf]  ;;  %v4215_v48 = vcombine.low %v2115_v46, %v2125_v4  ;;  %v5056_v24 = vsel %vm4649_vm4, %v2554_v6, %v2555_v17  ;;  %v2611_v29 = vrot.slane %v5001_v35, 5  ;;  %v931_v51 = vshrl.u32 %v835_v3, 16 }
  0x81   : > { %v2127_v39 = vshrl.u32 %v2056_v61, 16  ;;  %v2130_v14 = vshll.u32 %v2056_v61, 16  ;;  %812 = vst.msk [vmem:[#allocation3 + $0x84] sm:$0xf] %vm172_vm0, %v808_v34  ;;  %v2317_v25 = vsel %vm4708_vm14, %v2312_v28, %v2316_v2  ;;  %v4231_v33 = vcombine.low %v5046_v5, %v5056_v24  ;;  %v5064_v55 = vld [vmem:[#allocation3 + $0x20] sm:$0x1] }
  0x82   : > { %v851_v56 = vld [vmem:[#allocation3 + $0x78] sm:$0xf]  ;;  %v809_v41 = vld [vmem:[#allocation2 + $0x40] sm:$0xf]  ;;  %v5066_v32 = vcombine.low %v2307_v44, %v2317_v25  ;;  %v5070_v1 = vsel %vm4649_vm4, %v4095_v36, %v2608_v21  ;;  %v2610_v50 = vrot.slane %v2608_v21, 4  ;;  %v933_v63 = vrot.slane %v931_v51, 4 }
  0x83   : > { %v2129_v35 = vrot.slane %v2127_v39, 4  ;;  %v2132_v60 = vrot.slane %v2130_v14, 5  ;;  %813 = vst.msk [vmem:[#allocation3 + $0x88] sm:$0xf] %vm172_vm0, %v809_v41  ;;  %v934_v37 = vshll.u32 %v835_v3, 16  ;;  %v940_v40 = vshll.u32 %v5052_v58, 16 }
  0x84   : > { %v5076_v45 = vsel %vm4649_vm4, %v2610_v50, %v2611_v29  ;;  %v944_v57 = vshrl.u32 %v5052_v58, 16  ;;  %v950_v59 = vshll.u32 %v5064_v55, 16  ;;  %v1123_v9 = vshrl.u32 %v851_v56, 16  ;;  %v5087_v30 = vld [vmem:[#allocation3 + $0x7c] sm:$0xf] }
  0x85   : > { %v5080_v12 = vld [vmem:[#allocation3 + $0x28] sm:$0xf]  ;;  %v2133_v31 = vor.u32 %v2132_v60, %v2129_v35  ;;  %v4239_v13 = vcombine.low %v5070_v1, %v5076_v45  ;;  %v936_v19 = vrot.slane %v934_v37, 5  ;;  %v942_v16 = vrot.slane %v940_v40, 5  ;;  %v5098_v50 = vld [vmem:[#allocation3 + $0x80] sm:$0x1] }
  0x86   : > { %v2140_v43 = vshrl.u32 %v5080_v12, 16  ;;  %v4200_v23 = vcombine.low %v2056_v61, %v5080_v12  ;;  %v2136_v46 = vshll.u32 %v5080_v12, 16  ;;  %v946_v47 = vrot.slane %v944_v57, 4  ;;  %v2487_v40 = vld [vmem:[#allocation3 + $0x24] sm:$0xe] }
  0x87   : > { %v2134_v52 = vrot.slane %v2133_v31, 4  ;;  %v937_v2 = vor.u32 %v936_v19, %v933_v63  ;;  %v952_v0 = vrot.slane %v950_v59, 5  ;;  %v1125_v11 = vrot.slane %v1123_v9, 4 }
  0x88   : > { %3208 = vrot.lane.b32.xlu0 %v4200_v23, %s4434_s24  ;;  %v2072_v49 = vld [vmem:[#allocation3 + $0x84] sm:$0xf]  ;;  %v2138_v53 = vrot.slane %v2136_v46, 5  ;;  %v2142_v38 = vrot.slane %v2140_v43, 4  ;;  %v947_v27 = vor.u32 %v946_v47, %v942_v16  ;;  %v1126_v44 = vshll.u32 %v851_v56, 16 }
  0x89   : > { %v2319_v8 = vshrl.u32 %v2072_v49, 16  ;;  %v2322_v3 = vshll.u32 %v2072_v49, 16  ;;  %v938_v6 = vrot.slane %v937_v2, 4  ;;  %v1132_v17 = vshll.u32 %v5087_v30, 16  ;;  %v837_v23 = vld [vmem:[#allocation3 + $0x24] sm:$0xf] }
  0x8a   : > { %v2073_v4 = vld [vmem:[#allocation3 + $0x88] sm:$0xf]  ;;  %v2139_v28 = vsel %vm4708_vm14, %v2134_v52, %v2138_v53  ;;  %v2143_v36 = vor.u32 %v2142_v38, %v2138_v53  ;;  %v948_v21 = vrot.slane %v947_v27, 4  ;;  %v1128_v61 = vrot.slane %v1126_v44, 5 }
  0x8b   : > { %v2321_v34 = vrot.slane %v2319_v8, 4  ;;  %v2324_v29 = vrot.slane %v2322_v3, 5  ;;  %v2332_v51 = vshrl.u32 %v2073_v4, 16  ;;  %v4208_v39 = vcombine.low %v2072_v49, %v2073_v4 }
  0x8c   : > { %3286 = vrot.lane.b32.xlu0 %v4215_v48, %s4435_s25  ;;  %v2144_v14 = vrot.slane %v2143_v36, 4  ;;  %v2328_v25 = vshll.u32 %v2073_v4, 16  ;;  %v943_v56 = vsel %vm4708_vm14, %v938_v6, %v942_v16  ;;  %v953_v41 = vsel %vm4708_vm14, %v948_v21, %v952_v0  ;;  %v2495_v0 = vld [vmem:[#allocation3 + $0x84] sm:$0xe]  ;;  %v5118_v6 = vld [vmem:[#allocation3 + $0x28] sm:$0xf] }
  0x8d   : > { %3224 = vrot.lane.b32.xlu1 %v4208_v39, %s4434_s24  ;;  %v2325_v63 = vor.u32 %v2324_v29, %v2321_v34  ;;  %v2334_v35 = vrot.slane %v2332_v51, 4  ;;  %v4121_v60 = vcombine.low %v943_v56, %v953_v41  ;;  %v1129_v37 = vor.u32 %v1128_v61, %v1125_v11  ;;  %v5125_v21 = vld [vmem:[#allocation3 + $0x2c] sm:$0x1]  ;;  %v853_v29 = vld [vmem:[#allocation3 + $0x84] sm:$0xf] }
  0x8e   : > { %v2149_v48 = vsel %vm4708_vm14, %v2144_v14, %v5039_v7  ;;  %v2330_v57 = vrot.slane %v2328_v25, 5  ;;  %v1134_v59 = vrot.slane %v1132_v17, 5  ;;  %v1136_v9 = vshrl.u32 %v5087_v30, 16  ;;  %v5138_v56 = vld [vmem:[#allocation3 + $0x88] sm:$0xf] }
  0x8f   : > { %v4216_v31 = vcombine.low %v2139_v28, %v2149_v48  ;;  %v2326_v19 = vrot.slane %v2325_v63, 4  ;;  %v1130_v16 = vrot.slane %v1129_v37, 4  ;;  %v1142_v43 = vshll.u32 %v5098_v50, 16  ;;  %v5145_v63 = vld [vmem:[#allocation3 + $0x8c] sm:$0x1] }
  0x90   : > { %v2335_v46 = vor.u32 %v2334_v35, %v2330_v57  ;;  %v1138_v47 = vrot.slane %v1136_v9, 4  ;;  %v4088_v52 = vrot.slane %v2487_v40, 9  ;;  %v2559_v2 = vrot.slane %v5080_v12, 5 }
  0x91   : > { %3302 = vrot.lane.b32.xlu1 %v5066_v32, %s4435_s25  ;;  %3288 = vrot.lane.b32.xlu0 %v4216_v31, %s4435_s25  ;;  %v2331_v7 = vsel %vm4708_vm14, %v2326_v19, %v2330_v57  ;;  %v1135_v11 = vsel %vm4708_vm14, %v1130_v16, %v1134_v59  ;;  %v1144_v49 = vrot.slane %v1142_v43, 5  ;;  %v2562_v53 = vrot.slane %v5024_v26, 5  ;;  %v1268_v57 = vld [vmem:[#allocation3 + $0x18] sm:$0xe] }
  0x92   : > { %v2336_v38 = vrot.slane %v2335_v46, 4  ;;  %v1139_v27 = vor.u32 %v1138_v47, %v1134_v59  ;;  %v2560_v12 = vsel %vm4649_vm4, %v4088_v52, %v2559_v2  ;;  %v2561_v44 = vrot.slane %v2559_v2, 4  ;;  %v1276_v47 = vld [vmem:[#allocation3 + $0x78] sm:$0xe] }
  0x93   : > { %v4096_v8 = vrot.slane %v2495_v0, 9  ;;  %v2615_v3 = vrot.slane %v2073_v4, 5  ;;  %v2618_v32 = vrot.slane %v5033_v10, 5  ;;  %v955_v17 = vshrl.u32 %v837_v23, 16 }
  0x94   : > { %v2341_v28 = vsel %vm4708_vm14, %v2336_v38, %v5042_v20  ;;  %v1140_v36 = vrot.slane %v1139_v27, 4  ;;  %v2563_v26 = vsel %vm4649_vm4, %v2561_v44, %v2562_v53  ;;  %v958_v61 = vshll.u32 %v837_v23, 16  ;;  %v1269_v38 = vld [vmem:[#allocation3 + $0x24] sm:$0xe] }
  0x95   : > { %v4224_v34 = vcombine.low %v2331_v7, %v2341_v28  ;;  %3366 = vrot.lane.b32.xlu0 %v4231_v33, %s4436_s26  ;;  %v4232_v10 = vcombine.low %v2560_v12, %v2563_v26  ;;  %v5133_v4 = vsel %vm4649_vm4, %v4096_v8, %v2615_v3  ;;  %v2617_v20 = vrot.slane %v2615_v3, 4 }
  0x96   : > { %v1145_v51 = vsel %vm4708_vm14, %v1140_v36, %v1144_v49  ;;  %v957_v39 = vrot.slane %v955_v17, 4  ;;  %v960_v14 = vrot.slane %v958_v61, 5  ;;  %v964_v25 = vshll.u32 %v5118_v6, 16  ;;  %v1277_v36 = vld [vmem:[#allocation3 + $0x84] sm:$0xe] }
  0x97   : > { %3304 = vrot.lane.b32.xlu1 %v4224_v34, %s4435_s25  ;;  %v4129_v5 = vcombine.low %v1135_v11, %v1145_v51  ;;  %v2619_v24 = vsel %vm4649_vm4, %v2617_v20, %v2618_v32  ;;  %v968_v33 = vshrl.u32 %v5118_v6, 16  ;;  %v974_v41 = vshll.u32 %v5125_v21, 16 }
  0x98   : > { %v4240_v35 = vcombine.low %v5133_v4, %v2619_v24  ;;  %v961_v37 = vor.u32 %v960_v14, %v957_v39  ;;  %v966_v40 = vrot.slane %v964_v25, 5  ;;  %v1147_v48 = vshrl.u32 %v853_v29, 16 }
  0x99   : > { %2778 = vrot.lane.b32.xlu0 %v4121_v60, %s4432_s22  ;;  %v970_v59 = vrot.slane %v968_v33, 4  ;;  %v976_v9 = vrot.slane %v974_v41, 5  ;;  %v1150_v31 = vshll.u32 %v853_v29, 16  ;;  %v1156_v19 = vshll.u32 %v5138_v56, 16  ;;  %v5180_v29 = vld [vmem:[#allocation3 + $0x24] sm:$0xf] }
  0x9a   : > { %v962_v16 = vrot.slane %v961_v37, 4  ;;  %v1149_v43 = vrot.slane %v1147_v48, 4  ;;  %v1160_v23 = vshrl.u32 %v5138_v56, 16  ;;  %v1166_v46 = vshll.u32 %v5145_v63, 16  ;;  %v5194_v37 = vld [vmem:[#allocation3 + $0x84] sm:$0xf] }
  0x9b   : > { %3382 = vrot.lane.b32.xlu1 %v4239_v13, %s4436_s26  ;;  %v971_v52 = vor.u32 %v970_v59, %v966_v40  ;;  %v1152_v2 = vrot.slane %v1150_v31, 5  ;;  %v1158_v60 = vrot.slane %v1156_v19, 5  ;;  %v4057_v0 = vrot.slane %v1268_v57, 9  ;;  %v5202_v48 = vld [vmem:[#allocation3 + $0x30] sm:$0xf] }
  0x9c   : > { %v967_v7 = vsel %vm4708_vm14, %v962_v16, %v966_v40  ;;  %v1162_v11 = vrot.slane %v1160_v23, 4  ;;  %v1168_v49 = vrot.slane %v1166_v46, 5  ;;  %v1349_v53 = vrot.slane %v5052_v58, 5  ;;  %v5209_v19 = vld [vmem:[#allocation3 + $0x88] sm:$0xf] }
  0x9d   : > { %3368 = vrot.lane.b32.xlu0 %v4232_v10, %s4436_s26  ;;  %v972_v27 = vrot.slane %v971_v52, 4  ;;  %v1153_v12 = vor.u32 %v1152_v2, %v1149_v43  ;;  %v1352_v44 = vrot.slane %v5064_v55, 5  ;;  %v4065_v1 = vrot.slane %v1276_v47, 9  ;;  %v4376_v16 = vld [vmem:[%s6702_s1 + $0x8] sm:$0xff]   ;;  %v5220_v47 = vld [vmem:[#allocation3 + $0x34] sm:$0xf] }
  0x9e   : > { %v1163_v45 = vor.u32 %v1162_v11, %v1158_v60  ;;  %v1350_v13 = vsel %vm4649_vm4, %v4057_v0, %v1349_v53  ;;  %v1351_v8 = vrot.slane %v1349_v53, 4  ;;  %v1405_v3 = vrot.slane %v5087_v30, 5  ;;  %v4373_v30 = vld [vmem:[%s6702_s1] sm:$0xff]   ;;  %v5222_v52 = vld [vmem:[#allocation3 + $0x90] sm:$0xf] }
  0x9f   : > { %2794 = vrot.lane.b32.xlu1 %v4129_v5, %s4432_s22  ;;  %v977_v58 = vsel %vm4708_vm14, %v972_v27, %v976_v9  ;;  %v1154_v32 = vrot.slane %v1153_v12, 4  ;;  %v1408_v17 = vrot.slane %v5098_v50, 5  ;;  %v4058_v28 = vrot.slane %v1269_v38, 9  ;;  %v5187_v5 = vld [vmem:[#allocation3 + $0x28] sm:$0xf]  ;;  %4290 = vmatprep.subr.bf16.mxu0 %v4373_v30 }
  0xa0   : > { %v4122_v26 = vcombine.low %v967_v7, %v977_v58  ;;  %v1164_v55 = vrot.slane %v1163_v45, 4  ;;  %v1353_v61 = vsel %vm4649_vm4, %v1351_v8, %v1352_v44  ;;  %v5172_v34 = vsel %vm4649_vm4, %v4065_v1, %v1405_v3  ;;  %4291 = vmatpush3.bf16.msra.mxu0 %v4373_v30  ;;  %4328 = vmatprep.subr.bf16.mxu1 %v4373_v30  ;;  %v5227_v11 = vld [vmem:[#allocation3 + $0x94] sm:$0xf] }
  0xa1   : > { %v1159_v10 = vsel %vm4708_vm14, %v1154_v32, %v1158_v60  ;;  %v4137_v4 = vcombine.low %v1350_v13, %v1353_v61  ;;  %v1407_v50 = vrot.slane %v1405_v3, 4  ;;  %v1356_v20 = vrot.slane %v5118_v6, 5  ;;  %4331 = vmatpush3.bf16.msra.mxu1 %v4373_v30  ;;  %4292 = vmatprep.subr.bf16.mxu0 %v4376_v16  ;;  %v5237_v13 = vld [vmem:[#allocation3 + $0x2c] sm:$0x1] }
  0xa2   : > { %2780 = vrot.lane.b32.xlu0 %v4122_v26, %s4432_s22  ;;  %v1169_v51 = vsel %vm4708_vm14, %v1164_v55, %v1168_v49  ;;  %v1359_v39 = vrot.slane %v5125_v21, 5  ;;  %v4066_v14 = vrot.slane %v1277_v36, 9  ;;  %v1412_v25 = vrot.slane %v5138_v56, 5  ;;  %4329 = vmatprep.subr.bf16.mxu1 %v4376_v16  ;;  %v5247_v55 = vld [vmem:[#allocation3 + $0x8c] sm:$0x1] }
  0xa3   : > { %3384 = vrot.lane.b32.xlu1 %v4240_v35, %s4436_s26  ;;  %v4130_v24 = vcombine.low %v1159_v10, %v1169_v51  ;;  %v1409_v6 = vsel %vm4649_vm4, %v1407_v50, %v1408_v17  ;;  %v1357_v33 = vsel %vm4649_vm4, %v4058_v28, %v1356_v20  ;;  %v1358_v41 = vrot.slane %v1356_v20, 4  ;;  %v5251_v51 = vld [vmem:[#allocation3 + $0x38] sm:$0x1] }
  0xa4   : > { %v4145_v21 = vcombine.low %v5172_v34, %v1409_v6  ;;  %v5199_v56 = vsel %vm4649_vm4, %v4066_v14, %v1412_v25  ;;  %v1414_v40 = vrot.slane %v1412_v25, 4  ;;  %v1415_v35 = vrot.slane %v5145_v63, 5  ;;  %4293 = vmatpush3.bf16.msra.mxu0 %v4376_v16  ;;  %v786_v6 = vld [vmem:[#allocation2 + $0x20] sm:$0x1] }
  0xa5   : > { %v1360_v57 = vsel %vm4649_vm4, %v1358_v41, %v1359_v39  ;;  %v1542_v59 = vshrl.u32 %v5180_v29, 16  ;;  %v1545_v9 = vshll.u32 %v5180_v29, 16  ;;  %v1555_v31 = vshrl.u32 %v5187_v5, 16  ;;  %4332 = vmatpush3.bf16.msra.mxu1 %v4376_v16  ;;  %790 = vst.msk [vmem:[#allocation3 + $0x44] sm:$0x1] %vm175_vm1, %v786_v6 }
  0xa6   : > { %2858 = vrot.lane.b32.xlu0 %v4137_v4, %s4430_s16  ;;  %v4138_v63 = vcombine.low %v1357_v33, %v1360_v57  ;;  %v1416_v43 = vsel %vm4649_vm4, %v1414_v40, %v1415_v35  ;;  %v4153_v23 = vcombine.low %v5180_v29, %v5187_v5  ;;  %v1734_v46 = vshrl.u32 %v5194_v37, 16 }
  0xa7   : > { %2796 = vrot.lane.b32.xlu1 %v4130_v24, %s4432_s22  ;;  %v4146_v2 = vcombine.low %v5199_v56, %v1416_v43  ;;  %v1544_v60 = vrot.slane %v1542_v59, 4  ;;  %v1547_v0 = vrot.slane %v1545_v9, 5  ;;  %v1737_v7 = vshll.u32 %v5194_v37, 16  ;;  %v818_v56 = vld [vmem:[#allocation2 + $0x50] sm:$0x1] }
  0xa8   : > { %v1736_v49 = vrot.slane %v1734_v46, 4  ;;  %v1747_v53 = vshrl.u32 %v5209_v19, 16  ;;  %v4161_v38 = vcombine.low %v5194_v37, %v5209_v19  ;;  %v1566_v27 = vshrl.u32 %v5202_v48, 16  ;;  %v5260_v59 = vld [vmem:[#allocation3 + $0x98] sm:$0x1] }
  0xa9   : > { %v1739_v12 = vrot.slane %v1737_v7, 5  ;;  %v1569_v44 = vshll.u32 %v5202_v48, 16  ;;  %v1579_v1 = vshrl.u32 %v5220_v47, 16  ;;  %v4154_v45 = vcombine.low %v5202_v48, %v5220_v47  ;;  %822 = vst.msk [vmem:[#allocation3 + $0xa4] sm:$0x1] %vm175_vm1, %v818_v56 }
  0xaa   : > { %2860 = vrot.lane.b32.xlu0 %v4138_v63, %s4430_s16  ;;  %v1568_v8 = vrot.slane %v1566_v27, 4  ;;  %v1758_v3 = vshrl.u32 %v5222_v52, 16  ;;  %v1761_v58 = vshll.u32 %v5222_v52, 16  ;;  %v1771_v32 = vshrl.u32 %v5227_v11, 16 }
  0xab   : > { %2874 = vrot.lane.b32.xlu1 %v4145_v21, %s4430_s16  ;;  %v1571_v17 = vrot.slane %v1569_v44, 5  ;;  %v4162_v28 = vcombine.low %v5222_v52, %v5227_v11  ;;  %v1548_v36 = vor.u32 %v1547_v0, %v1544_v60  ;;  %v1551_v26 = vshll.u32 %v5187_v5, 16 }
  0xac   : > { %v1760_v61 = vrot.slane %v1758_v3, 4  ;;  %v1763_v34 = vrot.slane %v1761_v58, 5  ;;  %v1557_v30 = vrot.slane %v1555_v31, 4  ;;  %v1561_v10 = vshll.u32 %v5237_v13, 16 }
  0xad   : > { %v1549_v4 = vrot.slane %v1548_v36, 4  ;;  %v1553_v50 = vrot.slane %v1551_v26, 5  ;;  %v1740_v20 = vor.u32 %v1739_v12, %v1736_v49  ;;  %v1743_v29 = vshll.u32 %v5209_v19, 16 }
  0xae   : > { %2954 = vrot.lane.b32.xlu0 %v4153_v23, %s4429_s15  ;;  %v1563_v39 = vrot.slane %v1561_v10, 5  ;;  %v1749_v14 = vrot.slane %v1747_v53, 4  ;;  %v1753_v25 = vshll.u32 %v5247_v55, 16  ;;  %v1572_v24 = vor.u32 %v1571_v17, %v1568_v8  ;;  %v1880_v10 = vld [vmem:[#allocation3 + $0x30] sm:$0xe] }
  0xaf   : > { %2876 = vrot.lane.b32.xlu1 %v4146_v2, %s4430_s16  ;;  %v1554_v33 = vsel %vm4708_vm14, %v1549_v4, %v1553_v50  ;;  %v1558_v41 = vor.u32 %v1557_v30, %v1553_v50  ;;  %v1741_v37 = vrot.slane %v1740_v20, 4  ;;  %v1745_v21 = vrot.slane %v1743_v29, 5  ;;  %v1879_v2 = vld [vmem:[#allocation3 + $0x24] sm:$0xe]  ;;  %v5288_v29 = vpop.permute.xlu0 %2952 }
  0xb0   : > { %v1755_v40 = vrot.slane %v1753_v25, 5  ;;  %v1573_v35 = vrot.slane %v1572_v24, 4  ;;  %v1575_v48 = vshll.u32 %v5220_v47, 16  ;;  %v1581_v57 = vrot.slane %v1579_v1, 4  ;;  %v1887_v1 = vld [vmem:[#allocation3 + $0x84] sm:$0xe] }
  0xb1   : > { %v1559_v9 = vrot.slane %v1558_v41, 4  ;;  %v1746_v31 = vsel %vm4708_vm14, %v1741_v37, %v1745_v21  ;;  %v1750_v16 = vor.u32 %v1749_v14, %v1745_v21  ;;  %v1585_v63 = vshll.u32 %v5251_v51, 16  ;;  %v5294_v25 = vld [vmem:[#allocation3 + $0x30] sm:$0xf]  ;;  %v5300_v41 = vld [vmem:[#allocation3 + $0x34] sm:$0xf] }
  0xb2   : > { %2956 = vrot.lane.b32.xlu0 %v4154_v45, %s4429_s15  ;;  %v1577_v43 = vrot.slane %v1575_v48, 5  ;;  %v1764_v23 = vor.u32 %v1763_v34, %v1760_v61  ;;  %v1767_v46 = vshll.u32 %v5227_v11, 16  ;;  %v1773_v52 = vrot.slane %v1771_v32, 4 }
  0xb3   : > { %2970 = vrot.lane.b32.xlu1 %v4161_v38, %s4429_s15  ;;  %v1564_v60 = vsel %vm4708_vm14, %v1559_v9, %v1563_v39  ;;  %v1751_v0 = vrot.slane %v1750_v16, 4  ;;  %v1587_v7 = vrot.slane %v1585_v63, 5  ;;  %v1777_v49 = vshll.u32 %v5260_v59, 16  ;;  %v321_v16 = vld [vmem:[%s4704_s21 + $0x8] sm:$0x1] }
  0xb4   : > { %v4169_v53 = vcombine.low %v1554_v33, %v1564_v60  ;;  %v1578_v27 = vsel %vm4708_vm14, %v1573_v35, %v1577_v43  ;;  %v1582_v12 = vor.u32 %v1581_v57, %v1577_v43  ;;  %v1765_v44 = vrot.slane %v1764_v23, 4  ;;  %v5310_v35 = vld [vmem:[#allocation3 + $0x94] sm:$0xf]  ;;  %v5323_v60 = vpop.permute.xlu1 %2968 }
  0xb5   : > { %v1756_v45 = vsel %vm4708_vm14, %v1751_v0, %v1755_v40  ;;  %v1769_v8 = vrot.slane %v1767_v46, 5  ;;  %v1779_v3 = vrot.slane %v1777_v49, 5  ;;  %v4073_v38 = vrot.slane %v1879_v2, 9  ;;  %v455_v2 = vld [vmem:[%s4704_s21 + $0x8] sm:$0x2] }
  0xb6   : > { %3034 = vrot.lane.b32.xlu0 %v4169_v53, %s4433_s23  ;;  %v4177_v58 = vcombine.low %v1746_v31, %v1756_v45  ;;  %v1583_v32 = vrot.slane %v1582_v12, 4  ;;  %v1957_v17 = vrot.slane %v5187_v5, 5  ;;  %v1960_v36 = vrot.slane %v5237_v13, 5  ;;  %v1888_v13 = vld [vmem:[#allocation3 + $0x90] sm:$0xe] }
  0xb7   : > { %2972 = vrot.lane.b32.xlu1 %v4162_v28, %s4429_s15  ;;  %v1770_v26 = vsel %vm4708_vm14, %v1765_v44, %v1769_v8  ;;  %v1774_v61 = vor.u32 %v1773_v52, %v1769_v8  ;;  %v4081_v34 = vrot.slane %v1887_v1, 9  ;;  %v2013_v30 = vrot.slane %v5209_v19, 5  ;;  %v254_v31 = vld [vmem:[%s4704_s21 + $0x8] sm:$0x1]  ;;  %v380_v52 = vld [vmem:[%s4704_s21 + $0x8] sm:$0x2]  ;;  %v5333_v44 = vpop.permute.xlu0 %2854 }
  0xb8   : > { %v1588_v4 = vsel %vm4708_vm14, %v1583_v32, %v1587_v7  ;;  %v1958_v50 = vsel %vm4649_vm4, %v4073_v38, %v1957_v17  ;;  %v1959_v20 = vrot.slane %v1957_v17, 4  ;;  %v2016_v5 = vrot.slane %v5247_v55, 5  ;;  %v301_v49 = vld [vmem:[#allocation2 + $0x18] sm:$0x1]  ;;  %v360_v53 = vld [vmem:[#allocation2 + $0x18] sm:$0x2] }
  0xb9   : > { %v4170_v28 = vcombine.low %v1578_v27, %v1588_v4  ;;  %v1775_v39 = vrot.slane %v1774_v61, 4  ;;  %v5292_v14 = vsel %vm4649_vm4, %v4081_v34, %v2013_v30  ;;  %v2015_v19 = vrot.slane %v2013_v30, 4  ;;  %v514_v27 = vld [vmem:[%s4704_s21 + $0x8] sm:$0x4]  ;;  %v494_v38 = vld [vmem:[#allocation2 + $0x18] sm:$0x8] }
  0xba   : > { %v1961_v24 = vsel %vm4649_vm4, %v1959_v20, %v1960_v36  ;;  %v4074_v6 = vrot.slane %v1880_v10, 9  ;;  %v1964_v33 = vrot.slane %v5220_v47, 5  ;;  %v1967_v55 = vrot.slane %v5251_v51, 5  ;;  %v5308_v47 = vld [vmem:[#allocation3 + $0x90] sm:$0xf] }
  0xbb   : > { %3050 = vrot.lane.b32.xlu1 %v4177_v58, %s4433_s23  ;;  %3036 = vrot.lane.b32.xlu0 %v4170_v28, %s4433_s23  ;;  %v1780_v37 = vsel %vm4708_vm14, %v1775_v39, %v1779_v3  ;;  %v4185_v21 = vcombine.low %v1958_v50, %v1961_v24  ;;  %v2017_v56 = vsel %vm4649_vm4, %v2015_v19, %v2016_v5  ;;  %v4082_v40 = vrot.slane %v1888_v13, 9  ;;  %v594_v12 = vld [vmem:[%s4704_s21 + $0x8] sm:$0x4]  ;;  %v658_v58 = vld [vmem:[%s4704_s21 + $0x8] sm:$0x8] }
  0xbc   : > { %v4178_v51 = vcombine.low %v1770_v26, %v1780_v37  ;;  %v4193_v48 = vcombine.low %v5292_v14, %v2017_v56  ;;  %v1965_v57 = vsel %vm4649_vm4, %v4074_v6, %v1964_v33  ;;  %v1966_v9 = vrot.slane %v1964_v33, 4  ;;  %v738_v32 = vld [vmem:[%s4704_s21 + $0x8] sm:$0x8]  ;;  %v750_v17 = vld [vmem:[#allocation2 + $0x1c] sm:$0x8] }
  0xbd   : > { %v2020_v63 = vrot.slane %v5227_v11, 5  ;;  %v2023_v43 = vrot.slane %v5260_v59, 5  ;;  %v2151_v23 = vshrl.u32 %v5294_v25, 16  ;;  %v2154_v46 = vshll.u32 %v5294_v25, 16  ;;  %v638_v30 = vld [vmem:[#allocation2 + $0x1c] sm:$0x2] }
  0xbe   : > { %v1968_v0 = vsel %vm4649_vm4, %v1966_v9, %v1967_v55  ;;  %v2164_v7 = vshrl.u32 %v5300_v41, 16  ;;  %v4201_v11 = vcombine.low %v5294_v25, %v5300_v41  ;;  %v2343_v59 = vshrl.u32 %v5308_v47, 16  ;;  %v258_v10 = vld [vmem:[%s4704_s21 + $0x18] sm:$0x1]  ;;  %v435_v13 = vld [vmem:[#allocation2 + $0x18] sm:$0x4] }
  0xbf   : > { %3052 = vrot.lane.b32.xlu1 %v4178_v51, %s4433_s23  ;;  %3114 = vrot.lane.b32.xlu0 %v4185_v21, %s4431_s18  ;;  %v4186_v1 = vcombine.low %v1965_v57, %v1968_v0  ;;  %v2021_v45 = vsel %vm4649_vm4, %v4082_v40, %v2020_v63  ;;  %v2022_v8 = vrot.slane %v2020_v63, 4  ;;  %v5339_v3 = vrot.slane %v2151_v23, 4  ;;  %v325_v28 = vld [vmem:[%s4704_s21 + $0x18] sm:$0x1]  ;;  %v384_v39 = vld [vmem:[%s4704_s21 + $0x18] sm:$0x2]  ;;  %v5366_v63 = vpop.permute.xlu1 %2870  ;;  %v5374_v0 = vpop.permute.xlu0 %3112 }
  0xc0   : > { %v5343_v36 = vrot.slane %v2154_v46, 5  ;;  %v5345_v26 = vrot.slane %v2343_v59, 4  ;;  %v2346_v61 = vshll.u32 %v5308_v47, 16  ;;  %v2356_v34 = vshrl.u32 %v5310_v35, 16  ;;  %v574_v33 = vld [vmem:[#allocation2 + $0x1c] sm:$0x1] }
  0xc1   : > { %v2024_v4 = vsel %vm4649_vm4, %v2022_v8, %v2023_v43  ;;  %v4209_v50 = vcombine.low %v5308_v47, %v5310_v35  ;;  %v267_v20 = vshll.u32 %v254_v31, 16  ;;  %v337_v5 = vrot.slane %v321_v16, 7  ;;  %v313_v55 = vld [vmem:[#allocation2 + $0x48] sm:$0x1]  ;;  %v372_v37 = vld [vmem:[#allocation2 + $0x48] sm:$0x2] }
  0xc2   : > { %v4194_v14 = vcombine.low %v2021_v45, %v2024_v4  ;;  %v5356_v19 = vrot.slane %v2346_v61, 5  ;;  %v395_v24 = vshll.u32 %v380_v52, 16  ;;  %v471_v6 = vrot.slane %v455_v2, 6  ;;  %v459_v21 = vld [vmem:[%s4704_s21 + $0x18] sm:$0x2] }
  0xc3   : > { %3130 = vrot.lane.b32.xlu1 %v4193_v48, %s4431_s18  ;;  %3116 = vrot.lane.b32.xlu0 %v4186_v1, %s4431_s18  ;;  %v302_v56 = vsel %vm4725_vm15, %v267_v20, %v301_v49  ;;  %v361_v40 = vsel %vm4740_vm2, %v337_v5, %v360_v53  ;;  %v531_v51 = vshll.u32 %v514_v27, 16  ;;  %v4041_v57 = vrot.slane %v594_v12, 9  ;;  %v718_v9 = vld [vmem:[#allocation2 + $0x1c] sm:$0x4]  ;;  %v506_v31 = vld [vmem:[#allocation2 + $0x48] sm:$0x8] }
  0xc4   : > { %v518_v16 = vld [vmem:[%s4704_s21 + $0x18] sm:$0x4]  ;;  %303 = vst [vmem:[#allocation2 + $0x18] sm:$0x1] %v302_v56  ;;  %362 = vst [vmem:[#allocation2 + $0x18] sm:$0x2] %v361_v40  ;;  %v495_v43 = vsel %vm4749_vm3, %v471_v6, %v494_v38  ;;  %v751_v46 = vsel %vm4749_vm3, %v738_v32, %v750_v17  ;;  %v2157_v6 = vor.u32 %v5343_v36, %v5339_v3 }
  0xc5   : > { %v397_v48 = vrot.slane %v395_v24, 7  ;;  %v675_v23 = vshll.u32 %v658_v58, 16  ;;  %v598_v52 = vld [vmem:[%s4704_s21 + $0x18] sm:$0x4]  ;;  %v662_v2 = vld [vmem:[%s4704_s21 + $0x18] sm:$0x8]  ;;  %v639_v49 = vsel %vm4740_vm2, %v4041_v57, %v638_v30  ;;  %v5413_v57 = vpop.permute.xlu0 %2774 }
  0xc6   : > { %496 = vst [vmem:[#allocation2 + $0x18] sm:$0x8] %v495_v43  ;;  %v4033_v59 = vrot.slane %v531_v51, 10  ;;  %752 = vst [vmem:[#allocation2 + $0x1c] sm:$0x8] %v751_v46  ;;  %v279_v53 = vshll.u32 %v258_v10, 16 }
  0xc7   : > { %v341_v27 = vrot.slane %v325_v28, 7  ;;  %v742_v12 = vld [vmem:[%s4704_s21 + $0x18] sm:$0x8]  ;;  %v436_v1 = vsel %vm4761_vm5, %v397_v48, %v435_v13  ;;  %640 = vst [vmem:[#allocation2 + $0x1c] sm:$0x2] %v639_v49  ;;  %v4049_v45 = vrot.slane %v675_v23, 9  ;;  %3132 = vrot.lane.b32.xlu1 %v4194_v14, %s4431_s18  ;;  %3210 = vrot.lane.b32.xlu0 %v4201_v11, %s4434_s24  ;;  %v2349_v48 = vor.u32 %v5356_v19, %v5345_v26 }
  0xc8   : > { %v411_v8 = vshll.u32 %v384_v39, 16  ;;  %v475_v38 = vrot.slane %v459_v21, 6  ;;  %v762_v58 = vld [vmem:[#allocation2 + $0x4c] sm:$0x8]  ;;  %437 = vst [vmem:[#allocation2 + $0x18] sm:$0x4] %v436_v1  ;;  %v575_v32 = vsel %vm4725_vm15, %v4033_v59, %v574_v33  ;;  %v314_v17 = vsel %vm4725_vm15, %v279_v53, %v313_v55  ;;  %v5402_v33 = vpop.permute.xlu1 %3128 }
  0xc9   : > { %v373_v61 = vsel %vm4740_vm2, %v341_v27, %v372_v37  ;;  %v447_v30 = vld [vmem:[#allocation2 + $0x48] sm:$0x4]  ;;  %v551_v10 = vshll.u32 %v518_v16, 16  ;;  %v650_v4 = vld [vmem:[#allocation2 + $0x4c] sm:$0x2]  ;;  %v719_v20 = vsel %vm4761_vm5, %v4049_v45, %v718_v9  ;;  %v4045_v13 = vrot.slane %v598_v52, 9 }
  0xca   : > { %576 = vst [vmem:[#allocation2 + $0x1c] sm:$0x1] %v575_v32  ;;  %315 = vst [vmem:[#allocation2 + $0x48] sm:$0x1] %v314_v17  ;;  %v413_v25 = vrot.slane %v411_v8, 7  ;;  %v507_v11 = vsel %vm4749_vm3, %v475_v38, %v506_v31  ;;  %v695_v14 = vshll.u32 %v662_v2, 16  ;;  %v763_v24 = vsel %vm4749_vm3, %v742_v12, %v762_v58  ;;  %v5440_v17 = vpop.permute.xlu0 %2790 }
  0xcb   : > { %374 = vst [vmem:[#allocation2 + $0x48] sm:$0x2] %v373_v61  ;;  %v586_v5 = vld [vmem:[#allocation2 + $0x4c] sm:$0x1]  ;;  %v5396_v28 = vld [vmem:[#allocation3 + $0x38] sm:$0x1]  ;;  %v651_v37 = vsel %vm4740_vm2, %v4045_v13, %v650_v4  ;;  %3226 = vrot.lane.b32.xlu1 %v4209_v50, %s4434_s24 }
  0xcc   : > { %720 = vst [vmem:[#allocation2 + $0x1c] sm:$0x4] %v719_v20  ;;  %508 = vst [vmem:[#allocation2 + $0x48] sm:$0x8] %v507_v11  ;;  %v4037_v39 = vrot.slane %v551_v10, 10  ;;  %v448_v55 = vsel %vm4761_vm5, %v413_v25, %v447_v30  ;;  %v2160_v56 = vshll.u32 %v5300_v41, 16  ;;  %v5437_v1 = vpop.permute.xlu1 %3048 }
  0xcd   : > { %v730_v21 = vld [vmem:[#allocation2 + $0x4c] sm:$0x4]  ;;  %764 = vst [vmem:[#allocation2 + $0x4c] sm:$0x8] %v763_v24  ;;  %v2166_v40 = vrot.slane %v2164_v7, 4  ;;  %v4053_v36 = vrot.slane %v695_v14, 9 }
  0xce   : > { %v5411_v51 = vld [vmem:[#allocation3 + $0x98] sm:$0x1]  ;;  %449 = vst [vmem:[#allocation2 + $0x48] sm:$0x4] %v448_v55  ;;  %v587_v3 = vsel %vm4725_vm15, %v4037_v39, %v586_v5  ;;  %652 = vst [vmem:[#allocation2 + $0x4c] sm:$0x2] %v651_v37 }
  0xcf   : > { %v2170_v9 = vshll.u32 %v5396_v28, 16  ;;  %v5422_v31 = vld [vmem:[#allocation3 + $0x44] sm:$0x1]  ;;  %v2488_v7 = vld [vmem:[#allocation3 + $0x30] sm:$0xe]  ;;  %v2162_v16 = vrot.slane %v2160_v56, 5  ;;  %v731_v23 = vsel %vm4761_vm5, %v4053_v36, %v730_v21 }
  0xd0   : > { %588 = vst [vmem:[#allocation2 + $0x4c] sm:$0x1] %v587_v3  ;;  %v2352_v43 = vshll.u32 %v5310_v35, 16  ;;  %v2358_v47 = vrot.slane %v2356_v34, 4  ;;  %v5429_v50 = vld [vmem:[#allocation3 + $0xa4] sm:$0x1] }
  0xd1   : > { %v2158_v46 = vrot.slane %v2157_v6, 4  ;;  %v2362_v52 = vshll.u32 %v5411_v51, 16  ;;  %v784_v2 = vld [vmem:[#allocation2 + $0x18] sm:$0xf]  ;;  %732 = vst [vmem:[#allocation2 + $0x4c] sm:$0x4] %v731_v23  ;;  %v2167_v59 = vor.u32 %v2166_v40, %v2162_v16 }
  0xd2   : > { %v2172_v49 = vrot.slane %v2170_v9, 5  ;;  %v2354_v53 = vrot.slane %v2352_v43, 5  ;;  %v2496_v27 = vld [vmem:[#allocation3 + $0x90] sm:$0xe]  ;;  %788 = vst.msk [vmem:[#allocation3 + $0x3c] sm:$0xf] %vm172_vm0, %v784_v2 }
  0xd3   : > { %v2350_v26 = vrot.slane %v2349_v48, 4  ;;  %v2194_v19 = vshll.u32 %v5422_v31, 16  ;;  %v2386_v34 = vshll.u32 %v5429_v50, 16  ;;  %v4089_v12 = vrot.slane %v2488_v7, 9  ;;  %v785_v45 = vld [vmem:[#allocation2 + $0x1c] sm:$0xf]  ;;  %v5475_v7 = vpop.permute.xlu1 %2966 }
  0xd4   : > { %v2168_v8 = vrot.slane %v2167_v59, 4  ;;  %v2359_v38 = vor.u32 %v2358_v47, %v2354_v53  ;;  %v2364_v58 = vrot.slane %v2362_v52, 5  ;;  %v2566_v32 = vrot.slane %v5300_v41, 5  ;;  %789 = vst.msk [vmem:[#allocation3 + $0x40] sm:$0xf] %vm172_vm0, %v785_v45 }
  0xd5   : > { %v2163_v61 = vsel %vm4708_vm14, %v2158_v46, %v2162_v16  ;;  %v2569_v30 = vrot.slane %v5396_v28, 5  ;;  %v4097_v10 = vrot.slane %v2496_v27, 9  ;;  %v2622_v4 = vrot.slane %v5310_v35, 5  ;;  %v839_v20 = vld [vmem:[#allocation3 + $0x30] sm:$0xf]  ;;  %v5480_v46 = vpop.permute.xlu0 %3032 }
  0xd6   : > { %v816_v25 = vld [vmem:[#allocation2 + $0x48] sm:$0xf]  ;;  %v2173_v11 = vsel %vm4708_vm14, %v2168_v8, %v2172_v49  ;;  %v2360_v5 = vrot.slane %v2359_v38, 4  ;;  %v2568_v13 = vrot.slane %v2566_v32, 4  ;;  %v5449_v41 = vld [vmem:[#allocation3 + $0x34] sm:$0xf]  ;;  %v2355_v39 = vsel %vm4708_vm14, %v2350_v26, %v2354_v53 }
  0xd7   : > { %820 = vst.msk [vmem:[#allocation3 + $0x9c] sm:$0xf] %vm172_vm0, %v816_v25  ;;  %v5454_v14 = vrot.slane %v2194_v19, 5  ;;  %v5456_v28 = vrot.slane %v2386_v34, 5  ;;  %v5460_v35 = vsel %vm4649_vm4, %v4089_v12, %v2566_v32  ;;  %v4217_v24 = vcombine.low %v2163_v61, %v2173_v11  ;;  %v5472_v36 = vld [vmem:[#allocation3 + $0x38] sm:$0x1] }
  0xd8   : > { %v2365_v6 = vsel %vm4708_vm14, %v2360_v5, %v2364_v58  ;;  %v979_v55 = vshrl.u32 %v839_v20, 16  ;;  %v982_v37 = vshll.u32 %v839_v20, 16  ;;  %v817_v21 = vld [vmem:[#allocation2 + $0x4c] sm:$0xf]  ;;  %v5466_v56 = vsel %vm4649_vm4, %v2568_v13, %v2569_v30  ;;  %v5502_v5 = vpop.permute.xlu1 %2872 }
  0xd9   : > { %v5470_v40 = vsel %vm4649_vm4, %v4097_v10, %v2622_v4  ;;  %v2624_v3 = vrot.slane %v2622_v4, 4  ;;  %v988_v9 = vshll.u32 %v5449_v41, 16  ;;  %v2060_v16 = vld [vmem:[#allocation3 + $0x3c] sm:$0xf]  ;;  %821 = vst.msk [vmem:[#allocation3 + $0xa0] sm:$0xf] %vm172_vm0, %v817_v21  ;;  %v5482_v59 = vcombine.low %v2355_v39, %v2365_v6 }
  0xda   : > { %v2625_v48 = vrot.slane %v5411_v51, 5  ;;  %v981_v43 = vrot.slane %v979_v55, 4  ;;  %v984_v47 = vrot.slane %v982_v37, 5  ;;  %v992_v23 = vshrl.u32 %v5449_v41, 16  ;;  %v855_v10 = vld [vmem:[#allocation3 + $0x90] sm:$0xf] }
  0xdb   : > { %v2175_v52 = vshrl.u32 %v2060_v16, 16  ;;  %v2178_v2 = vshll.u32 %v2060_v16, 16  ;;  %v5484_v49 = vrot.slane %v988_v9, 5  ;;  %v5486_v53 = vld [vmem:[#allocation3 + $0x40] sm:$0xf]  ;;  %v4233_v27 = vcombine.low %v5460_v35, %v5466_v56 }
  0xdc   : > { %v985_v26 = vor.u32 %v984_v47, %v981_v43  ;;  %v994_v19 = vrot.slane %v992_v23, 4  ;;  %v998_v51 = vshll.u32 %v5472_v36, 16  ;;  %v2188_v45 = vshrl.u32 %v5486_v53, 16  ;;  %v5508_v55 = vld [vmem:[#allocation3 + $0x4] sm:$0xf] }
  0xdd   : > { %v2177_v34 = vrot.slane %v2175_v52, 4  ;;  %v2180_v12 = vrot.slane %v2178_v2, 5  ;;  %v4202_v8 = vcombine.low %v2060_v16, %v5486_v53  ;;  %v2184_v58 = vshll.u32 %v5486_v53, 16  ;;  %v5510_v37 = vld [vmem:[#allocation3] sm:$0xf] }
  0xde   : > { %v2076_v38 = vld [vmem:[#allocation3 + $0x9c] sm:$0xf]  ;;  %v5496_v32 = vsel %vm4649_vm4, %v2624_v3, %v2625_v48  ;;  %v5498_v61 = vrot.slane %v985_v26, 4  ;;  %v995_v30 = vor.u32 %v994_v19, %v5484_v49  ;;  %v2190_v11 = vrot.slane %v2188_v45, 4  ;;  %v5514_v3 = vpop.permute.xlu0 %2950  ;;  %v5521_v19 = vld [vmem:[#allocation3 + $0x94] sm:$0xf] }
  0xdf   : > { %3212 = vrot.lane.b32.xlu0 %v4202_v8, %s4434_s24  ;;  %v2367_v4 = vshrl.u32 %v2076_v38, 16  ;;  %v2370_v20 = vshll.u32 %v2076_v38, 16  ;;  %v2181_v25 = vor.u32 %v2180_v12, %v2177_v34  ;;  %v2186_v13 = vrot.slane %v2184_v58, 5  ;;  %v5530_v45 = vld [vmem:[#allocation3 + $0x98] sm:$0x1] }
  0xe0   : > { %v5504_v39 = vrot.slane %v995_v30, 4  ;;  %v5506_v6 = vrot.slane %v998_v51, 5  ;;  %v4103_v21 = vcombine.low %v5510_v37, %v5508_v55  ;;  %v5516_v9 = vld [vmem:[#allocation3 + $0xa0] sm:$0xf]  ;;  %v1171_v47 = vshrl.u32 %v855_v10, 16 }
  0xe1   : > { %v2369_v16 = vrot.slane %v2367_v4, 4  ;;  %v2372_v48 = vrot.slane %v2370_v20, 5  ;;  %v2182_v43 = vrot.slane %v2181_v25, 4  ;;  %v2380_v23 = vshrl.u32 %v5516_v9, 16  ;;  %v2489_v4 = vld [vmem:[#allocation3 + $0x3c] sm:$0xe] }
  0xe2   : > { %v4210_v52 = vcombine.low %v2076_v38, %v5516_v9  ;;  %v2191_v2 = vor.u32 %v2190_v11, %v2186_v13  ;;  %v2376_v26 = vshll.u32 %v5516_v9, 16  ;;  %v991_v12 = vsel %vm4708_vm14, %v5498_v61, %v5484_v49  ;;  %v5599_v37 = vld [vmem:[#allocation3 + $0xa0] sm:$0xf] }
  0xe3   : > { %3290 = vrot.lane.b32.xlu0 %v4217_v24, %s4435_s25  ;;  %v2187_v51 = vsel %vm4708_vm14, %v2182_v43, %v2186_v13  ;;  %v2373_v34 = vor.u32 %v2372_v48, %v2369_v16  ;;  %v2382_v58 = vrot.slane %v2380_v23, 4  ;;  %v1173_v30 = vrot.slane %v1171_v47, 4  ;;  %v5535_v13 = vpop.permute.xlu1 %3126  ;;  %v2497_v43 = vld [vmem:[#allocation3 + $0x9c] sm:$0xe] }
  0xe4   : > { %3228 = vrot.lane.b32.xlu1 %v4210_v52, %s4434_s24  ;;  %v2192_v8 = vrot.slane %v2191_v2, 4  ;;  %v2378_v38 = vrot.slane %v2376_v26, 5  ;;  %v1174_v20 = vshll.u32 %v855_v10, 16  ;;  %v1180_v25 = vshll.u32 %v5521_v19, 16  ;;  %v5545_v10 = vpop.permute.xlu0 %2856 }
  0xe5   : > { %v2374_v24 = vrot.slane %v2373_v34, 4  ;;  %v1184_v11 = vshrl.u32 %v5521_v19, 16  ;;  %v1001_v16 = vsel %vm4708_vm14, %v5504_v39, %v5506_v6  ;;  %v1190_v48 = vshll.u32 %v5530_v45, 16 }
  0xe6   : > { %v2197_v49 = vsel %vm4708_vm14, %v2192_v8, %v5454_v14  ;;  %v2383_v61 = vor.u32 %v2382_v58, %v2378_v38  ;;  %v1176_v23 = vrot.slane %v1174_v20, 5  ;;  %v1182_v52 = vrot.slane %v1180_v25, 5  ;;  %v4394_v25 = vld [vmem:[#allocation3 + $0x64] sm:$0xf] }
  0xe7   : > { %v4218_v47 = vcombine.low %v2187_v51, %v2197_v49  ;;  %v4090_v2 = vrot.slane %v2489_v4, 9  ;;  %v2379_v14 = vsel %vm4708_vm14, %v2374_v24, %v2378_v38  ;;  %v1186_v34 = vrot.slane %v1184_v11, 4  ;;  %v4395_v49 = vld [vmem:[#allocation3 + $0x60] sm:$0xf]  ;;  %v841_v24 = vld [vmem:[#allocation3 + $0x3c] sm:$0xf] }
  0xe8   : > { %3306 = vrot.lane.b32.xlu1 %v5482_v59, %s4435_s25  ;;  %v2384_v26 = vrot.slane %v2383_v61, 4  ;;  %v2573_v8 = vrot.slane %v5486_v53, 5  ;;  %v1177_v39 = vor.u32 %v1176_v23, %v1173_v30  ;;  %v1192_v6 = vrot.slane %v1190_v48, 5  ;;  %v5560_v48 = vpop.permute.xlu1 %2776 }
  0xe9   : > { %3292 = vrot.lane.b32.xlu0 %v4218_v47, %s4435_s25  ;;  %v2576_v58 = vrot.slane %v5422_v31, 5  ;;  %v4098_v51 = vrot.slane %v2497_v43, 9  ;;  %v1187_v20 = vor.u32 %v1186_v34, %v1182_v52  ;;  %v4111_v38 = vcombine.low %v4395_v49, %v4394_v25  ;;  %v794_v31 = vld [vmem:[#allocation2 + $0x2c] sm:$0x1]  ;;  %v826_v43 = vld [vmem:[#allocation2 + $0x5c] sm:$0x1] }
  0xea   : > { %v2389_v4 = vsel %vm4708_vm14, %v2384_v26, %v5456_v28  ;;  %v2575_v59 = vrot.slane %v2573_v8, 4  ;;  %v4241_v53 = vcombine.low %v5470_v40, %v5496_v32  ;;  %v1178_v61 = vrot.slane %v1177_v39, 4  ;;  %798 = vst.msk [vmem:[#allocation3 + $0x5c] sm:$0x1] %vm175_vm1, %v794_v31  ;;  %830 = vst.msk [vmem:[#allocation3 + $0xbc] sm:$0x1] %vm175_vm1, %v826_v43 }
  0xeb   : > { %v4226_v11 = vcombine.low %v2379_v14, %v2389_v4  ;;  %v2629_v30 = vrot.slane %v5516_v9, 5  ;;  %v1188_v47 = vrot.slane %v1187_v20, 4  ;;  %v2574_v28 = vsel %vm4649_vm4, %v4090_v2, %v2573_v8  ;;  %v5567_v14 = vpop.permute.xlu0 %3110  ;;  %v5582_v2 = vld [vmem:[#allocation3 + $0x40] sm:$0xf]  ;;  %v5607_v4 = vld [vmem:[#allocation3 + $0xa4] sm:$0x1] }
  0xec   : > { %v2577_v23 = vsel %vm4649_vm4, %v2575_v59, %v2576_v58  ;;  %v2632_v26 = vrot.slane %v5429_v50, 5  ;;  %v4123_v40 = vcombine.low %v991_v12, %v1001_v16  ;;  %v1183_v32 = vsel %vm4708_vm14, %v1178_v61, %v1182_v52  ;;  %v857_v16 = vld [vmem:[#allocation3 + $0x9c] sm:$0xf]  ;;  %v5609_v25 = vpop.permute.xlu1 %2792  ;;  %v1270_v61 = vld [vmem:[#allocation3 + $0x30] sm:$0xe] }
  0xed   : > { %3308 = vrot.lane.b32.xlu1 %v4226_v11, %s4435_s25  ;;  %3370 = vrot.lane.b32.xlu0 %v4233_v27, %s4436_s26  ;;  %v5580_v50 = vsel %vm4649_vm4, %v4098_v51, %v2629_v30  ;;  %v2631_v9 = vrot.slane %v2629_v30, 4  ;;  %v5589_v34 = vsel %vm3398_vm6, %v4103_v21, %v5413_v57  ;;  %v1193_v35 = vsel %vm4708_vm14, %v1188_v47, %v1192_v6  ;;  %v5595_v27 = vld [vmem:[#allocation3 + $0x44] sm:$0x1] }
  0xee   : > { %v3425_v56 = vsel %vm3398_vm6, %v4111_v38, %v5440_v17  ;;  %v1003_v12 = vshrl.u32 %v841_v24, 16  ;;  %v4131_v52 = vcombine.low %v1183_v32, %v1193_v35  ;;  %v4234_v8 = vcombine.low %v2574_v28, %v2577_v23 }
  0xef   : > { %v2633_v39 = vsel %vm4649_vm4, %v2631_v9, %v2632_v26  ;;  %vm3447_vm1 = vcmask 64512   ;;  %v1006_v55 = vshll.u32 %v841_v24, 16  ;;  %v1012_v6 = vshll.u32 %v5582_v2, 16  ;;  %v5613_v30 = vpop.permute.xlu0 %3030 }
  0xf0   : > { %v4242_v57 = vcombine.low %v5580_v50, %v2633_v39  ;;  %v1005_v21 = vrot.slane %v1003_v12, 4  ;;  %v1016_v17 = vshrl.u32 %v5582_v2, 16  ;;  %v1022_v51 = vshll.u32 %v5595_v27, 16  ;;  %v1278_v12 = vld [vmem:[#allocation3 + $0x90] sm:$0xe] }
  0xf1   : > { %3386 = vrot.lane.b32.xlu1 %v4241_v53, %s4436_s26  ;;  %2782 = vrot.lane.b32.xlu0 %v4123_v40, %s4432_s22  ;;  %v1008_v58 = vrot.slane %v1006_v55, 5  ;;  %v1195_v20 = vshrl.u32 %v857_v16, 16  ;;  %v1198_v59 = vshll.u32 %v857_v16, 16  ;;  %v1014_v49 = vrot.slane %v1012_v6, 5 }
  0xf2   : > { %v1018_v38 = vrot.slane %v1016_v17, 4  ;;  %v1204_v24 = vshll.u32 %v5599_v37, 16  ;;  %v1208_v11 = vshrl.u32 %v5599_v37, 16  ;;  %v1024_v31 = vrot.slane %v1022_v51, 5 }
  0xf3   : > { %v1009_v53 = vor.u32 %v1008_v58, %v1005_v21  ;;  %v1197_v43 = vrot.slane %v1195_v20, 4  ;;  %v1200_v47 = vrot.slane %v1198_v59, 5  ;;  %v1214_v40 = vshll.u32 %v5607_v4, 16 }
  0xf4   : > { %v1019_v28 = vor.u32 %v1018_v38, %v1014_v49  ;;  %v1206_v23 = vrot.slane %v1204_v24, 5  ;;  %v1210_v26 = vrot.slane %v1208_v11, 4  ;;  %v4059_v9 = vrot.slane %v1270_v61, 9  ;;  %v1271_v38 = vld [vmem:[#allocation3 + $0x3c] sm:$0xe] }
  0xf5   : > { %2798 = vrot.lane.b32.xlu1 %v4131_v52, %s4432_s22  ;;  %3372 = vrot.lane.b32.xlu0 %v4234_v8, %s4436_s26  ;;  %v1010_v32 = vrot.slane %v1009_v53, 4  ;;  %v1201_v50 = vor.u32 %v1200_v47, %v1197_v43  ;;  %v1363_v35 = vrot.slane %v5449_v41, 5  ;;  %v1216_v55 = vrot.slane %v1214_v40, 5  ;;  %v5624_v8 = vpop.permute.xlu1 %3046  ;;  %v1279_v61 = vld [vmem:[#allocation3 + $0x9c] sm:$0xe] }
  0xf6   : > { %v1020_v16 = vrot.slane %v1019_v28, 4  ;;  %v1211_v39 = vor.u32 %v1210_v26, %v1206_v23  ;;  %v1366_v21 = vrot.slane %v5472_v36, 5  ;;  %v3465_v51 = vsel %vm3447_vm1, %v3425_v56, %v5366_v63  ;;  %v5630_v36 = vpop.permute.xlu0 %3206  ;;  %v5641_v43 = vld [vmem:[#allocation3 + $0x3c] sm:$0xf] }
  0xf7   : > { %v1015_v6 = vsel %vm4708_vm14, %v1010_v32, %v1014_v49  ;;  %v1202_v17 = vrot.slane %v1201_v50, 4  ;;  %v1364_v52 = vsel %vm4649_vm4, %v4059_v9, %v1363_v35  ;;  %v1365_v58 = vrot.slane %v1363_v35, 4 }
  0xf8   : > { %v1025_v41 = vsel %vm4708_vm14, %v1020_v16, %v1024_v31  ;;  %v1212_v20 = vrot.slane %v1211_v39, 4  ;;  %v4067_v59 = vrot.slane %v1278_v12, 9  ;;  %v1419_v53 = vrot.slane %v5521_v19, 5  ;;  %v1469_v39 = vld [vmem:[#allocation3 + $0x9c] sm:$0xf] }
  0xf9   : > { %3388 = vrot.lane.b32.xlu1 %v4242_v57, %s4436_s26  ;;  %v4124_v49 = vcombine.low %v1015_v6, %v1025_v41  ;;  %v1207_v24 = vsel %vm4708_vm14, %v1202_v17, %v1206_v23  ;;  %v1367_v11 = vsel %vm4649_vm4, %v1365_v58, %v1366_v21  ;;  %v1422_v31 = vrot.slane %v5530_v45, 5  ;;  %v5675_v58 = vld [vmem:[#allocation3 + $0x48] sm:$0xf] }
  0xfa   : > { %v1217_v63 = vsel %vm4708_vm14, %v1212_v20, %v1216_v55  ;;  %v4139_v56 = vcombine.low %v1364_v52, %v1367_v11  ;;  %v4060_v47 = vrot.slane %v1271_v38, 9  ;;  %v1370_v28 = vrot.slane %v5582_v2, 5  ;;  %v5654_v2 = vpop.permute.xlu1 %3222  ;;  %v5661_v55 = vpop.permute.xlu0 %3208  ;;  %v5673_v52 = vld [vmem:[#allocation3 + $0x40] sm:$0xf]  ;;  %v4397_v38 = vld [vmem:[#allocation3 + $0x10] sm:$0xf] }
  0xfb   : > { %2784 = vrot.lane.b32.xlu0 %v4124_v49, %s4432_s22  ;;  %v4132_v57 = vcombine.low %v1207_v24, %v1217_v63  ;;  %v1373_v23 = vrot.slane %v5595_v27, 5  ;;  %v1420_v26 = vsel %vm4649_vm4, %v4067_v59, %v1419_v53  ;;  %v1421_v40 = vrot.slane %v1419_v53, 4  ;;  %v5681_v59 = vld [vmem:[#allocation3 + $0xa0] sm:$0xf] }
  0xfc   : > { %v4068_v32 = vrot.slane %v1279_v61, 9  ;;  %v1426_v50 = vrot.slane %v5599_v37, 5  ;;  %v1371_v19 = vsel %vm4649_vm4, %v4060_v47, %v1370_v28  ;;  %v1372_v45 = vrot.slane %v1370_v28, 4  ;;  %v5684_v61 = vld [vmem:[#allocation3 + $0x4c] sm:$0xf] }
  0xfd   : > { %2800 = vrot.lane.b32.xlu1 %v4132_v57, %s4432_s22  ;;  %v1429_v9 = vrot.slane %v5607_v4, 5  ;;  %v1590_v35 = vshrl.u32 %v5641_v43, 16  ;;  %v1423_v27 = vsel %vm4649_vm4, %v1421_v40, %v1422_v31  ;;  %v1593_v37 = vshll.u32 %v5641_v43, 16  ;;  %v1471_v31 = vld [vmem:[#allocation3 + $0xa8] sm:$0xf] }
  0xfe   : > { %v1427_v12 = vsel %vm4649_vm4, %v4068_v32, %v1426_v50  ;;  %v1428_v16 = vrot.slane %v1426_v50, 4  ;;  %v5665_v21 = vsel %vm3480_vm7, %v3465_v51, %v5475_v7  ;;  %v3449_v4 = vsel %vm3447_vm1, %v5589_v34, %v5333_v44  ;;  %v4396_v34 = vld [vmem:[#allocation3 + $0xc] sm:$0xf]  ;;  %v5689_v57 = vpop.permute.xlu0 %3286 }
  0xff   : > { %2862 = vrot.lane.b32.xlu0 %v4139_v56, %s4430_s16  ;;  %v4147_v6 = vcombine.low %v1420_v26, %v1423_v27  ;;  %v1374_v17 = vsel %vm4649_vm4, %v1372_v45, %v1373_v23  ;;  %v3482_v41 = vsel %vm3480_vm7, %v3449_v4, %v5514_v3  ;;  %v1592_v51 = vrot.slane %v1590_v35, 4  ;;  %v5698_v40 = vpop.permute.xlu1 %3224  ;;  %v4399_v27 = vld [vmem:[#allocation3 + $0x6c] sm:$0xf] }
 0x100   : > { %v4140_v20 = vcombine.low %v1371_v19, %v1374_v17  ;;  %v1430_v7 = vsel %vm4649_vm4, %v1428_v16, %v1429_v9  ;;  %v4104_v49 = vcombine.low %v4396_v34, %v4397_v38  ;;  %v1782_v24 = vshrl.u32 %v1469_v39, 16  ;;  %v5703_v9 = vld [vmem:[#allocation3 + $0xac] sm:$0xf] }
 0x101   : > { %2878 = vrot.lane.b32.xlu1 %v4147_v6, %s4430_s16  ;;  %v4148_v44 = vcombine.low %v1427_v12, %v1430_v7  ;;  %v1785_v11 = vshll.u32 %v1469_v39, 16  ;;  %v1595_v63 = vrot.slane %v1593_v37, 5  ;;  %v1603_v3 = vshrl.u32 %v5673_v52, 16  ;;  %v5706_v37 = vld [vmem:[#allocation3 + $0x44] sm:$0x1] }
 0x102   : > { %v1614_v56 = vshrl.u32 %v5675_v58, 16  ;;  %v1617_v53 = vshll.u32 %v5675_v58, 16  ;;  %v4155_v47 = vcombine.low %v5641_v43, %v5673_v52  ;;  %v3404_v28 = vsel %vm3398_vm6, %v4104_v49, %v5560_v48  ;;  %v4398_v48 = vld [vmem:[#allocation3 + $0x70] sm:$0xf] }
 0x103   : > { %2864 = vrot.lane.b32.xlu0 %v4140_v20, %s4430_s16  ;;  %v1795_v23 = vshrl.u32 %v5681_v59, 16  ;;  %v4163_v26 = vcombine.low %v1469_v39, %v5681_v59  ;;  %v3451_v32 = vsel %vm3447_vm1, %v3404_v28, %v5545_v10  ;;  %v1784_v50 = vrot.slane %v1782_v24, 4  ;;  %v5730_v24 = vld [vmem:[#allocation3 + $0xa4] sm:$0x1] }
 0x104   : > { %v1787_v19 = vrot.slane %v1785_v11, 5  ;;  %v1627_v45 = vshrl.u32 %v5684_v61, 16  ;;  %v1616_v43 = vrot.slane %v1614_v56, 4  ;;  %v1619_v35 = vrot.slane %v1617_v53, 5 }
 0x105   : > { %2880 = vrot.lane.b32.xlu1 %v4148_v44, %s4430_s16  ;;  %v4112_v12 = vcombine.low %v4399_v27, %v4398_v48  ;;  %v1806_v16 = vshrl.u32 %v1471_v31, 16  ;;  %v5710_v39 = vsel %vm3480_vm7, %v3451_v32, %v5288_v29  ;;  %v4156_v10 = vcombine.low %v5675_v58, %v5684_v61  ;;  %v5720_v44 = vpop.permute.xlu1 %3302  ;;  %v5722_v29 = vpop.permute.xlu0 %3288 }
 0x106   : > { %v1809_v4 = vshll.u32 %v1471_v31, 16  ;;  %v3515_v17 = vsel %vm3513_vm8, %v3482_v41, %v5613_v30  ;;  %v1596_v20 = vor.u32 %v1595_v63, %v1592_v51  ;;  %v1599_v7 = vshll.u32 %v5673_v52, 16 }
 0x107   : > { %2958 = vrot.lane.b32.xlu0 %v4155_v47, %s4429_s15  ;;  %v3428_v6 = vsel %vm3398_vm6, %v4112_v12, %v5609_v25  ;;  %v1819_v34 = vshrl.u32 %v5703_v9, 16  ;;  %v4164_v58 = vcombine.low %v1471_v31, %v5703_v9  ;;  %v1605_v38 = vrot.slane %v1603_v3, 4 }
 0x108   : > { %v1609_v49 = vshll.u32 %v5706_v37, 16  ;;  %v3467_v25 = vsel %vm3447_vm1, %v3428_v6, %v5502_v5  ;;  %v1808_v30 = vrot.slane %v1806_v16, 4  ;;  %v1597_v41 = vrot.slane %v1596_v20, 4  ;;  %v5737_v5 = vld [vmem:[#allocation3 + $0x50] sm:$0x1] }
 0x109   : > { %2974 = vrot.lane.b32.xlu1 %v4163_v26, %s4429_s15  ;;  %v1601_v51 = vrot.slane %v1599_v7, 5  ;;  %v1811_v11 = vrot.slane %v1809_v4, 5  ;;  %v3531_v56 = vsel %vm3513_vm8, %v5665_v21, %v5624_v8  ;;  %v1788_v53 = vor.u32 %v1787_v19, %v1784_v50  ;;  %v5739_v47 = vpop.permute.xlu0 %3366  ;;  %v5746_v27 = vpop.permute.xlu1 %3304 }
 0x10a   : > { %v1611_v63 = vrot.slane %v1609_v49, 5  ;;  %vm3546_vm9 = vcmask 162816   ;;  %vm6705_vm10 = vcmask 195584   ;;  %v1791_v31 = vshll.u32 %v5681_v59, 16 }
 0x10b   : > { %2960 = vrot.lane.b32.xlu0 %v4156_v10, %s4429_s15  ;;  %v1606_v3 = vor.u32 %v1605_v38, %v1601_v51  ;;  %v1602_v28 = vsel %vm4708_vm14, %v1597_v41, %v1601_v51  ;;  %v1789_v26 = vrot.slane %v1788_v53, 4  ;;  %v1797_v32 = vrot.slane %v1795_v23, 4  ;;  %v5765_v38 = vld [vmem:[#allocation3 + $0xb0] sm:$0x1]  ;;  %v1881_v41 = vld [vmem:[#allocation3 + $0x3c] sm:$0xe] }
 0x10c   : > { %v1801_v48 = vshll.u32 %v5730_v24, 16  ;;  %v1793_v21 = vrot.slane %v1791_v31, 5  ;;  %v1620_v50 = vor.u32 %v1619_v35, %v1616_v43  ;;  %v1623_v19 = vshll.u32 %v5684_v61, 16 }
 0x10d   : > { %2976 = vrot.lane.b32.xlu1 %v4164_v58, %s4429_s15  ;;  %v1607_v8 = vrot.slane %v1606_v3, 4  ;;  %v3500_v12 = vsel %vm3480_vm7, %v3467_v25, %v5323_v60  ;;  %v3548_v16 = vsel %vm3546_vm9, %v3515_v17, %v5567_v14  ;;  %v1629_v10 = vrot.slane %v1627_v45, 4  ;;  %v5755_v43 = vpop.permute.xlu0 %2778  ;;  %v5768_v51 = vpop.permute.xlu1 %3382 }
 0x10e   : > { %v1633_v23 = vshll.u32 %v5737_v5, 16  ;;  %v1798_v6 = vor.u32 %v1797_v32, %v1793_v21  ;;  %v1803_v20 = vrot.slane %v1801_v48, 5  ;;  %v1621_v7 = vrot.slane %v1620_v50, 4 }
 0x10f   : > { %v1612_v4 = vsel %vm4708_vm14, %v1607_v8, %v1611_v63  ;;  %v5759_v58 = vsel %vm6705_vm10, %v3548_v16, %v5630_v36  ;;  %v1625_v60 = vrot.slane %v1623_v19, 5  ;;  %v3564_v14 = vsel %vm3546_vm9, %v3531_v56, %v5535_v13 }
 0x110   : > { %v4171_v35 = vcombine.low %v1602_v28, %v1612_v4  ;;  %v1794_v45 = vsel %vm4708_vm14, %v1789_v26, %v1793_v21  ;;  %v1799_v17 = vrot.slane %v1798_v6, 4  ;;  %v1812_v49 = vor.u32 %v1811_v11, %v1808_v30  ;;  %v1889_v21 = vld [vmem:[#allocation3 + $0x9c] sm:$0xe] }
 0x111   : > { %v1815_v25 = vshll.u32 %v5703_v9, 16  ;;  %v1630_v36 = vor.u32 %v1629_v10, %v1625_v60  ;;  %v1635_v63 = vrot.slane %v1633_v23, 5  ;;  %v3517_v13 = vsel %vm3513_vm8, %v5710_v39, %v5480_v46  ;;  %v5778_v31 = vpop.permute.xlu0 %3368  ;;  %v5785_v50 = vpop.permute.xlu1 %2794 }
 0x112   : > { %3038 = vrot.lane.b32.xlu0 %v4171_v35, %s4433_s23  ;;  %v1821_v56 = vrot.slane %v1819_v34, 4  ;;  %v1804_v53 = vsel %vm4708_vm14, %v1799_v17, %v1803_v20  ;;  %v1626_v30 = vsel %vm4708_vm14, %v1621_v7, %v1625_v60  ;;  %v1813_v11 = vrot.slane %v1812_v49, 4  ;;  %v1890_v17 = vld [vmem:[#allocation3 + $0xa8] sm:$0xe] }
 0x113   : > { %v1817_v3 = vrot.slane %v1815_v25, 5  ;;  %v4179_v28 = vcombine.low %v1794_v45, %v1804_v53  ;;  %v1631_v26 = vrot.slane %v1630_v36, 4  ;;  %v1825_v32 = vshll.u32 %v5765_v38, 16 }
 0x114   : > { %v4075_v48 = vrot.slane %v1881_v41, 9  ;;  %v3597_v8 = vsel %vm6705_vm10, %v3564_v14, %v5654_v2  ;;  %v1971_v39 = vrot.slane %v5673_v52, 5  ;;  %v1974_v34 = vrot.slane %v5706_v37, 5 }
 0x115   : > { %v1822_v46 = vor.u32 %v1821_v56, %v1817_v3  ;;  %3054 = vrot.lane.b32.xlu1 %v4179_v28, %s4433_s23  ;;  %v1636_v19 = vsel %vm4708_vm14, %v1631_v26, %v1635_v63  ;;  %v3550_v16 = vsel %vm3546_vm9, %v3517_v13, %v5374_v0  ;;  %v1818_v10 = vsel %vm4708_vm14, %v1813_v11, %v1817_v3  ;;  %v1882_v0 = vld [vmem:[#allocation3 + $0x48] sm:$0xe]  ;;  %v5801_v60 = vpop.permute.xlu0 %2780  ;;  %v5809_v49 = vpop.permute.xlu1 %3384  ;;  %v255_v26 = vld [vmem:[%s4704_s21 + $0xc] sm:$0x1] }
 0x116   : > { %v1827_v2 = vrot.slane %v1825_v32, 5  ;;  %v4172_v23 = vcombine.low %v1626_v30, %v1636_v19  ;;  %v1972_v52 = vsel %vm4649_vm4, %v4075_v48, %v1971_v39  ;;  %v1973_v37 = vrot.slane %v1971_v39, 4  ;;  %v5817_v56 = vld [vmem:[#allocation3 + $0x48] sm:$0xf] }
 0x117   : > { %v1823_v4 = vrot.slane %v1822_v46, 4  ;;  %v3583_v6 = vsel %vm6705_vm10, %v3550_v16, %v5661_v55  ;;  %v3533_v20 = vsel %vm3513_vm8, %v3500_v12, %v5437_v1  ;;  %v4083_v7 = vrot.slane %v1889_v21, 9  ;;  %v322_v21 = vld [vmem:[%s4704_s21 + $0xc] sm:$0x1] }
 0x118   : > { %v2027_v35 = vrot.slane %v5681_v59, 5  ;;  %3040 = vrot.lane.b32.xlu0 %v4172_v23, %s4433_s23  ;;  %v1975_v45 = vsel %vm4649_vm4, %v1973_v37, %v1974_v34  ;;  %vm3612_vm11 = vcmask 228352   ;;  %v2030_v55 = vrot.slane %v5730_v24, 5  ;;  %v5845_v34 = vld [vmem:[#allocation3 + $0xac] sm:$0xf] }
 0x119   : > { %v1828_v14 = vsel %vm4708_vm14, %v1823_v4, %v1827_v2  ;;  %v4187_v12 = vcombine.low %v1972_v52, %v1975_v45  ;;  %v3566_v41 = vsel %vm3546_vm9, %v3533_v20, %v5402_v33  ;;  %v4076_v36 = vrot.slane %v1882_v0, 9  ;;  %v5830_v11 = vpop.permute.xlu0 %2858  ;;  %v304_v2 = vld [vmem:[#allocation2 + $0x24] sm:$0x1]  ;;  %v363_v23 = vld [vmem:[#allocation2 + $0x24] sm:$0x2] }
 0x11a   : > { %v4180_v1 = vcombine.low %v1818_v10, %v1828_v14  ;;  %v2028_v59 = vsel %vm4649_vm4, %v4083_v7, %v2027_v35  ;;  %v2029_v25 = vrot.slane %v2027_v35, 4  ;;  %v1978_v63 = vrot.slane %v5684_v61, 5  ;;  %v5828_v61 = vld [vmem:[#allocation3 + $0x4c] sm:$0xf] }
 0x11b   : > { %v1981_v13 = vrot.slane %v5737_v5, 5  ;;  %v5823_v24 = vsel %vm3612_vm11, %v5759_v58, %v5689_v57  ;;  %v4084_v30 = vrot.slane %v1890_v17, 9  ;;  %v2034_v33 = vrot.slane %v5703_v9, 5  ;;  %v5836_v58 = vld [vmem:[#allocation3 + $0xa8] sm:$0xf]  ;;  %v5839_v9 = vpop.permute.xlu1 %2796 }
 0x11c   : > { %3056 = vrot.lane.b32.xlu1 %v4180_v1, %s4433_s23  ;;  %v2031_v53 = vsel %vm4649_vm4, %v2029_v25, %v2030_v55  ;;  %3118 = vrot.lane.b32.xlu0 %v4187_v12, %s4431_s18  ;;  %v1979_v3 = vsel %vm4649_vm4, %v4076_v36, %v1978_v63  ;;  %v1980_v28 = vrot.slane %v1978_v63, 4  ;;  %v2037_v57 = vrot.slane %v5765_v38, 5  ;;  %v381_v4 = vld [vmem:[%s4704_s21 + $0xc] sm:$0x2]  ;;  %v515_v37 = vld [vmem:[%s4704_s21 + $0xc] sm:$0x4] }
 0x11d   : > { %v4195_v5 = vcombine.low %v2028_v59, %v2031_v53  ;;  %v2035_v32 = vsel %vm4649_vm4, %v4084_v30, %v2034_v33  ;;  %v2036_v48 = vrot.slane %v2034_v33, 4  ;;  %v2199_v46 = vshrl.u32 %v5817_v56, 16  ;;  %v456_v52 = vld [vmem:[%s4704_s21 + $0xc] sm:$0x2]  ;;  %v438_v55 = vld [vmem:[#allocation2 + $0x24] sm:$0x4]  ;;  %v5881_v59 = vpop.permute.xlu0 %2860 }
 0x11e   : > { %v2202_v39 = vshll.u32 %v5817_v56, 16  ;;  %v5850_v38 = vsel %vm6705_vm10, %v3566_v41, %v5698_v40  ;;  %v1982_v19 = vsel %vm4649_vm4, %v1980_v28, %v1981_v13  ;;  %v5856_v16 = vsel %vm3612_vm11, %v3597_v8, %v5720_v44  ;;  %v497_v8 = vld [vmem:[#allocation2 + $0x24] sm:$0x8]  ;;  %v641_v17 = vld [vmem:[#allocation2 + $0x28] sm:$0x2] }
 0x11f   : > { %v5860_v10 = vsel %vm3612_vm11, %v3583_v6, %v5722_v29  ;;  %v4188_v40 = vcombine.low %v1979_v3, %v1982_v19  ;;  %v2038_v20 = vsel %vm4649_vm4, %v2036_v48, %v2037_v57  ;;  %v2212_v7 = vshrl.u32 %v5828_v61, 16  ;;  %v595_v29 = vld [vmem:[%s4704_s21 + $0xc] sm:$0x4]  ;;  %v659_v6 = vld [vmem:[%s4704_s21 + $0xc] sm:$0x8]  ;;  %v5879_v12 = vpop.permute.xlu1 %2874 }
 0x120   : > { %3134 = vrot.lane.b32.xlu1 %v4195_v5, %s4431_s18  ;;  %v4203_v44 = vcombine.low %v5817_v56, %v5828_v61  ;;  %v4196_v35 = vcombine.low %v2035_v32, %v2038_v20  ;;  %v5873_v0 = vrot.slane %v2199_v46, 4  ;;  %v5875_v14 = vrot.slane %v2202_v39, 5  ;;  %v739_v1 = vld [vmem:[%s4704_s21 + $0xc] sm:$0x8]  ;;  %v577_v13 = vld [vmem:[#allocation2 + $0x28] sm:$0x1] }
 0x121   : > { %v2391_v45 = vshrl.u32 %v5836_v58, 16  ;;  %3120 = vrot.lane.b32.xlu0 %v4188_v40, %s4431_s18  ;;  %v2394_v25 = vshll.u32 %v5836_v58, 16  ;;  %v270_v41 = vshll.u32 %v255_v26, 16  ;;  %v338_v36 = vrot.slane %v322_v21, 7  ;;  %v753_v56 = vld [vmem:[#allocation2 + $0x28] sm:$0x8] }
 0x122   : > { %v399_v63 = vshll.u32 %v381_v4, 16  ;;  %v2404_v53 = vshrl.u32 %v5845_v34, 16  ;;  %v4211_v30 = vcombine.low %v5836_v58, %v5845_v34  ;;  %v472_v33 = vrot.slane %v456_v52, 6  ;;  %v259_v3 = vld [vmem:[%s4704_s21 + $0x1c] sm:$0x1] }
 0x123   : > { %v536_v5 = vshll.u32 %v515_v37, 16  ;;  %v326_v28 = vld [vmem:[%s4704_s21 + $0x1c] sm:$0x1]  ;;  %v305_v57 = vsel %vm4725_vm15, %v270_v41, %v304_v2  ;;  %v364_v26 = vsel %vm4740_vm2, %v338_v36, %v363_v23  ;;  %v4042_v48 = vrot.slane %v595_v29, 9  ;;  %v721_v46 = vld [vmem:[#allocation2 + $0x28] sm:$0x4] }
 0x124   : > { %3136 = vrot.lane.b32.xlu1 %v4196_v35, %s4431_s18  ;;  %v401_v32 = vrot.slane %v399_v63, 7  ;;  %v385_v39 = vld [vmem:[%s4704_s21 + $0x1c] sm:$0x2]  ;;  %306 = vst [vmem:[#allocation2 + $0x24] sm:$0x1] %v305_v57  ;;  %v498_v58 = vsel %vm4749_vm3, %v472_v33, %v497_v8  ;;  %v680_v4 = vshll.u32 %v659_v6, 16  ;;  %v754_v2 = vsel %vm4749_vm3, %v739_v1, %v753_v56  ;;  %v5908_v35 = vpop.permute.xlu1 %2876  ;;  %v5919_v56 = vpop.permute.xlu0 %2954 }
 0x125   : > { %v460_v21 = vld [vmem:[%s4704_s21 + $0x1c] sm:$0x2]  ;;  %365 = vst [vmem:[#allocation2 + $0x24] sm:$0x2] %v364_v26  ;;  %v4034_v19 = vrot.slane %v536_v5, 10  ;;  %3214 = vrot.lane.b32.xlu0 %v4203_v44, %s4434_s24  ;;  %v642_v8 = vsel %vm4740_vm2, %v4042_v48, %v641_v17  ;;  %vm3645_vm12 = vcmask 261120   ;;  %v2205_v54 = vor.u32 %v5875_v14, %v5873_v0 }
 0x126   : > { %v316_v52 = vld [vmem:[#allocation2 + $0x54] sm:$0x1]  ;;  %v375_v37 = vld [vmem:[#allocation2 + $0x54] sm:$0x2]  ;;  %v509_v40 = vld [vmem:[#allocation2 + $0x54] sm:$0x8]  ;;  %v439_v20 = vsel %vm4761_vm5, %v401_v32, %v438_v55  ;;  %v3647_v41 = vsel %vm3645_vm12, %v5823_v24, %v5739_v47  ;;  %v3632_v0 = vsel %vm3612_vm11, %v5850_v38, %v5746_v27  ;;  %v3649_v27 = vsel %vm3645_vm12, %v5860_v10, %v5778_v31 }
 0x127   : > { %v519_v23 = vld [vmem:[%s4704_s21 + $0x1c] sm:$0x4]  ;;  %499 = vst [vmem:[#allocation2 + $0x24] sm:$0x8] %v498_v58  ;;  %755 = vst [vmem:[#allocation2 + $0x28] sm:$0x8] %v754_v2  ;;  %v578_v44 = vsel %vm4725_vm15, %v4034_v19, %v577_v13 }
 0x128   : > { %vm3705_vm13 = vcmask 293888   ;;  %v599_v29 = vld [vmem:[%s4704_s21 + $0x1c] sm:$0x4]  ;;  %v653_v6 = vld [vmem:[#allocation2 + $0x58] sm:$0x2]  ;;  %v5910_v1 = vrot.slane %v2391_v45, 4  ;;  %3230 = vrot.lane.b32.xlu1 %v4211_v30, %s4434_s24 }
 0x129   : > { %440 = vst [vmem:[#allocation2 + $0x24] sm:$0x4] %v439_v20  ;;  %643 = vst [vmem:[#allocation2 + $0x28] sm:$0x2] %v642_v8  ;;  %v4050_v55 = vrot.slane %v680_v4, 9  ;;  %4296 = vmatprep.mubr.msk.bf16.mxu0 %vm3705_vm13, %v3647_v41  ;;  %v282_v45 = vshll.u32 %v259_v3, 16 }
 0x12a   : > { %v450_v17 = vld [vmem:[#allocation2 + $0x54] sm:$0x4]  ;;  %v663_v36 = vld [vmem:[%s4704_s21 + $0x1c] sm:$0x8]  ;;  %579 = vst [vmem:[#allocation2 + $0x28] sm:$0x1] %v578_v44 }
 0x12b   : > { %v743_v63 = vld [vmem:[%s4704_s21 + $0x1c] sm:$0x8]  ;;  %v342_v33 = vrot.slane %v326_v28, 7  ;;  %v415_v5 = vshll.u32 %v385_v39, 16  ;;  %v476_v13 = vrot.slane %v460_v21, 6  ;;  %v5923_v26 = vrot.slane %v2394_v25, 5 }
 0x12c   : > { %v765_v57 = vld [vmem:[#allocation2 + $0x58] sm:$0x8]  ;;  %v722_v47 = vsel %vm4761_vm5, %v4050_v55, %v721_v46  ;;  %v556_v24 = vshll.u32 %v519_v23, 16  ;;  %v4046_v32 = vrot.slane %v599_v29, 9  ;;  %v317_v30 = vsel %vm4725_vm15, %v282_v45, %v316_v52  ;;  %v589_v39 = vld [vmem:[#allocation2 + $0x58] sm:$0x1] }
 0x12d   : > { %v4379_v48 = vld [vmem:[%s6702_s1 + $0x10] ss:$0 sps:$4 sm:$0x33]   ;;  %723 = vst [vmem:[#allocation2 + $0x28] sm:$0x4] %v722_v47  ;;  %v376_v3 = vsel %vm4740_vm2, %v342_v33, %v375_v37  ;;  %v417_v28 = vrot.slane %v415_v5, 7  ;;  %v510_v25 = vsel %vm4749_vm3, %v476_v13, %v509_v40  ;;  %v766_v19 = vsel %vm4749_vm3, %v743_v63, %v765_v57  ;;  %v5949_v40 = vpop.permute.xlu1 %2970 }
 0x12e   : > { %318 = vst [vmem:[#allocation2 + $0x54] sm:$0x1] %v317_v30  ;;  %377 = vst [vmem:[#allocation2 + $0x54] sm:$0x2] %v376_v3  ;;  %v4038_v46 = vrot.slane %v556_v24, 10  ;;  %v654_v21 = vsel %vm4740_vm2, %v4046_v32, %v653_v6  ;;  %v700_v58 = vshll.u32 %v663_v36, 16  ;;  %v3663_v37 = vsel %vm3645_vm12, %v5856_v16, %v5768_v51  ;;  %v5958_v16 = vpop.permute.xlu0 %2956 }
 0x12f   : > { %511 = vst [vmem:[#allocation2 + $0x54] sm:$0x8] %v510_v25  ;;  %v5940_v4 = vld [vmem:[#allocation3 + $0x50] sm:$0x1]  ;;  %v451_v2 = vsel %vm4761_vm5, %v417_v28, %v450_v17  ;;  %655 = vst [vmem:[#allocation2 + $0x58] sm:$0x2] %v654_v21  ;;  %4312 = vmatprep.mubr.msk.bf16.mxu1 %vm3705_vm13, %v3663_v37  ;;  %v2397_v38 = vor.u32 %v5923_v26, %v5910_v1  ;;  %v3665_v32 = vsel %vm3645_vm12, %v3632_v0, %v5809_v49 }
 0x130   : > { %v733_v52 = vld [vmem:[#allocation2 + $0x58] sm:$0x4]  ;;  %767 = vst [vmem:[#allocation2 + $0x58] sm:$0x8] %v766_v19  ;;  %vm3738_vm10 = vcmask 1041408   ;;  %v590_v62 = vsel %vm4725_vm15, %v4038_v46, %v589_v39  ;;  %v4054_v23 = vrot.slane %v700_v58, 9 }
 0x131   : > { %452 = vst [vmem:[#allocation2 + $0x54] sm:$0x4] %v451_v2  ;;  %4334 = vmatprep.subr.msk.bf16.mxu0 %vm3738_vm10, %v4379_v48  ;;  %v2208_v20 = vshll.u32 %v5828_v61, 16  ;;  %v2214_v51 = vrot.slane %v2212_v7, 4  ;;  %v792_v14 = vld [vmem:[#allocation2 + $0x24] sm:$0xf]  ;;  %4335 = vmatprep.subr.msk.bf16.mxu1 %vm3738_vm10, %v4379_v48  ;;  %v5989_v28 = vpop.permute.xlu1 %2972 }
 0x132   : > { %v4400_v8 = vld [vmem:[#allocation3 + $0x18] sm:$0xf]  ;;  %591 = vst [vmem:[#allocation2 + $0x58] sm:$0x1] %v590_v62  ;;  %v2218_v6 = vshll.u32 %v5940_v4, 16  ;;  %v3740_v44 = vsel %vm3738_vm10, %v4379_v48, 0  ;;  %v734_v7 = vsel %vm4761_vm5, %v4054_v23, %v733_v52  ;;  %v5994_v46 = vpop.permute.xlu0 %3034 }
 0x133   : > { %v4105_v29 = vcombine.low %v4400_v8, %v4401_v42  ;;  %v5966_v55 = vld [vmem:[#allocation3 + $0xb0] sm:$0x1]  ;;  %796 = vst.msk [vmem:[#allocation3 + $0x54] sm:$0xf] %vm172_vm0, %v792_v14  ;;  %v2210_v41 = vrot.slane %v2208_v20, 5  ;;  %4295 = vmatpush3.bf16.msra.mxu0 %v3740_v44  ;;  %4333 = vmatpush3.bf16.msra.mxu1 %v3740_v44  ;;  %v2206_v36 = vrot.slane %v2205_v54, 4 }
 0x134   : > { %v5976_v17 = vld [vmem:[#allocation3 + $0x5c] sm:$0x1]  ;;  %735 = vst [vmem:[#allocation2 + $0x58] sm:$0x4] %v734_v7  ;;  %v4402_v63 = vld [vmem:[#allocation3 + $0x78] sm:$0xf] }
 0x135   : > { %v4403_v45 = vld [vmem:[#allocation3 + $0x7c] sm:$0xf]  ;;  %v2400_v15 = vshll.u32 %v5845_v34, 16  ;;  %v2406_v5 = vrot.slane %v2404_v53, 4  ;;  %v793_v57 = vld [vmem:[#allocation2 + $0x28] sm:$0xf]  ;;  %v2215_v31 = vor.u32 %v2214_v51, %v2210_v41  ;;  %v3407_v25 = vsel %vm3398_vm6, %v4105_v29, %v5755_v43 }
 0x136   : > { %v4113_v33 = vcombine.low %v4402_v63, %v4403_v45  ;;  %v5981_v13 = vld [vmem:[#allocation3 + $0xbc] sm:$0x1]  ;;  %v2220_v10 = vrot.slane %v2218_v6, 5  ;;  %v2398_v47 = vrot.slane %v2397_v38, 4  ;;  %v2410_v1 = vshll.u32 %v5966_v55, 16  ;;  %4297 = vmatmul.mubr.msk.bf16.vlgmr.msra.gmra.mrb[0].mxu0 %vm3705_vm13, %v3649_v27  ;;  %4313 = vmatmul.mubr.msk.bf16.vlgmr.msra.gmra.mrb[0].mxu1 %vm3705_vm13, %v3665_v32 }
 0x137   : > { %797 = vst.msk [vmem:[#allocation3 + $0x58] sm:$0xf] %vm172_vm0, %v793_v57  ;;  %v2402_v26 = vrot.slane %v2400_v15, 5  ;;  %v2242_v24 = vshll.u32 %v5976_v17, 16  ;;  %v4404_v48 = vld [vmem:[#allocation3 + $0x24] sm:$0xf]  ;;  %v2211_v52 = vsel %vm4708_vm14, %v2206_v36, %v2210_v41  ;;  %v6029_v36 = vpop.permute.xlu1 %3050 }
 0x138   : > { %v4405_v53 = vld [vmem:[#allocation3 + $0x28] sm:$0xf]  ;;  %v2216_v39 = vrot.slane %v2215_v31, 4  ;;  %v824_v21 = vld [vmem:[#allocation2 + $0x54] sm:$0xf]  ;;  %v5998_v58 = vsel %vm3398_vm6, %v4113_v33, %v5785_v50  ;;  %v2412_v19 = vrot.slane %v2410_v1, 5  ;;  %v6035_v33 = vsel %vm3447_vm1, %v3407_v25, %v5830_v11 }
 0x139   : > { %v4106_v30 = vcombine.low %v4404_v48, %v4405_v53  ;;  %v2490_v3 = vld [vmem:[#allocation3 + $0x48] sm:$0xe]  ;;  %v2407_v49 = vor.u32 %v2406_v5, %v2402_v26  ;;  %v2434_v2 = vshll.u32 %v5981_v13, 16  ;;  %828 = vst.msk [vmem:[#allocation3 + $0xb4] sm:$0xf] %vm172_vm0, %v824_v21  ;;  %v2580_v54 = vrot.slane %v5828_v61, 5  ;;  %v6038_v5 = vpop.permute.xlu0 %3036 }
 0x13a   : > { %v2221_v43 = vsel %vm4708_vm14, %v2216_v39, %v2220_v10  ;;  %v4091_v37 = vrot.slane %v2490_v3, 9  ;;  %v2064_v62 = vld [vmem:[#allocation3 + $0x54] sm:$0xf]  ;;  %v2403_v50 = vsel %vm4708_vm14, %v2398_v47, %v2402_v26  ;;  %v6009_v20 = vrot.slane %v2242_v24, 5  ;;  %v6021_v7 = vld [vmem:[#allocation3 + $0x84] sm:$0xf] }
 0x13b   : > { %v2408_v23 = vrot.slane %v2407_v49, 4  ;;  %v6013_v51 = vsel %vm3398_vm6, %v4106_v30, %v5801_v60  ;;  %v2223_v0 = vshrl.u32 %v2064_v62, 16  ;;  %v2226_v14 = vshll.u32 %v2064_v62, 16  ;;  %v825_v8 = vld [vmem:[#allocation2 + $0x58] sm:$0xf] }
 0x13c   : > { %v2582_v42 = vrot.slane %v2580_v54, 4  ;;  %v2583_v29 = vrot.slane %v5940_v4, 5  ;;  %829 = vst.msk [vmem:[#allocation3 + $0xb8] sm:$0xf] %vm172_vm0, %v825_v8  ;;  %v4219_v61 = vcombine.low %v2211_v52, %v2221_v43  ;;  %v6019_v44 = vrot.slane %v2434_v2, 5 }
 0x13d   : > { %v2413_v6 = vsel %vm4708_vm14, %v2408_v23, %v2412_v19  ;;  %v6023_v41 = vld [vmem:[#allocation3 + $0x88] sm:$0xf]  ;;  %v2225_v63 = vrot.slane %v2223_v0, 4  ;;  %v2228_v45 = vrot.slane %v2226_v14, 5  ;;  %v2636_v15 = vrot.slane %v5845_v34, 5  ;;  %v6065_v8 = vpop.permute.xlu0 %3114 }
 0x13e   : > { %v4114_v60 = vcombine.low %v6021_v7, %v6023_v41  ;;  %v6027_v27 = vld [vmem:[#allocation3 + $0xa8] sm:$0xe]  ;;  %v6031_v4 = vld [vmem:[#allocation3 + $0x58] sm:$0xf]  ;;  %v6045_v47 = vsel %vm4649_vm4, %v4091_v37, %v2580_v54  ;;  %v4227_v1 = vcombine.low %v2403_v50, %v2413_v6  ;;  %v6049_v11 = vsel %vm4649_vm4, %v2582_v42, %v2583_v29  ;;  %v6052_v24 = vld [vmem:[#allocation3 + $0x4c] sm:$0xf]  ;;  %v6058_v54 = vpop.permute.xlu1 %3052 }
 0x13f   : > { %v843_v38 = vld [vmem:[#allocation3 + $0x48] sm:$0xf]  ;;  %v2236_v57 = vshrl.u32 %v6031_v4, 16  ;;  %v4204_v31 = vcombine.low %v2064_v62, %v6031_v4  ;;  %v2232_v10 = vshll.u32 %v6031_v4, 16  ;;  %v2229_v26 = vor.u32 %v2228_v45, %v2225_v63  ;;  %v6056_v52 = vld [vmem:[#allocation3 + $0x50] sm:$0x1] }
 0x140   : > { %v4099_v34 = vrot.slane %v6027_v27, 9  ;;  %v2080_v32 = vld [vmem:[#allocation3 + $0xb4] sm:$0xf]  ;;  %v1027_v30 = vshrl.u32 %v843_v38, 16  ;;  %v1030_v3 = vshll.u32 %v843_v38, 16  ;;  %v2638_v49 = vrot.slane %v2636_v15, 4 }
 0x141   : > { %3216 = vrot.lane.b32.xlu0 %v4204_v31, %s4434_s24  ;;  %v2234_v48 = vrot.slane %v2232_v10, 5  ;;  %v2238_v53 = vrot.slane %v2236_v57, 4  ;;  %v2415_v25 = vshrl.u32 %v2080_v32, 16  ;;  %v2418_v39 = vshll.u32 %v2080_v32, 16  ;;  %v6099_v41 = vpop.permute.xlu0 %3116 }
 0x142   : > { %v2230_v21 = vrot.slane %v2229_v26, 4  ;;  %v2639_v2 = vrot.slane %v5966_v55, 5  ;;  %v1029_v43 = vrot.slane %v1027_v30, 4  ;;  %v1032_v37 = vrot.slane %v1030_v3, 5  ;;  %v6077_v3 = vld [vmem:[#allocation3 + $0xac] sm:$0xf] }
 0x143   : > { %v2239_v19 = vor.u32 %v2238_v53, %v2234_v48  ;;  %v6060_v62 = vld [vmem:[#allocation3 + $0xb8] sm:$0xf]  ;;  %v2417_v50 = vrot.slane %v2415_v25, 4  ;;  %v2420_v23 = vrot.slane %v2418_v39, 5  ;;  %v1036_v14 = vshll.u32 %v6052_v24, 16 }
 0x144   : > { %v2235_v0 = vsel %vm4708_vm14, %v2230_v21, %v2234_v48  ;;  %v2428_v42 = vshrl.u32 %v6060_v62, 16  ;;  %v4212_v55 = vcombine.low %v2080_v32, %v6060_v62  ;;  %v2424_v6 = vshll.u32 %v6060_v62, 16  ;;  %v859_v32 = vld [vmem:[#allocation3 + $0xa8] sm:$0xf] }
 0x145   : > { %3294 = vrot.lane.b32.xlu0 %v4219_v61, %s4435_s25  ;;  %v2240_v29 = vrot.slane %v2239_v19, 4  ;;  %v2421_v27 = vor.u32 %v2420_v23, %v2417_v50  ;;  %v1033_v38 = vor.u32 %v1032_v37, %v1029_v43  ;;  %v1038_v63 = vrot.slane %v1036_v14, 5  ;;  %v6090_v19 = vld [vmem:[#allocation3 + $0xb0] sm:$0x1]  ;;  %v6092_v43 = vpop.permute.xlu1 %3130 }
 0x146   : > { %v1040_v45 = vshrl.u32 %v6052_v24, 16  ;;  %3232 = vrot.lane.b32.xlu1 %v4212_v55, %s4434_s24  ;;  %v2426_v31 = vrot.slane %v2424_v6, 5  ;;  %v2430_v10 = vrot.slane %v2428_v42, 4  ;;  %v1046_v26 = vshll.u32 %v6056_v52, 16 }
 0x147   : > { %v2245_v57 = vsel %vm4708_vm14, %v2240_v29, %v6009_v20  ;;  %v2422_v48 = vrot.slane %v2421_v27, 4  ;;  %v1034_v53 = vrot.slane %v1033_v38, 4  ;;  %v4235_v39 = vcombine.low %v6045_v47, %v6049_v11 }
 0x148   : > { %v4220_v61 = vcombine.low %v2235_v0, %v2245_v57  ;;  %v1042_v30 = vrot.slane %v1040_v45, 4  ;;  %v2431_v25 = vor.u32 %v2430_v10, %v2426_v31  ;;  %v6086_v20 = vsel %vm3398_vm6, %v4114_v60, %v5839_v9 }
 0x149   : > { %v2637_v21 = vsel %vm4649_vm4, %v4099_v34, %v2636_v15  ;;  %v2427_v37 = vsel %vm4708_vm14, %v2422_v48, %v2426_v31  ;;  %v2640_v47 = vsel %vm4649_vm4, %v2638_v49, %v2639_v2  ;;  %v1048_v7 = vrot.slane %v1046_v26, 5  ;;  %v2491_v49 = vld [vmem:[#allocation3 + $0x54] sm:$0xe] }
 0x14a   : > { %3296 = vrot.lane.b32.xlu0 %v4220_v61, %s4435_s25  ;;  %v1043_v11 = vor.u32 %v1042_v30, %v1038_v63  ;;  %3310 = vrot.lane.b32.xlu1 %v4227_v1, %s4435_s25  ;;  %v2432_v9 = vrot.slane %v2431_v25, 4  ;;  %v1219_v60 = vshrl.u32 %v859_v32, 16  ;;  %v1222_v15 = vshll.u32 %v859_v32, 16  ;;  %v6114_v26 = vld [vmem:[#allocation3 + $0x54] sm:$0xf]  ;;  %v6123_v25 = vpop.permute.xlu0 %3210 }
 0x14b   : > { %v1228_v34 = vshll.u32 %v6077_v3, 16  ;;  %v1039_v50 = vsel %vm4708_vm14, %v1034_v53, %v1038_v63  ;;  %v1232_v0 = vshrl.u32 %v6077_v3, 16  ;;  %v1238_v14 = vshll.u32 %v6090_v19, 16  ;;  %v2499_v63 = vld [vmem:[#allocation3 + $0xb4] sm:$0xe] }
 0x14c   : > { %v1044_v23 = vrot.slane %v1043_v11, 4  ;;  %v2437_v2 = vsel %vm4708_vm14, %v2432_v9, %v6019_v44  ;;  %v1221_v42 = vrot.slane %v1219_v60, 4  ;;  %v1224_v1 = vrot.slane %v1222_v15, 5  ;;  %v6116_v44 = vpop.permute.xlu1 %3132  ;;  %v6121_v30 = vld [vmem:[#allocation3 + $0x58] sm:$0xf] }
 0x14d   : > { %v1230_v55 = vrot.slane %v1228_v34, 5  ;;  %v4228_v29 = vcombine.low %v2427_v37, %v2437_v2  ;;  %v4243_v6 = vcombine.low %v2637_v21, %v2640_v47  ;;  %v1234_v38 = vrot.slane %v1232_v0, 4  ;;  %v6135_v15 = vld [vmem:[#allocation3 + $0x5c] sm:$0x1] }
 0x14e   : > { %3374 = vrot.lane.b32.xlu0 %v4235_v39, %s4436_s26  ;;  %v1049_v27 = vsel %vm4708_vm14, %v1044_v23, %v1048_v7  ;;  %v1225_v57 = vor.u32 %v1224_v1, %v1221_v42  ;;  %v4092_v31 = vrot.slane %v2491_v49, 9  ;;  %v2587_v10 = vrot.slane %v6031_v4, 5 }
 0x14f   : > { %v4125_v45 = vcombine.low %v1039_v50, %v1049_v27  ;;  %3312 = vrot.lane.b32.xlu1 %v4228_v29, %s4435_s25  ;;  %v1380_v32 = vrot.slane %v6056_v52, 5  ;;  %v1235_v61 = vor.u32 %v1234_v38, %v1230_v55  ;;  %v1240_v48 = vrot.slane %v1238_v14, 5  ;;  %v6144_v14 = vld [vmem:[#allocation3 + $0xb4] sm:$0xf] }
 0x150   : > { %v2590_v53 = vrot.slane %v5976_v17, 5  ;;  %v1226_v39 = vrot.slane %v1225_v57, 4  ;;  %v2588_v4 = vsel %vm4649_vm4, %v4092_v31, %v2587_v10  ;;  %v2589_v21 = vrot.slane %v2587_v10, 4  ;;  %v6153_v29 = vpop.permute.xlu1 %3226 }
 0x151   : > { %v4100_v37 = vrot.slane %v2499_v63, 9  ;;  %v1236_v47 = vrot.slane %v1235_v61, 4  ;;  %v2643_v11 = vrot.slane %v6060_v62, 5  ;;  %v2646_v7 = vrot.slane %v5981_v13, 5  ;;  %v1272_v61 = vld [vmem:[#allocation3 + $0x48] sm:$0xe] }
 0x152   : > { %2786 = vrot.lane.b32.xlu0 %v4125_v45, %s4432_s22  ;;  %v1051_v9 = vshrl.u32 %v6114_v26, 16  ;;  %v1231_v17 = vsel %vm4708_vm14, %v1226_v39, %v1230_v55  ;;  %v2591_v60 = vsel %vm4649_vm4, %v2589_v21, %v2590_v53  ;;  %v1054_v34 = vshll.u32 %v6114_v26, 16  ;;  %v6151_v55 = vld [vmem:[#allocation3 + $0xb8] sm:$0xf]  ;;  %v6160_v45 = vld [vmem:[#allocation3 + $0xbc] sm:$0x1] }
 0x153   : > { %v1060_v50 = vshll.u32 %v6121_v30, 16  ;;  %3390 = vrot.lane.b32.xlu1 %v4243_v6, %s4436_s26  ;;  %v1241_v62 = vsel %vm4708_vm14, %v1236_v47, %v1240_v48  ;;  %v4236_v13 = vcombine.low %v2588_v4, %v2591_v60  ;;  %v2644_v23 = vsel %vm4649_vm4, %v4100_v37, %v2643_v11 }
 0x154   : > { %v2645_v0 = vrot.slane %v2643_v11, 4  ;;  %v6149_v49 = vsel %vm3447_vm1, %v5998_v58, %v5879_v12  ;;  %v4133_v2 = vcombine.low %v1231_v17, %v1241_v62  ;;  %v1053_v42 = vrot.slane %v1051_v9, 4  ;;  %v6162_v12 = vpop.permute.xlu0 %3212  ;;  %v1280_v17 = vld [vmem:[#allocation3 + $0xa8] sm:$0xe] }
 0x155   : > { %v1056_v1 = vrot.slane %v1054_v34, 5  ;;  %v1062_v27 = vrot.slane %v1060_v50, 5  ;;  %v1064_v38 = vshrl.u32 %v6121_v30, 16  ;;  %v1070_v63 = vshll.u32 %v6135_v15, 16 }
 0x156   : > { %3376 = vrot.lane.b32.xlu0 %v4236_v13, %s4436_s26  ;;  %v2647_v6 = vsel %vm4649_vm4, %v2645_v0, %v2646_v7  ;;  %v3455_v58 = vsel %vm3447_vm1, %v6013_v51, %v5881_v59  ;;  %v1243_v10 = vshrl.u32 %v6144_v14, 16  ;;  %v1246_v39 = vshll.u32 %v6144_v14, 16  ;;  %v6180_v0 = vpop.permute.xlu1 %3228 }
 0x157   : > { %v4244_v57 = vcombine.low %v2644_v23, %v2647_v6  ;;  %v1057_v31 = vor.u32 %v1056_v1, %v1053_v42  ;;  %2802 = vrot.lane.b32.xlu1 %v4133_v2, %s4432_s22  ;;  %v1066_v48 = vrot.slane %v1064_v38, 4  ;;  %v1072_v53 = vrot.slane %v1070_v63, 5  ;;  %v1273_v23 = vld [vmem:[#allocation3 + $0x54] sm:$0xe] }
 0x158   : > { %v1252_v4 = vshll.u32 %v6151_v55, 16  ;;  %v1245_v37 = vrot.slane %v1243_v10, 4  ;;  %v1256_v47 = vshrl.u32 %v6151_v55, 16  ;;  %v1262_v11 = vshll.u32 %v6160_v45, 16  ;;  %v6173_v60 = vpop.permute.xlu0 %3290 }
 0x159   : > { %v1058_v21 = vrot.slane %v1057_v31, 4  ;;  %v1067_v59 = vor.u32 %v1066_v48, %v1062_v27  ;;  %v1248_v51 = vrot.slane %v1246_v39, 5  ;;  %v4061_v9 = vrot.slane %v1272_v61, 9 }
 0x15a   : > { %v1254_v7 = vrot.slane %v1252_v4, 5  ;;  %v1436_v34 = vrot.slane %v6090_v19, 5  ;;  %v3471_v50 = vsel %vm3447_vm1, %v6086_v20, %v5908_v35  ;;  %v1258_v62 = vrot.slane %v1256_v47, 4  ;;  %v6195_v39 = vpop.permute.xlu1 %3306 }
 0x15b   : > { %v1377_v13 = vrot.slane %v6052_v24, 5  ;;  %3392 = vrot.lane.b32.xlu1 %v4244_v57, %s4436_s26  ;;  %v1063_v2 = vsel %vm4708_vm14, %v1058_v21, %v1062_v27  ;;  %v1068_v42 = vrot.slane %v1067_v59, 4  ;;  %v1249_v1 = vor.u32 %v1248_v51, %v1245_v37  ;;  %v1281_v37 = vld [vmem:[#allocation3 + $0xb4] sm:$0xe] }
 0x15c   : > { %v1264_v6 = vrot.slane %v1262_v11, 5  ;;  %v1259_v38 = vor.u32 %v1258_v62, %v1254_v7  ;;  %v4069_v35 = vrot.slane %v1280_v17, 9  ;;  %v1433_v31 = vrot.slane %v6077_v3, 5  ;;  %v6202_v47 = vpop.permute.xlu0 %3292 }
 0x15d   : > { %v1378_v19 = vsel %vm4649_vm4, %v4061_v9, %v1377_v13  ;;  %v1379_v63 = vrot.slane %v1377_v13, 4  ;;  %v1073_v24 = vsel %vm4708_vm14, %v1068_v42, %v1072_v53  ;;  %v1250_v20 = vrot.slane %v1249_v1, 4  ;;  %v1473_v42 = vld [vmem:[#allocation3 + $0xb4] sm:$0xf] }
 0x15e   : > { %v4062_v10 = vrot.slane %v1273_v23, 9  ;;  %v4126_v57 = vcombine.low %v1063_v2, %v1073_v24  ;;  %v1260_v61 = vrot.slane %v1259_v38, 4  ;;  %v1384_v48 = vrot.slane %v6121_v30, 5  ;;  %v6224_v23 = vld [vmem:[#allocation3 + $0x58] sm:$0xf] }
 0x15f   : > { %v1381_v27 = vsel %vm4649_vm4, %v1379_v63, %v1380_v32  ;;  %v3486_v4 = vsel %vm3480_vm7, %v6035_v33, %v5919_v56  ;;  %v1255_v53 = vsel %vm4708_vm14, %v1250_v20, %v1254_v7  ;;  %v1435_v21 = vrot.slane %v1433_v31, 4  ;;  %v6210_v56 = vld [vmem:[#allocation3 + $0x54] sm:$0xf]  ;;  %v1459_v38 = vld [vmem:[#allocation3 + $0x60] sm:$0xf] }
 0x160   : > { %v4141_v3 = vcombine.low %v1378_v19, %v1381_v27  ;;  %2788 = vrot.lane.b32.xlu0 %v4126_v57, %s4432_s22  ;;  %v1265_v52 = vsel %vm4708_vm14, %v1260_v61, %v1264_v6  ;;  %v1434_v32 = vsel %vm4649_vm4, %v4069_v35, %v1433_v31  ;;  %v1386_v11 = vrot.slane %v1384_v48, 4  ;;  %v6235_v19 = vpop.permute.xlu1 %3308  ;;  %v6237_v63 = vpop.permute.xlu0 %3370  ;;  %v6252_v61 = vld [vmem:[#allocation3 + $0x64] sm:$0xf] }
 0x161   : > { %v1387_v59 = vrot.slane %v6135_v15, 5  ;;  %v3502_v33 = vsel %vm3480_vm7, %v6149_v49, %v5949_v40  ;;  %v4134_v51 = vcombine.low %v1255_v53, %v1265_v52  ;;  %v1437_v7 = vsel %vm4649_vm4, %v1435_v21, %v1436_v34 }
 0x162   : > { %v1385_v9 = vsel %vm4649_vm4, %v4062_v10, %v1384_v48  ;;  %v3488_v17 = vsel %vm3480_vm7, %v3455_v58, %v5958_v16  ;;  %v4070_v15 = vrot.slane %v1281_v37, 9  ;;  %v1440_v13 = vrot.slane %v6151_v55, 5  ;;  %v6267_v37 = vld [vmem:[#allocation3 + $0x5c] sm:$0x1] }
 0x163   : > { %v1388_v62 = vsel %vm4649_vm4, %v1386_v11, %v1387_v59  ;;  %2804 = vrot.lane.b32.xlu1 %v4134_v51, %s4432_s22  ;;  %v4149_v40 = vcombine.low %v1434_v32, %v1437_v7  ;;  %v1443_v49 = vrot.slane %v6160_v45, 5  ;;  %v1638_v34 = vshrl.u32 %v6210_v56, 16 }
 0x164   : > { %v1641_v2 = vshll.u32 %v6210_v56, 16  ;;  %2866 = vrot.lane.b32.xlu0 %v4141_v3, %s4430_s16  ;;  %v3504_v16 = vsel %vm3480_vm7, %v3471_v50, %v5989_v28  ;;  %v4142_v58 = vcombine.low %v1385_v9, %v1388_v62  ;;  %v1441_v1 = vsel %vm4649_vm4, %v4070_v15, %v1440_v13  ;;  %v6248_v50 = vld [vmem:[#allocation3 + $0xb8] sm:$0xf]  ;;  %v6273_v9 = vpop.permute.xlu1 %3386 }
 0x165   : > { %v1442_v6 = vrot.slane %v1440_v13, 4  ;;  %v3519_v45 = vsel %vm3513_vm8, %v3486_v4, %v5994_v46  ;;  %v3535_v35 = vsel %vm3513_vm8, %v3502_v33, %v6029_v36  ;;  %v6245_v24 = vsel %vm3513_vm8, %v3488_v17, %v6038_v5  ;;  %v1475_v5 = vld [vmem:[#allocation3 + $0xc0] sm:$0xf]  ;;  %v6271_v33 = vld [vmem:[#allocation3 + $0xc4] sm:$0xf] }
 0x166   : > { %v1651_v28 = vshrl.u32 %v6224_v23, 16  ;;  %v1640_v31 = vrot.slane %v1638_v34, 4  ;;  %v1830_v10 = vshrl.u32 %v1473_v42, 16  ;;  %v1833_v57 = vshll.u32 %v1473_v42, 16 }
 0x167   : > { %v1444_v20 = vsel %vm4649_vm4, %v1442_v6, %v1443_v49  ;;  %2882 = vrot.lane.b32.xlu1 %v4149_v40, %s4430_s16  ;;  %v1643_v36 = vrot.slane %v1641_v2, 5  ;;  %v1662_v27 = vshrl.u32 %v1459_v38, 16  ;;  %v1665_v48 = vshll.u32 %v1459_v38, 16  ;;  %v6280_v40 = vld [vmem:[#allocation3 + $0xbc] sm:$0x1] }
 0x168   : > { %v4150_v46 = vcombine.low %v1441_v1, %v1444_v20  ;;  %2868 = vrot.lane.b32.xlu0 %v4142_v58, %s4430_s16  ;;  %v4157_v4 = vcombine.low %v6210_v56, %v6224_v23  ;;  %v6260_v53 = vsel %vm3513_vm8, %v3504_v16, %v6058_v54  ;;  %v6264_v3 = vsel %vm3546_vm9, %v3519_v45, %v6065_v8  ;;  %v6275_v8 = vpop.permute.xlu0 %2782 }
 0x169   : > { %v1843_v21 = vshrl.u32 %v6248_v50, 16  ;;  %v1832_v52 = vrot.slane %v1830_v10, 4  ;;  %v1835_v32 = vrot.slane %v1833_v57, 5  ;;  %v4165_v11 = vcombine.low %v1473_v42, %v6248_v50 }
 0x16a   : > { %v1675_v59 = vshrl.u32 %v6252_v61, 16  ;;  %v1664_v56 = vrot.slane %v1662_v27, 4  ;;  %v1667_v51 = vrot.slane %v1665_v48, 5  ;;  %v1854_v54 = vshrl.u32 %v1475_v5, 16 }
 0x16b   : > { %v1857_v7 = vshll.u32 %v1475_v5, 16  ;;  %2884 = vrot.lane.b32.xlu1 %v4150_v46, %s4430_s16  ;;  %v1644_v17 = vor.u32 %v1643_v36, %v1640_v31  ;;  %v1647_v62 = vshll.u32 %v6224_v23, 16  ;;  %v1653_v15 = vrot.slane %v1651_v28, 4  ;;  %v6291_v31 = vld [vmem:[#allocation3 + $0x68] sm:$0x1] }
 0x16c   : > { %v1657_v13 = vshll.u32 %v6267_v37, 16  ;;  %2962 = vrot.lane.b32.xlu0 %v4157_v4, %s4429_s15  ;;  %v4158_v49 = vcombine.low %v1459_v38, %v6252_v61  ;;  %v6286_v34 = vsel %vm3546_vm9, %v3535_v35, %v6092_v43  ;;  %v1856_v2 = vrot.slane %v1854_v54, 4  ;;  %v6299_v4 = vpop.permute.xlu0 %3372 }
 0x16d   : > { %v4166_v42 = vcombine.low %v1475_v5, %v6271_v33  ;;  %v1859_v16 = vrot.slane %v1857_v7, 5  ;;  %v1645_v58 = vrot.slane %v1644_v17, 4  ;;  %v1649_v1 = vrot.slane %v1647_v62, 5  ;;  %v6297_v5 = vpop.permute.xlu1 %2798  ;;  %v6306_v7 = vld [vmem:[#allocation3 + $0xc8] sm:$0x1] }
 0x16e   : > { %v1836_v6 = vor.u32 %v1835_v32, %v1832_v52  ;;  %v1839_v45 = vshll.u32 %v6248_v50, 16  ;;  %v1845_v28 = vrot.slane %v1843_v21, 4  ;;  %v1849_v20 = vshll.u32 %v6280_v40, 16 }
 0x16f   : > { %v1668_v10 = vor.u32 %v1667_v51, %v1664_v56  ;;  %2978 = vrot.lane.b32.xlu1 %v4165_v11, %s4429_s15  ;;  %v1654_v38 = vor.u32 %v1653_v15, %v1649_v1  ;;  %v1659_v43 = vrot.slane %v1657_v13, 5  ;;  %v1671_v57 = vshll.u32 %v6252_v61, 16 }
 0x170   : > { %v1837_v35 = vrot.slane %v1836_v6, 4  ;;  %2964 = vrot.lane.b32.xlu0 %v4158_v49, %s4429_s15  ;;  %v1867_v46 = vshrl.u32 %v6271_v33, 16  ;;  %v1841_v36 = vrot.slane %v1839_v45, 5  ;;  %v1677_v48 = vrot.slane %v1675_v59, 4  ;;  %v1883_v59 = vld [vmem:[#allocation3 + $0x54] sm:$0xe] }
 0x171   : > { %v1669_v27 = vrot.slane %v1668_v10, 4  ;;  %v1650_v21 = vsel %vm4708_vm14, %v1645_v58, %v1649_v1  ;;  %v1655_v52 = vrot.slane %v1654_v38, 4  ;;  %v1673_v32 = vrot.slane %v1671_v57, 5  ;;  %v6322_v57 = vpop.permute.xlu1 %3388 }
 0x172   : > { %v1681_v11 = vshll.u32 %v6291_v31, 16  ;;  %v1842_v56 = vsel %vm4708_vm14, %v1837_v35, %v1841_v36  ;;  %v1846_v51 = vor.u32 %v1845_v28, %v1841_v36  ;;  %v1851_v54 = vrot.slane %v1849_v20, 5  ;;  %v1891_v35 = vld [vmem:[#allocation3 + $0xb4] sm:$0xe]  ;;  %v6324_v36 = vpop.permute.xlu0 %2784 }
 0x173   : > { %v1860_v17 = vor.u32 %v1859_v16, %v1856_v2  ;;  %2980 = vrot.lane.b32.xlu1 %v4166_v42, %s4429_s15  ;;  %v1660_v62 = vsel %vm4708_vm14, %v1655_v52, %v1659_v43  ;;  %v1674_v15 = vsel %vm4708_vm14, %v1669_v27, %v1673_v32  ;;  %v1678_v13 = vor.u32 %v1677_v48, %v1673_v32  ;;  %v1884_v48 = vld [vmem:[#allocation3 + $0x60] sm:$0xe] }
 0x174   : > { %v1683_v49 = vrot.slane %v1681_v11, 5  ;;  %v4173_v58 = vcombine.low %v1650_v21, %v1660_v62  ;;  %v1847_v1 = vrot.slane %v1846_v51, 4  ;;  %v1863_v45 = vshll.u32 %v6271_v33, 16 }
 0x175   : > { %v1861_v6 = vrot.slane %v1860_v17, 4  ;;  %v1679_v28 = vrot.slane %v1678_v13, 4  ;;  %v1869_v20 = vrot.slane %v1867_v46, 4  ;;  %v1873_v2 = vshll.u32 %v6306_v7, 16 }
 0x176   : > { %v4077_v16 = vrot.slane %v1883_v59, 9  ;;  %v3554_v42 = vsel %vm3546_vm9, %v6245_v24, %v6099_v41  ;;  %3042 = vrot.lane.b32.xlu0 %v4173_v58, %s4433_s23  ;;  %v1852_v10 = vsel %vm4708_vm14, %v1847_v1, %v1851_v54  ;;  %v1865_v38 = vrot.slane %v1863_v45, 5  ;;  %v6352_v45 = vpop.permute.xlu0 %2862 }
 0x177   : > { %v1985_v43 = vrot.slane %v6224_v23, 5  ;;  %v3570_v46 = vsel %vm3546_vm9, %v6260_v53, %v6116_v44  ;;  %v4181_v27 = vcombine.low %v1842_v56, %v1852_v10  ;;  %v1684_v41 = vsel %vm4708_vm14, %v1679_v28, %v1683_v49  ;;  %v1892_v49 = vld [vmem:[#allocation3 + $0xc0] sm:$0xe] }
 0x178   : > { %v1988_v24 = vrot.slane %v6267_v37, 5  ;;  %v4174_v21 = vcombine.low %v1674_v15, %v1684_v41  ;;  %v1866_v23 = vsel %vm4708_vm14, %v1861_v6, %v1865_v38  ;;  %v1870_v52 = vor.u32 %v1869_v20, %v1865_v38  ;;  %v2066_v6 = vld [vmem:[#allocation3 + $0x60] sm:$0xf] }
 0x179   : > { %v1875_v32 = vrot.slane %v1873_v2, 5  ;;  %3058 = vrot.lane.b32.xlu1 %v4181_v27, %s4433_s23  ;;  %v1986_v11 = vsel %vm4649_vm4, %v4077_v16, %v1985_v43  ;;  %v1987_v51 = vrot.slane %v1985_v43, 4  ;;  %v4085_v44 = vrot.slane %v1891_v35, 9  ;;  %v6366_v35 = vld [vmem:[#allocation3 + $0x64] sm:$0xf] }
 0x17a   : > { %v2041_v53 = vrot.slane %v6248_v50, 5  ;;  %3044 = vrot.lane.b32.xlu0 %v4174_v21, %s4433_s23  ;;  %v1871_v56 = vrot.slane %v1870_v52, 4  ;;  %v2044_v37 = vrot.slane %v6280_v40, 5  ;;  %v4078_v54 = vrot.slane %v1884_v48, 9  ;;  %v6370_v27 = vld [vmem:[#allocation3 + $0xc0] sm:$0xf] }
 0x17b   : > { %v1992_v17 = vrot.slane %v6252_v61, 5  ;;  %v1989_v59 = vsel %vm4649_vm4, %v1987_v51, %v1988_v24  ;;  %v1995_v13 = vrot.slane %v6291_v31, 5  ;;  %v6350_v61 = vpop.permute.xlu1 %2800  ;;  %vm6719_vm0 = vcmask 195584   ;;  %v2068_v21 = vld [vmem:[#allocation3 + $0x6c] sm:$0xf] }
 0x17c   : > { %v2042_v62 = vsel %vm4649_vm4, %v4085_v44, %v2041_v53  ;;  %v2043_v15 = vrot.slane %v2041_v53, 4  ;;  %v1876_v50 = vsel %vm4708_vm14, %v1871_v56, %v1875_v32  ;;  %v4189_v58 = vcombine.low %v1986_v11, %v1989_v59  ;;  %vm6720_vm15 = vmmov %vm6719_vm0 }
 0x17d   : > { %v1993_v40 = vsel %vm4649_vm4, %v4078_v54, %v1992_v17  ;;  %v1994_v1 = vrot.slane %v1992_v17, 4  ;;  %v3585_v28 = vsel %vm6719_vm0, %v6264_v3, %v6123_v25  ;;  %v3601_v31 = vsel %vm6720_vm15, %v6286_v34, %v6153_v29  ;;  %vm6721_vm2 = vmmov %vm6719_vm0 }
 0x17e   : > { %v4182_v20 = vcombine.low %v1866_v23, %v1876_v50  ;;  %v2045_v2 = vsel %vm4649_vm4, %v2043_v15, %v2044_v37  ;;  %3122 = vrot.lane.b32.xlu0 %v4189_v58, %s4431_s18  ;;  %v4086_v38 = vrot.slane %v1892_v49, 9  ;;  %v2048_v43 = vrot.slane %v6271_v33, 5  ;;  %vm6722_vm3 = vmmov %vm6719_vm0  ;;  %v2084_v37 = vld [vmem:[#allocation3 + $0xcc] sm:$0xf]  ;;  %v6410_v58 = vld [vmem:[#allocation3 + $0xd0] sm:$0xf] }
 0x17f   : > { %v4197_v16 = vcombine.low %v2042_v62, %v2045_v2  ;;  %v1996_v10 = vsel %vm4649_vm4, %v1994_v1, %v1995_v13  ;;  %v2051_v29 = vrot.slane %v6306_v7, 5  ;;  %v2247_v3 = vshrl.u32 %v2066_v6, 16  ;;  %vm6725_vm5 = vmmov %vm6719_vm0 }
 0x180   : > { %3060 = vrot.lane.b32.xlu1 %v4182_v20, %s4433_s23  ;;  %v4190_v25 = vcombine.low %v1993_v40, %v1996_v10  ;;  %v2250_v34 = vshll.u32 %v2066_v6, 16  ;;  %v3587_v41 = vsel %vm6721_vm2, %v3554_v42, %v6162_v12  ;;  %v3618_v24 = vsel %vm3612_vm11, %v3585_v28, %v6173_v60  ;;  %v6385_v12 = vld [vmem:[#allocation3 + $0xc4] sm:$0xf]  ;;  %v6412_v40 = vld [vmem:[#allocation3 + $0x68] sm:$0x1]  ;;  %vm6726_vm10 = vmmov %vm6719_vm0 }
 0x181   : > { %v2049_v33 = vsel %vm4649_vm4, %v4086_v38, %v2048_v43  ;;  %v2050_v48 = vrot.slane %v2048_v43, 4  ;;  %v3603_v23 = vsel %vm6722_vm3, %v3570_v46, %v6180_v0  ;;  %v3634_v7 = vsel %vm3612_vm11, %v3601_v31, %v6195_v39  ;;  %v6393_v46 = vld [vmem:[#allocation3 + $0x70] sm:$0xf]  ;;  %v6396_v39 = vpop.permute.xlu1 %2878  ;;  %v6423_v43 = vld [vmem:[#allocation3 + $0xc8] sm:$0x1]  ;;  %vm6727_vm15 = vmmov %vm6719_vm0 }
 0x182   : > { %v2260_v52 = vshrl.u32 %v6366_v35, 16  ;;  %v3651_v32 = vsel %vm3645_vm12, %v3618_v24, %v6237_v63  ;;  %3124 = vrot.lane.b32.xlu0 %v4190_v25, %s4431_s18  ;;  %v4205_v42 = vcombine.low %v2066_v6, %v6366_v35  ;;  %v2439_v11 = vshrl.u32 %v6370_v27, 16  ;;  %v6398_v63 = vpop.permute.xlu0 %2864  ;;  %vm6728_vm2 = vmmov %vm6719_vm0 }
 0x183   : > { %v2052_v60 = vsel %vm4649_vm4, %v2050_v48, %v2051_v29  ;;  %v2442_v0 = vshll.u32 %v6370_v27, 16  ;;  %4300 = vmatprep.mubr.msk.bf16.mxu0 %vm3705_vm13, %v3651_v32  ;;  %v2249_v44 = vrot.slane %v2247_v3, 4  ;;  %v2252_v53 = vrot.slane %v2250_v34, 5 }
 0x184   : > { %3138 = vrot.lane.b32.xlu1 %v4197_v16, %s4431_s18  ;;  %v4198_v51 = vcombine.low %v2049_v33, %v2052_v60  ;;  %v2271_v56 = vshrl.u32 %v2068_v21, 16  ;;  %v3620_v54 = vsel %vm3612_vm11, %v3587_v41, %v6202_v47  ;;  %v3636_v17 = vsel %vm3612_vm11, %v3603_v23, %v6235_v19  ;;  %v6433_v23 = vld [vmem:[#allocation3 + $0x74] sm:$0x1] }
 0x185   : > { %v2452_v59 = vshrl.u32 %v6385_v12, 16  ;;  %v2274_v62 = vshll.u32 %v2068_v21, 16  ;;  %v2441_v15 = vrot.slane %v2439_v11, 4  ;;  %v2444_v13 = vrot.slane %v2442_v0, 5  ;;  %v6425_v25 = vpop.permute.xlu1 %2880 }
 0x186   : > { %v4213_v49 = vcombine.low %v6370_v27, %v6385_v12  ;;  %v3667_v50 = vsel %vm3645_vm12, %v3634_v7, %v6273_v9  ;;  %3218 = vrot.lane.b32.xlu0 %v4205_v42, %s4434_s24  ;;  %v2284_v47 = vshrl.u32 %v6393_v46, 16  ;;  %v4206_v19 = vcombine.low %v2068_v21, %v6393_v46  ;;  %v6427_v29 = vpop.permute.xlu0 %2958 }
 0x187   : > { %v2463_v1 = vshrl.u32 %v2084_v37, 16  ;;  %v2466_v6 = vshll.u32 %v2084_v37, 16  ;;  %4316 = vmatprep.mubr.msk.bf16.mxu1 %vm3705_vm13, %v3667_v50  ;;  %v2273_v28 = vrot.slane %v2271_v56, 4  ;;  %v2253_v31 = vor.u32 %v2252_v53, %v2249_v44 }
 0x188   : > { %3140 = vrot.lane.b32.xlu1 %v4198_v51, %s4431_s18  ;;  %v2256_v9 = vshll.u32 %v6366_v35, 16  ;;  %v2262_v20 = vrot.slane %v2260_v52, 4  ;;  %v2276_v2 = vrot.slane %v2274_v62, 5  ;;  %v2476_v16 = vshrl.u32 %v6410_v58, 16 }
 0x189   : > { %v4214_v10 = vcombine.low %v2084_v37, %v6410_v58  ;;  %v2266_v38 = vshll.u32 %v6412_v40, 16  ;;  %v2254_v3 = vrot.slane %v2253_v31, 4  ;;  %v3653_v27 = vsel %vm3645_vm12, %v3620_v54, %v6299_v4 }
 0x18a   : > { %v2258_v34 = vrot.slane %v2256_v9, 5  ;;  %v2445_v41 = vor.u32 %v2444_v13, %v2441_v15  ;;  %3220 = vrot.lane.b32.xlu0 %v4206_v19, %s4434_s24  ;;  %v2465_v24 = vrot.slane %v2463_v1, 4  ;;  %v2468_v33 = vrot.slane %v2466_v6, 5  ;;  %4301 = vmatmul.mubr.msk.bf16.gmra.mrb[4].mxu0 %vm3705_vm13, %v3653_v27  ;;  %v6445_v15 = vpop.permute.xlu1 %2974  ;;  %v6447_v13 = vpop.permute.xlu0 %2960 }
 0x18b   : > { %v2448_v48 = vshll.u32 %v6385_v12, 16  ;;  %v2454_v21 = vrot.slane %v2452_v59, 4  ;;  %v2268_v52 = vrot.slane %v2266_v38, 5  ;;  %v2458_v60 = vshll.u32 %v6423_v43, 16 }
 0x18c   : > { %3234 = vrot.lane.b32.xlu1 %v4213_v49, %s4434_s24  ;;  %v2263_v7 = vor.u32 %v2262_v20, %v2258_v34  ;;  %v2446_v32 = vrot.slane %v2445_v41, 4  ;;  %v2277_v42 = vor.u32 %v2276_v2, %v2273_v28  ;;  %v2280_v11 = vshll.u32 %v6393_v46, 16 }
 0x18d   : > { %v2450_v4 = vrot.slane %v2448_v48, 5  ;;  %v2286_v0 = vrot.slane %v2284_v47, 4  ;;  %v2259_v51 = vsel %vm4708_vm14, %v2254_v3, %v2258_v34  ;;  %v2290_v53 = vshll.u32 %v6433_v23, 16  ;;  %v6454_v47 = vld [vmem:[#allocation3 + $0xd4] sm:$0x1] }
 0x18e   : > { %v2264_v44 = vrot.slane %v2263_v7, 4  ;;  %v3669_v56 = vsel %vm3645_vm12, %v3636_v17, %v6322_v57  ;;  %v2460_v54 = vrot.slane %v2458_v60, 5  ;;  %v2278_v59 = vrot.slane %v2277_v42, 4  ;;  %v2492_v17 = vld [vmem:[#allocation3 + $0x60] sm:$0xe]  ;;  %v6467_v7 = vpop.permute.xlu1 %2976 }
 0x18f   : > { %v2455_v37 = vor.u32 %v2454_v21, %v2450_v4  ;;  %v2282_v62 = vrot.slane %v2280_v11, 5  ;;  %4317 = vmatmul.mubr.msk.bf16.gmra.mrb[4].mxu1 %vm3705_vm13, %v3669_v56  ;;  %v2451_v50 = vsel %vm4708_vm14, %v2446_v32, %v2450_v4  ;;  %v2469_v57 = vor.u32 %v2468_v33, %v2465_v24  ;;  %v2500_v33 = vld [vmem:[#allocation3 + $0xc0] sm:$0xe] }
 0x190   : > { %3236 = vrot.lane.b32.xlu1 %v4214_v10, %s4434_s24  ;;  %v2269_v49 = vsel %vm4708_vm14, %v2264_v44, %v2268_v52  ;;  %v2292_v28 = vrot.slane %v2290_v53, 5  ;;  %v2472_v20 = vshll.u32 %v6410_v58, 16  ;;  %v2478_v2 = vrot.slane %v2476_v16, 4  ;;  %v2493_v16 = vld [vmem:[#allocation3 + $0x6c] sm:$0xe]  ;;  %v6469_v52 = vpop.permute.xlu0 %3038 }
 0x191   : > { %v4221_v19 = vcombine.low %v2259_v51, %v2269_v49  ;;  %v2456_v1 = vrot.slane %v2455_v37, 4  ;;  %v2287_v6 = vor.u32 %v2286_v0, %v2282_v62  ;;  %v2283_v31 = vsel %vm4708_vm14, %v2278_v59, %v2282_v62  ;;  %v2501_v49 = vld [vmem:[#allocation3 + $0xcc] sm:$0xe] }
 0x192   : > { %v2470_v9 = vrot.slane %v2469_v57, 4  ;;  %v2482_v3 = vshll.u32 %v6454_v47, 16  ;;  %v4093_v34 = vrot.slane %v2492_v17, 9  ;;  %v2474_v41 = vrot.slane %v2472_v20, 5 }
 0x193   : > { %3298 = vrot.lane.b32.xlu0 %v4221_v19, %s4435_s25  ;;  %v2461_v10 = vsel %vm4708_vm14, %v2456_v1, %v2460_v54  ;;  %v2288_v38 = vrot.slane %v2287_v6, 4  ;;  %v2594_v24 = vrot.slane %v6366_v35, 5  ;;  %v2597_v21 = vrot.slane %v6412_v40, 5  ;;  %v3055_v19 = vpop.permute.xlu1 %3054 }
 0x194   : > { %v4229_v27 = vcombine.low %v2451_v50, %v2461_v10  ;;  %v2475_v60 = vsel %vm4708_vm14, %v2470_v9, %v2474_v41  ;;  %v2479_v4 = vor.u32 %v2478_v2, %v2474_v41  ;;  %v2484_v42 = vrot.slane %v2482_v3, 5  ;;  %v3041_v1 = vpop.permute.xlu0 %3040 }
 0x195   : > { %v2293_v48 = vsel %vm4708_vm14, %v2288_v38, %v2292_v28  ;;  %v2595_v35 = vsel %vm4649_vm4, %v4093_v34, %v2594_v24  ;;  %v2596_v11 = vrot.slane %v2594_v24, 4  ;;  %v4101_v0 = vrot.slane %v2500_v33, 9 }
 0x196   : > { %3314 = vrot.lane.b32.xlu1 %v4229_v27, %s4435_s25  ;;  %v4222_v32 = vcombine.low %v2283_v31, %v2293_v48  ;;  %v2650_v40 = vrot.slane %v6385_v12, 5  ;;  %v2480_v51 = vrot.slane %v2479_v4, 4  ;;  %v2653_v44 = vrot.slane %v6423_v43, 5  ;;  %v4408_v48 = vld [vmem:[#allocation3 + $0x30] sm:$0xf] }
 0x197   : > { %v4094_v53 = vrot.slane %v2493_v16, 9  ;;  %v2601_v56 = vrot.slane %v6393_v46, 5  ;;  %v2598_v37 = vsel %vm4649_vm4, %v2596_v11, %v2597_v21  ;;  %v2604_v62 = vrot.slane %v6433_v23, 5  ;;  %v3057_v3 = vpop.permute.xlu1 %3056  ;;  %v4409_v21 = vld [vmem:[#allocation3 + $0x34] sm:$0xf] }
 0x198   : > { %3300 = vrot.lane.b32.xlu0 %v4222_v32, %s4435_s25  ;;  %v2651_v54 = vsel %vm4649_vm4, %v4101_v0, %v2650_v40  ;;  %v2652_v59 = vrot.slane %v2650_v40, 4  ;;  %v2485_v12 = vsel %vm4708_vm14, %v2480_v51, %v2484_v42  ;;  %v4237_v50 = vcombine.low %v2595_v35, %v2598_v37  ;;  %v4410_v42 = vld [vmem:[#allocation3 + $0x90] sm:$0xf]  ;;  %v4411_v35 = vld [vmem:[#allocation3 + $0x94] sm:$0xf]  ;;  %vm6724_vm14 = vmmov %vm6719_vm0 }
 0x199   : > { %v2602_v43 = vsel %vm4649_vm4, %v4094_v53, %v2601_v56  ;;  %v2603_v57 = vrot.slane %v2601_v56, 4  ;;  %v4230_v17 = vcombine.low %v2475_v60, %v2485_v12  ;;  %v4102_v6 = vrot.slane %v2501_v49, 9  ;;  %v4412_v53 = vld [vmem:[#allocation3 + $0x3c] sm:$0xf]  ;;  %v4413_v56 = vld [vmem:[#allocation3 + $0x40] sm:$0xf] }
 0x19a   : > { %v2654_v46 = vsel %vm4649_vm4, %v2652_v59, %v2653_v44  ;;  %v2657_v18 = vrot.slane %v6410_v58, 5  ;;  %v2660_v9 = vrot.slane %v6454_v47, 5  ;;  %v3119_v58 = vpop.permute.xlu0 %3118  ;;  %v4107_v16 = vcombine.low %v4408_v48, %v4409_v21 }
 0x19b   : > { %v2605_v23 = vsel %vm4649_vm4, %v2603_v57, %v2604_v62  ;;  %3316 = vrot.lane.b32.xlu1 %v4230_v17, %s4435_s25  ;;  %v4245_v28 = vcombine.low %v2651_v54, %v2654_v46  ;;  %v3135_v34 = vpop.permute.xlu1 %3134  ;;  %v4115_v11 = vcombine.low %v4410_v42, %v4411_v35  ;;  %v4108_v37 = vcombine.low %v4412_v53, %v4413_v56  ;;  %v4414_v57 = vld [vmem:[#allocation3 + $0x9c] sm:$0xf]  ;;  %v4415_v17 = vld [vmem:[#allocation3 + $0xa0] sm:$0xf] }
 0x19c   : > { %3378 = vrot.lane.b32.xlu0 %v4237_v50, %s4436_s26  ;;  %v4238_v31 = vcombine.low %v2602_v43, %v2605_v23  ;;  %v2658_v20 = vsel %vm4649_vm4, %v4102_v6, %v2657_v18  ;;  %v2659_v2 = vrot.slane %v2657_v18, 4  ;;  %v3413_v22 = vsel %vm3398_vm6, %v4107_v16, %v6275_v8 }
 0x19d   : > { %v3457_v4 = vsel %vm3447_vm1, %v3413_v22, %v6352_v45  ;;  %v3437_v45 = vsel %vm3398_vm6, %v4115_v11, %v6297_v5  ;;  %v4116_v46 = vcombine.low %v4414_v57, %v4415_v17 }
 0x19e   : > { %v2661_v10 = vsel %vm4649_vm4, %v2659_v2, %v2660_v9  ;;  %v3121_v27 = vpop.permute.xlu0 %3120  ;;  %v3490_v0 = vsel %vm3480_vm7, %v3457_v4, %v6427_v29  ;;  %vm6723_vm4 = vmmov %vm6719_vm0  ;;  %v3473_v29 = vsel %vm3447_vm1, %v3437_v45, %v6396_v39 }
 0x19f   : > { %3394 = vrot.lane.b32.xlu1 %v4245_v28, %s4436_s26  ;;  %v4246_v38 = vcombine.low %v2658_v20, %v2661_v10  ;;  %v3137_v41 = vpop.permute.xlu1 %3136  ;;  %v3523_v51 = vsel %vm3513_vm8, %v3490_v0, %v6469_v52  ;;  %v3416_v52 = vsel %vm3398_vm6, %v4108_v37, %v6324_v36  ;;  %v3506_v12 = vsel %vm3480_vm7, %v3473_v29, %v6445_v15  ;;  %v4416_v37 = vld [vmem:[#allocation3 + $0x48] sm:$0xf] }
 0x1a0   : > { %3380 = vrot.lane.b32.xlu0 %v4238_v31, %s4436_s26  ;;  %v3556_v54 = vsel %vm3546_vm9, %v3523_v51, %v3119_v58  ;;  %v3459_v5 = vsel %vm3447_vm1, %v3416_v52, %v6398_v63  ;;  %v3539_v43 = vsel %vm3513_vm8, %v3506_v12, %v3055_v19  ;;  %v3440_v9 = vsel %vm3398_vm6, %v4116_v46, %v6350_v61 }
 0x1a1   : > { %v3492_v39 = vsel %vm3480_vm7, %v3459_v5, %v6447_v13  ;;  %v3572_v23 = vsel %vm3546_vm9, %v3539_v43, %v3135_v34  ;;  %v6580_v5 = vld [vmem:[%s6703_s2] ss:$0 sm:$0xff] }
 0x1a2   : > { %v3215_v47 = vpop.permute.xlu0 %3214  ;;  %v3525_v6 = vsel %vm3513_vm8, %v3492_v39, %v3041_v1  ;;  %v3475_v1 = vsel %vm3447_vm1, %v3440_v9, %v6425_v25 }
 0x1a3   : > { %3396 = vrot.lane.b32.xlu1 %v4246_v38, %s4436_s26  ;;  %v3231_v24 = vpop.permute.xlu1 %3230  ;;  %v3589_v8 = vsel %vm6723_vm4, %v3556_v54, %v3215_v47  ;;  %v3558_v18 = vsel %vm3546_vm9, %v3525_v6, %v3121_v27  ;;  %v3508_v10 = vsel %vm3480_vm7, %v3475_v1, %v6467_v7  ;;  %v4417_v54 = vld [vmem:[#allocation3 + $0x4c] sm:$0xf] }
 0x1a4   : > { %v3605_v15 = vsel %vm6724_vm14, %v3572_v23, %v3231_v24  ;;  %v3541_v58 = vsel %vm3513_vm8, %v3508_v10, %v3057_v3 }
 0x1a5   : > { %v3574_v61 = vsel %vm3546_vm9, %v3541_v58, %v3137_v41 }
 0x1b3   : > { %v3217_v33 = vpop.permute.xlu0 %3216 }
 0x1b4   : > { %v3591_v19 = vsel %vm6725_vm5, %v3558_v18, %v3217_v33 }
 0x1b7   : > { %v3295_v32 = vpop.permute.xlu0 %3294 }
 0x1b8   : > { %v3233_v60 = vpop.permute.xlu1 %3232  ;;  %v3622_v59 = vsel %vm3612_vm11, %v3589_v8, %v3295_v32  ;;  %v4109_v8 = vcombine.low %v4416_v37, %v4417_v54 }
 0x1b9   : > { %v3607_v34 = vsel %vm6726_vm10, %v3574_v61, %v3233_v60 }
 0x1bc   : > { %v3297_v40 = vpop.permute.xlu0 %3296  ;;  %v3311_v44 = vpop.permute.xlu1 %3310 }
 0x1bd   : > { %v3638_v28 = vsel %vm3612_vm11, %v3605_v15, %v3311_v44  ;;  %v3624_v13 = vsel %vm3612_vm11, %v3591_v19, %v3297_v40 }
 0x1c0   : > { %v3375_v62 = vpop.permute.xlu0 %3374 }
 0x1c1   : > { %v3655_v49 = vsel %vm3645_vm12, %v3622_v59, %v3375_v62  ;;  %v3313_v50 = vpop.permute.xlu1 %3312  ;;  %v4418_v59 = vld [vmem:[#allocation3 + $0xa8] sm:$0xf]  ;;  %v4419_v62 = vld [vmem:[#allocation3 + $0xac] sm:$0xf] }
 0x1c2   : > { %4304 = vmatprep.mubr.msk.bf16.mxu0 %vm3705_vm13, %v3655_v49  ;;  %v3640_v27 = vsel %vm3612_vm11, %v3607_v34, %v3313_v50  ;;  %v4117_v29 = vcombine.low %v4418_v59, %v4419_v62  ;;  %v4110_v49 = vcombine.low %v6114_v26, %v6121_v30  ;;  %v4118_v26 = vcombine.low %v6144_v14, %v6151_v55 }
 0x1c4   : > { %v2787_v36 = vpop.permute.xlu0 %2786 }
 0x1c5   : > { %v3391_v63 = vpop.permute.xlu1 %3390  ;;  %v3419_v12 = vsel %vm3398_vm6, %v4109_v8, %v2787_v36 }
 0x1c6   : > { %v3671_v31 = vsel %vm3645_vm12, %v3638_v28, %v3391_v63 }
 0x1c7   : > { %4320 = vmatprep.mubr.msk.bf16.mxu1 %vm3705_vm13, %v3671_v31 }
 0x1c8   : > { %v3377_v20 = vpop.permute.xlu0 %3376 }
 0x1c9   : > { %v3657_v2 = vsel %vm3645_vm12, %v3624_v13, %v3377_v20  ;;  %v2803_v38 = vpop.permute.xlu1 %2802 }
 0x1ca   : > { %4305 = vmatmul.mubr.msk.bf16.gmra.mrb[8].mxu0 %vm3705_vm13, %v3657_v2  ;;  %v3443_v43 = vsel %vm3398_vm6, %v4117_v29, %v2803_v38 }
 0x1cd   : > { %v3393_v47 = vpop.permute.xlu1 %3392 }
 0x1ce   : > { %v3673_v24 = vsel %vm3645_vm12, %v3640_v27, %v3393_v47 }
 0x1cf   : > { %4321 = vmatmul.mubr.msk.bf16.gmra.mrb[8].mxu1 %vm3705_vm13, %v3673_v24 }
 0x1d2   : > { %v2789_v25 = vpop.permute.xlu0 %2788 }
 0x1d3   : > { %v3422_v57 = vsel %vm3398_vm6, %v4110_v49, %v2789_v25 }
 0x1d5   : > { %v6553_v33 = vpop.permute.xlu1 %2804 }
 0x1d6   : > { %v2867_v7 = vpop.permute.xlu0 %2866  ;;  %v3446_v54 = vsel %vm3398_vm6, %v4118_v26, %v6553_v33  ;;  %vm6729_vm6 = vmmov %vm6719_vm0 }
 0x1d7   : > { %v3461_v50 = vsel %vm3447_vm1, %v3419_v12, %v2867_v7 }
 0x1d9   : > { %v2883_v48 = vpop.permute.xlu1 %2882 }
 0x1da   : > { %v2869_v21 = vpop.permute.xlu0 %2868  ;;  %v3477_v30 = vsel %vm3447_vm1, %v3443_v43, %v2883_v48 }
 0x1db   : > { %v3463_v39 = vsel %vm3447_vm1, %v3422_v57, %v2869_v21 }
 0x1dd   : > { %v6555_v16 = vpop.permute.xlu1 %2884 }
 0x1de   : > { %v2963_v3 = vpop.permute.xlu0 %2962  ;;  %v3479_v59 = vsel %vm3447_vm1, %v3446_v54, %v6555_v16 }
 0x1df   : > { %v3494_v17 = vsel %vm3480_vm7, %v3461_v50, %v2963_v3 }
 0x1e1   : > { %v2979_v32 = vpop.permute.xlu1 %2978 }
 0x1e2   : > { %v2965_v41 = vpop.permute.xlu0 %2964  ;;  %v3510_v15 = vsel %vm3480_vm7, %v3477_v30, %v2979_v32 }
 0x1e3   : > { %v3496_v18 = vsel %vm3480_vm7, %v3463_v39, %v2965_v41 }
 0x1e5   : > { %v6557_v22 = vpop.permute.xlu1 %2980 }
 0x1e6   : > { %v3512_v33 = vsel %vm3480_vm7, %v3479_v59, %v6557_v22 }
 0x1e8   : > { %v3043_v60 = vpop.permute.xlu0 %3042 }
 0x1e9   : > { %v3527_v23 = vsel %vm3513_vm8, %v3494_v17, %v3043_v60 }
 0x1eb   : > { %v6559_v4 = vpop.permute.xlu1 %3058 }
 0x1ec   : > { %v3045_v42 = vpop.permute.xlu0 %3044 }
 0x1ed   : > { %v3529_v14 = vsel %vm3513_vm8, %v3496_v18, %v3045_v42  ;;  %v3543_v42 = vsel %vm3513_vm8, %v3510_v15, %v6559_v4 }
 0x1f0   : > { %v3123_v35 = vpop.permute.xlu0 %3122 }
 0x1f1   : > { %v3560_v28 = vsel %vm3546_vm9, %v3527_v23, %v3123_v35 }
 0x1f2   : > { %v6561_v11 = vpop.permute.xlu1 %3060 }
 0x1f3   : > { %v3545_v16 = vsel %vm3513_vm8, %v3512_v33, %v6561_v11 }
 0x1f4   : > { %v3125_v0 = vpop.permute.xlu0 %3124 }
 0x1f5   : > { %v3562_v35 = vsel %vm3546_vm9, %v3529_v14, %v3125_v0 }
 0x1f6   : > { %v6563_v40 = vpop.permute.xlu1 %3138 }
 0x1f7   : > { %v3576_v8 = vsel %vm3546_vm9, %v3543_v42, %v6563_v40 }
 0x1f8   : > { %v3219_v51 = vpop.permute.xlu0 %3218 }
 0x1f9   : > { %v3593_v55 = vsel %vm6719_vm0, %v3560_v28, %v3219_v51 }
 0x1fa   : > { %v6565_v44 = vpop.permute.xlu1 %3140 }
 0x1fc   : > { %v6569_v56 = vpop.permute.xlu0 %3220 }
 0x1fd   : > { %v3595_v4 = vsel %vm6727_vm15, %v3562_v35, %v6569_v56 }
 0x1fe   : > { %v6567_v53 = vpop.permute.xlu1 %3234 }
 0x1ff   : > { %v3609_v62 = vsel %vm6728_vm2, %v3576_v8, %v6567_v53  ;;  %v3578_v53 = vsel %vm3546_vm9, %v3545_v16, %v6565_v44 }
 0x202   : > { %v6571_v45 = vpop.permute.xlu1 %3236 }
 0x203   : > { %v3611_v22 = vsel %vm6729_vm6, %v3578_v53, %v6571_v45 }
 0x205   : > { %v3299_v52 = vpop.permute.xlu0 %3298 }
 0x206   : > { %v3626_v2 = vsel %vm3612_vm11, %v3593_v55, %v3299_v52 }
 0x208   : > { %v3315_v46 = vpop.permute.xlu1 %3314 }
 0x209   : > { %v4298_v6 = vpop.f32.mrb[0].mxu0  ;;  %v4314_v31 = vpop.f32.mrb[0].mxu1  ;;  %v3642_v40 = vsel %vm3612_vm11, %v3609_v62, %v3315_v46 }
 0x20a   : > { %v3301_v36 = vpop.permute.xlu0 %3300  ;;  %v3785_v63 = vadd.f32 %v4298_v6, %v6580_v5  ;;  %v3776_v19 = vpop.f32.mrb[1].mxu0  ;;  %v3849_v20 = vadd.f32 %v4314_v31, %v6580_v5 }
 0x20b   : > { %v3777_v9 = vadd.f32 %v6580_v5, %v3776_v19  ;;  %v4299_v13 = vpop.f32.mrb[2].mxu0  ;;  %v3840_v1 = vpop.f32.mrb[1].mxu1  ;;  %v3628_v29 = vsel %vm3612_vm11, %v3595_v4, %v3301_v36 }
 0x20c   : > { %v3905_v10 = vmax.f32 %v3785_v63, 0.0  ;;  %v3788_v38 = vadd.f32 %v4299_v13, %v6580_v5  ;;  %v3779_v58 = vpop.f32.mrb[3].mxu0  ;;  %v3841_v61 = vadd.f32 %v6580_v5, %v3840_v1  ;;  %v4315_v34 = vpop.f32.mrb[2].mxu1  ;;  %v3921_v25 = vmax.f32 %v3849_v20, 0.0 }
 0x20d   : > { %v3903_v47 = vmax.f32 %v3777_v9, 0.0  ;;  %v3780_v24 = vadd.f32 %v6580_v5, %v3779_v58  ;;  %v3852_v7 = vadd.f32 %v4315_v34, %v6580_v5  ;;  %v3843_v48 = vpop.f32.mrb[3].mxu1  ;;  %v3317_v21 = vpop.permute.xlu1 %3316 }
 0x20e   : > { %v3379_v27 = vpop.permute.xlu0 %3378  ;;  %3937 = vst [vmem:[%s6600_s11 + $0x10] sm:$0xff] %v3905_v10  ;;  %v3906_v32 = vmax.f32 %v3788_v38, 0.0  ;;  %v3919_v41 = vmax.f32 %v3841_v61, 0.0  ;;  %v3844_v60 = vadd.f32 %v6580_v5, %v3843_v48  ;;  %3953 = vst [vmem:[%s6600_s11 + $0x90] sm:$0xff] %v3921_v25  ;;  %v3644_v50 = vsel %vm3612_vm11, %v3611_v22, %v3317_v21 }
 0x20f   : > { %v3659_v3 = vsel %vm3645_vm12, %v3626_v2, %v3379_v27  ;;  %3935 = vst [vmem:[%s6600_s11] sm:$0xff] %v3903_v47  ;;  %v3904_v51 = vmax.f32 %v3780_v24, 0.0  ;;  %v3922_v37 = vmax.f32 %v3852_v7, 0.0 }
 0x210   : > { %4308 = vmatprep.mubr.msk.bf16.mxu0 %vm3705_vm13, %v3659_v3  ;;  %3938 = vst [vmem:[%s6600_s11 + $0x18] sm:$0xff] %v3906_v32  ;;  %3951 = vst [vmem:[%s6600_s11 + $0x80] sm:$0xff] %v3919_v41  ;;  %v3920_v0 = vmax.f32 %v3844_v60, 0.0 }
 0x211   : > { %3936 = vst [vmem:[%s6600_s11 + $0x8] sm:$0xff] %v3904_v51  ;;  %3954 = vst [vmem:[%s6600_s11 + $0x98] sm:$0xff] %v3922_v37  ;;  %v3395_v56 = vpop.permute.xlu1 %3394 }
 0x212   : > { %v3381_v49 = vpop.permute.xlu0 %3380  ;;  %3952 = vst [vmem:[%s6600_s11 + $0x88] sm:$0xff] %v3920_v0  ;;  %v3675_v12 = vsel %vm3645_vm12, %v3642_v40, %v3395_v56 }
 0x213   : > { %v3661_v52 = vsel %vm3645_vm12, %v3628_v29, %v3381_v49  ;;  %4324 = vmatprep.mubr.msk.bf16.mxu1 %vm3705_vm13, %v3675_v12 }
 0x214   : > { %4309 = vmatmul.mubr.msk.bf16.gmra.mrb[12].mxu0 %vm3705_vm13, %v3661_v52 }
 0x215   : > { %v3397_v43 = vpop.permute.xlu1 %3396 }
 0x216   : > { %v3677_v57 = vsel %vm3645_vm12, %v3644_v50, %v3397_v43 }
 0x217   : > { %4325 = vmatmul.mubr.msk.bf16.gmra.mrb[12].mxu1 %vm3705_vm13, %v3677_v57 }
 0x25d   : > { %v4302_v11 = vpop.f32.mrb[4].mxu0 }
 0x25e   : > { %v3801_v17 = vadd.f32 %v4302_v11, %v6580_v5  ;;  %v3792_v46 = vpop.f32.mrb[5].mxu0 }
 0x25f   : > { %v3793_v44 = vadd.f32 %v6580_v5, %v3792_v46  ;;  %v4303_v26 = vpop.f32.mrb[6].mxu0 }
 0x260   : > { %v3909_v30 = vmax.f32 %v3801_v17, 0.0  ;;  %v3804_v45 = vadd.f32 %v4303_v26, %v6580_v5  ;;  %v3795_v39 = vpop.f32.mrb[7].mxu0 }
 0x261   : > { %v3907_v23 = vmax.f32 %v3793_v44, 0.0  ;;  %v3796_v36 = vadd.f32 %v6580_v5, %v3795_v39 }
 0x262   : > { %v4318_v6 = vpop.f32.mrb[4].mxu1  ;;  %3941 = vst [vmem:[%s6600_s11 + $0x30] sm:$0xff] %v3909_v30  ;;  %v3910_v15 = vmax.f32 %v3804_v45, 0.0 }
 0x263   : > { %v3865_v18 = vadd.f32 %v4318_v6, %v6580_v5  ;;  %v3856_v28 = vpop.f32.mrb[5].mxu1  ;;  %3939 = vst [vmem:[%s6600_s11 + $0x20] sm:$0xff] %v3907_v23  ;;  %v3908_v63 = vmax.f32 %v3796_v36, 0.0 }
 0x264   : > { %v3857_v19 = vadd.f32 %v6580_v5, %v3856_v28  ;;  %v4319_v31 = vpop.f32.mrb[6].mxu1  ;;  %3942 = vst [vmem:[%s6600_s11 + $0x38] sm:$0xff] %v3910_v15 }
 0x265   : > { %v3925_v14 = vmax.f32 %v3865_v18, 0.0  ;;  %v3868_v55 = vadd.f32 %v4319_v31, %v6580_v5  ;;  %v3859_v9 = vpop.f32.mrb[7].mxu1  ;;  %3940 = vst [vmem:[%s6600_s11 + $0x28] sm:$0xff] %v3908_v63 }
 0x266   : > { %v3923_v13 = vmax.f32 %v3857_v19, 0.0  ;;  %v3860_v20 = vadd.f32 %v6580_v5, %v3859_v9 }
 0x267   : > { %3957 = vst [vmem:[%s6600_s11 + $0xb0] sm:$0xff] %v3925_v14  ;;  %v3926_v1 = vmax.f32 %v3868_v55, 0.0 }
 0x268   : > { %3955 = vst [vmem:[%s6600_s11 + $0xa0] sm:$0xff] %v3923_v13  ;;  %v3924_v2 = vmax.f32 %v3860_v20, 0.0 }
 0x269   : > { %3958 = vst [vmem:[%s6600_s11 + $0xb8] sm:$0xff] %v3926_v1 }
 0x26a   : > { %3956 = vst [vmem:[%s6600_s11 + $0xa8] sm:$0xff] %v3924_v2 }
 0x29d   : > { %v4306_v10 = vpop.f32.mrb[8].mxu0 }
 0x29e   : > { %v3817_v38 = vadd.f32 %v4306_v10, %v6580_v5  ;;  %v3808_v58 = vpop.f32.mrb[9].mxu0 }
 0x29f   : > { %v3809_v61 = vadd.f32 %v6580_v5, %v3808_v58  ;;  %v4307_v34 = vpop.f32.mrb[10].mxu0 }
 0x2a0   : > { %v3913_v27 = vmax.f32 %v3817_v38, 0.0  ;;  %v3820_v47 = vadd.f32 %v4307_v34, %v6580_v5  ;;  %v3811_v24 = vpop.f32.mrb[11].mxu0 }
 0x2a1   : > { %v3911_v25 = vmax.f32 %v3809_v61, 0.0  ;;  %v3812_v7 = vadd.f32 %v6580_v5, %v3811_v24 }
 0x2a2   : > { %3945 = vst [vmem:[%s6600_s11 + $0x50] sm:$0xff] %v3913_v27  ;;  %v3914_v48 = vmax.f32 %v3820_v47, 0.0  ;;  %v4322_v3 = vpop.f32.mrb[8].mxu1 }
 0x2a3   : > { %3943 = vst [vmem:[%s6600_s11 + $0x40] sm:$0xff] %v3911_v25  ;;  %v3912_v21 = vmax.f32 %v3812_v7, 0.0  ;;  %v3881_v32 = vadd.f32 %v4322_v3, %v6580_v5  ;;  %v3872_v41 = vpop.f32.mrb[9].mxu1 }
 0x2a4   : > { %3946 = vst [vmem:[%s6600_s11 + $0x58] sm:$0xff] %v3914_v48  ;;  %v3873_v60 = vadd.f32 %v6580_v5, %v3872_v41  ;;  %v4323_v42 = vpop.f32.mrb[10].mxu1 }
 0x2a5   : > { %3944 = vst [vmem:[%s6600_s11 + $0x48] sm:$0xff] %v3912_v21  ;;  %v3929_v35 = vmax.f32 %v3881_v32, 0.0  ;;  %v3884_v51 = vadd.f32 %v4323_v42, %v6580_v5  ;;  %v3875_v37 = vpop.f32.mrb[11].mxu1 }
 0x2a6   : > { %v3927_v54 = vmax.f32 %v3873_v60, 0.0  ;;  %v3876_v8 = vadd.f32 %v6580_v5, %v3875_v37 }
 0x2a7   : > { %3961 = vst [vmem:[%s6600_s11 + $0xd0] sm:$0xff] %v3929_v35  ;;  %v3930_v4 = vmax.f32 %v3884_v51, 0.0 }
 0x2a8   : > { %3959 = vst [vmem:[%s6600_s11 + $0xc0] sm:$0xff] %v3927_v54  ;;  %v3928_v0 = vmax.f32 %v3876_v8, 0.0 }
 0x2a9   : > { %3962 = vst [vmem:[%s6600_s11 + $0xd8] sm:$0xff] %v3930_v4 }
 0x2aa   : > { %3960 = vst [vmem:[%s6600_s11 + $0xc8] sm:$0xff] %v3928_v0 }
 0x2e7   : > { %v4310_v59 = vpop.f32.mrb[12].mxu0 }
 0x2e8   : > { %v3833_v62 = vadd.f32 %v4310_v59, %v6580_v5  ;;  %v3824_v29 = vpop.f32.mrb[13].mxu0 }
 0x2e9   : > { %v3825_v49 = vadd.f32 %v6580_v5, %v3824_v29  ;;  %v4311_v33 = vpop.f32.mrb[14].mxu0 }
 0x2ea   : > { %v3917_v40 = vmax.f32 %v3833_v62, 0.0  ;;  %v3836_v56 = vadd.f32 %v4311_v33, %v6580_v5  ;;  %v3827_v52 = vpop.f32.mrb[15].mxu0  ;;  %v4326_v22 = vpop.f32.mrb[12].mxu1 }
 0x2eb   : > { %v3915_v16 = vmax.f32 %v3825_v49, 0.0  ;;  %v3828_v12 = vadd.f32 %v6580_v5, %v3827_v52  ;;  %v3897_v43 = vadd.f32 %v4326_v22, %v6580_v5  ;;  %v3888_v57 = vpop.f32.mrb[13].mxu1 }
 0x2ec   : > { %3949 = vst [vmem:[%s6600_s11 + $0x70] sm:$0xff] %v3917_v40  ;;  %v3918_v53 = vmax.f32 %v3836_v56, 0.0  ;;  %v3889_v11 = vadd.f32 %v6580_v5, %v3888_v57  ;;  %v4327_v17 = vpop.f32.mrb[14].mxu1 }
 0x2ed   : > { %3947 = vst [vmem:[%s6600_s11 + $0x60] sm:$0xff] %v3915_v16  ;;  %v3916_v50 = vmax.f32 %v3828_v12, 0.0  ;;  %v3933_v46 = vmax.f32 %v3897_v43, 0.0  ;;  %v3900_v44 = vadd.f32 %v4327_v17, %v6580_v5  ;;  %v3891_v26 = vpop.f32.mrb[15].mxu1 }
 0x2ee   : > { %3950 = vst [vmem:[%s6600_s11 + $0x78] sm:$0xff] %v3918_v53  ;;  %v3931_v30 = vmax.f32 %v3889_v11, 0.0  ;;  %v3892_v45 = vadd.f32 %v6580_v5, %v3891_v26 }
 0x2ef   : > { %3948 = vst [vmem:[%s6600_s11 + $0x68] sm:$0xff] %v3916_v50  ;;  %3965 = vst [vmem:[%s6600_s11 + $0xf0] sm:$0xff] %v3933_v46  ;;  %v3934_v39 = vmax.f32 %v3900_v44, 0.0 }
 0x2f0   : > { %3963 = vst [vmem:[%s6600_s11 + $0xe0] sm:$0xff] %v3931_v30  ;;  %v3932_v23 = vmax.f32 %v3892_v45, 0.0 }
 0x2f1   : > { %3966 = vst [vmem:[%s6600_s11 + $0xf8] sm:$0xff] %v3934_v39 }
 0x2f2   : > { %3964 = vst [vmem:[%s6600_s11 + $0xe8] sm:$0xff] %v3932_v23 }
 0x2f3 PF: > { %s13_s12 = sadd.s32 1, %s4426_s12  }
 0x2f4   : > { %p10_p4 = scmp.ge.s32.totalorder %s13_s12, 4  }
 0x2f6   :  { %12 = sbr.rel (!%p10_p4) target bundleno = 1 (0x1), region = 78 }

</bundles_post_ra>
